<compile_context>
chip_gen: v6e
topology: v6e:2x2x1
jax: 0.10.0
libtpu: 0.0.40
codegen_flags: <defaults>
</compile_context>

<pallas_src>
import functools

import jax
import jax.numpy as jnp
from jax.experimental import pallas as pl
from jax.experimental.pallas import tpu as pltpu


def _silu(x):
    return x * jax.nn.sigmoid(x)


def _pick_tile_m(M, target=512):
    """Largest row tile <= target dividing M, preferring >= 4 grid steps
    (two per v7x TensorCore, double-buffered), then >= 2, then any;
    rows kept a multiple of 8 (sublane aligned)."""
    for min_steps in (4, 2, 1):
        for t in range(min(target, M), 7, -1):
            if t % 8 == 0 and M % t == 0 and M // t >= min_steps:
                return t
    return M  # degenerate fallback (tiny / odd M): single grid step


def _pick_tile_h(H, W, c, budget_bytes=2 << 20):
    """Bottleneck row tile: largest divisor of H whose f32 accumulator
    (th*W*c*4B) fits the budget while still giving >= 2 row tiles
    (pipelining + megacore work at N == 1)."""
    divs = sorted((d for d in range(1, H + 1) if H % d == 0), reverse=True)
    for min_tiles in (2, 1):
        for th in divs:
            if th * W * c * 4 <= budget_bytes and H // th >= min_tiles:
                return th
    return H


def _compiler_params(dimension_semantics, working_set_bytes):
    """Scoped-VMEM limit sized from the actual double-buffered block/scratch
    footprint; floor 32 MiB (>= all default scoped limits), cap 64 MiB
    (v7x physical VMEM per TensorCore)."""
    limit = int(min(64 << 20, max(32 << 20, 2 * working_set_bytes + (8 << 20))))
    return pltpu.CompilerParams(dimension_semantics=dimension_semantics,
                                vmem_limit_bytes=limit)


# ------------------- kernel 1: cv1 + cv2 as one fat matmul ------------------

def _cv12_kernel(x_ref, w_ref, b_ref, o1_ref, o2_ref):
    # x_ref: (tm, Cin) bf16; w_ref: (Cin, 2c_) bf16; b_ref: (1, 2c_) f32
    a = jnp.dot(x_ref[...], w_ref[...], preferred_element_type=jnp.float32)
    a = _silu(a + b_ref[...])
    c = o1_ref.shape[1]
    o1_ref[...] = a[:, :c].astype(o1_ref.dtype)
    o2_ref[...] = a[:, c:].astype(o2_ref.dtype)


def fused_cv1_cv2(x2d, w12, b12, c_, *, tile_m=512):
    """(silu(x@w1+b1), silu(x@w2+b2)) as one matmul against [w1|w2]."""
    M, cin = x2d.shape
    two_c = w12.shape[1]
    tm = _pick_tile_m(M, tile_m)
    itm = jnp.dtype(x2d.dtype).itemsize
    ws = 2 * (tm * cin * itm + cin * two_c * itm + two_c * 4 + 2 * tm * c_ * itm)
    return pl.pallas_call(
        _cv12_kernel,
        out_shape=(jax.ShapeDtypeStruct((M, c_), x2d.dtype),
                   jax.ShapeDtypeStruct((M, c_), x2d.dtype)),
        grid_spec=pltpu.PrefetchScalarGridSpec(
            num_scalar_prefetch=0,
            grid=(M // tm,),
            in_specs=[
                pl.BlockSpec((tm, cin), lambda i: (i, 0)),
                pl.BlockSpec((cin, two_c), lambda i: (0, 0)),
                pl.BlockSpec((1, two_c), lambda i: (0, 0)),
            ],
            out_specs=[
                pl.BlockSpec((tm, c_), lambda i: (i, 0)),
                pl.BlockSpec((tm, c_), lambda i: (i, 0)),
            ],
        ),
        compiler_params=_compiler_params(("parallel",), ws),
    )(x2d, w12, b12.reshape(1, two_c))


# --------------- kernel 2: fully fused, H-tiled TBottleneck -----------------

def _tbottleneck_kernel(add, y_ref, w1_ref, b1_ref, w2_ref, b2_ref, o_ref, zp_ref):
    # y_ref : (H, W, c) bf16 whole image (revisited across row tiles, DMA'd once per n)
    # w1_ref: (c, c) bf16 (bottleneck 1x1); b1_ref: (1, c) f32
    # w2_ref: (9, c, c) bf16 (3x3 taps, kh*3+kw); b2_ref: (1, c) f32
    # o_ref : (th, W, c) output row tile
    # zp_ref: VMEM (th+2, W+2, c) bf16 scratch = zero-padded 1x1 activation for this tile
    _, W, c = y_ref.shape
    th = o_ref.shape[0]
    i = pl.program_id(1)
    nh = pl.num_programs(1)
    r0 = i * th
    if th % 8 == 0:
        r0 = pl.multiple_of(r0, 8)

    def conv1(x2d):                     # fused 1x1 + folded-BN bias + SiLU (f32 epilogue)
        z = jnp.dot(x2d, w1_ref[...], preferred_element_type=jnp.float32)
        return _silu(z + b1_ref[...]).astype(zp_ref.dtype)

    # ---- build the zero-padded 1x1 activation in VMEM (halo ring only, O(perimeter)) ----
    zp_ref[:, 0:1, :] = jnp.zeros((th + 2, 1, c), zp_ref.dtype)          # left halo col
    zp_ref[:, W + 1:W + 2, :] = jnp.zeros((th + 2, 1, c), zp_ref.dtype)  # right halo col

    x_tile = y_ref[pl.ds(r0, th), :, :]                                   # (th, W, c)
    zp_ref[1:th + 1, 1:W + 1, :] = conv1(x_tile.reshape(th * W, c)).reshape(th, W, c)

    # top halo row: 1x1 of image row r0-1, zeros at the image border
    @pl.when(i == 0)
    def _():
        zp_ref[0:1, 1:W + 1, :] = jnp.zeros((1, W, c), zp_ref.dtype)

    @pl.when(i > 0)
    def _():
        xt = y_ref[pl.ds(r0 - 1, 1), :, :].reshape(W, c)
        zp_ref[0:1, 1:W + 1, :] = conv1(xt).reshape(1, W, c)

    # bottom halo row: 1x1 of image row r0+th, zeros at the image border
    @pl.when(i == nh - 1)
    def _():
        zp_ref[th + 1:th + 2, 1:W + 1, :] = jnp.zeros((1, W, c), zp_ref.dtype)

    @pl.when(i < nh - 1)
    def _():
        xb = y_ref[pl.ds(r0 + th, 1), :, :].reshape(W, c)
        zp_ref[th + 1:th + 2, 1:W + 1, :] = conv1(xb).reshape(1, W, c)

    # ---- 3x3 conv as 9 accumulating bf16 matmuls on shifted scratch views ----
    acc = jnp.zeros((th * W, c), jnp.float32)
    for dh in range(3):
        for dw in range(3):
            patch = zp_ref[dh:dh + th, dw:dw + W, :]                       # (th, W, c) bf16
            acc = acc + jnp.dot(patch.reshape(th * W, c), w2_ref[dh * 3 + dw],
                                preferred_element_type=jnp.float32)

    out = _silu(acc + b2_ref[...])
    if add:  # residual comes from the input tile already in VMEM (no second DMA)
        out = out + x_tile.reshape(th * W, c).astype(jnp.float32)
    o_ref[...] = out.reshape(th, W, c).astype(o_ref.dtype)


def tbottleneck_fused(y, w1, b1, w2p, b2, *, add):
    """Fused TBottleneck: silu(conv3x3(silu(y@w1+b1)) + b2) (+ y if add).

    y: [N, H, W, c] channels-last bf16; w1: [c, c]; w2p: [9, c, c]; biases f32.
    """
    N, H, W, c = y.shape
    th = _pick_tile_h(H, W, c)
    nh = H // th
    itm = jnp.dtype(y.dtype).itemsize
    ws = (2 * (H * W * c * itm + th * W * c * itm + 10 * c * c * itm + 2 * c * 4)
          + (th + 2) * (W + 2) * c * itm      # bf16 scratch
          + 3 * th * W * c * 4)               # f32 accumulator / intermediates headroom
    # TODO(synk): for very large images, replace the whole-image (revisited) input block by
    # an overlapping halo block (pl.Element) so input VMEM also scales with th, and chain
    # multiple bottlenecks (n > 1) inside one pallas_call to avoid the HBM round-trip of y.
    return pl.pallas_call(
        functools.partial(_tbottleneck_kernel, bool(add)),
        out_shape=jax.ShapeDtypeStruct((N, H, W, c), y.dtype),
        grid_spec=pltpu.PrefetchScalarGridSpec(
            num_scalar_prefetch=0,
            grid=(N, nh),
            in_specs=[
                pl.BlockSpec((None, H, W, c), lambda n, i: (n, 0, 0, 0)),
                pl.BlockSpec((c, c), lambda n, i: (0, 0)),
                pl.BlockSpec((1, c), lambda n, i: (0, 0)),
                pl.BlockSpec((9, c, c), lambda n, i: (0, 0, 0)),
                pl.BlockSpec((1, c), lambda n, i: (0, 0)),
            ],
            out_specs=pl.BlockSpec((None, th, W, c), lambda n, i: (n, i, 0, 0)),
            scratch_shapes=[pltpu.VMEM((th + 2, W + 2, c), y.dtype)],
        ),
        compiler_params=_compiler_params(("parallel", "parallel"), ws),
    )(y, w1, b1.reshape(1, c), w2p, b2.reshape(1, c))


# ------------------- kernel 3: cv3 with the concat folded in ----------------

def _cv3_kernel(ym_ref, y2_ref, wt_ref, wb_ref, b_ref, o_ref):
    acc = jnp.dot(ym_ref[...], wt_ref[...], preferred_element_type=jnp.float32)
    acc = acc + jnp.dot(y2_ref[...], wb_ref[...], preferred_element_type=jnp.float32)
    o_ref[...] = _silu(acc + b_ref[...]).astype(o_ref.dtype)


def fused_concat_cv3(ym, y2, w3_top, w3_bot, b3, out_dtype, *, tile_m=512):
    """silu(concat([ym, y2], ch) @ w3 + b3) without materializing the concat."""
    M, c_ = ym.shape
    cout = w3_top.shape[1]
    tm = _pick_tile_m(M, tile_m)
    itm = jnp.dtype(ym.dtype).itemsize
    ws = 2 * (2 * tm * c_ * itm + 2 * c_ * cout * itm + cout * 4
              + tm * cout * jnp.dtype(out_dtype).itemsize)
    return pl.pallas_call(
        _cv3_kernel,
        out_shape=jax.ShapeDtypeStruct((M, cout), out_dtype),
        grid_spec=pltpu.PrefetchScalarGridSpec(
            num_scalar_prefetch=0,
            grid=(M // tm,),
            in_specs=[
                pl.BlockSpec((tm, c_), lambda i: (i, 0)),
                pl.BlockSpec((tm, c_), lambda i: (i, 0)),
                pl.BlockSpec((c_, cout), lambda i: (0, 0)),
                pl.BlockSpec((c_, cout), lambda i: (0, 0)),
                pl.BlockSpec((1, cout), lambda i: (0, 0)),
            ],
            out_specs=pl.BlockSpec((tm, cout), lambda i: (i, 0)),
        ),
        compiler_params=_compiler_params(("parallel",), ws),
    )(ym, y2, w3_top, w3_bot, b3.reshape(1, cout))


# ------------------------- parameter construction --------------------------

def _fold_bn(w, gamma, beta, mean, var, eps=1e-3):
    # w: (..., Cin, Cout); BatchNorm params are per output channel (last axis).
    scale = gamma / jnp.sqrt(var + eps)
    return w * scale, beta - mean * scale


def _conv_params(key, cin, cout, k):
    """Deterministic params for one `Conv` block (Conv2d(no bias)+BN folded)."""
    kw, kg, kb, km, kv = jax.random.split(key, 5)
    w = jax.random.normal(kw, (k, k, cin, cout), jnp.float32)
    w = w * (1.0 / (k * k * cin) ** 0.5)
    gamma = jax.random.uniform(kg, (cout,), jnp.float32, 0.5, 1.5)
    beta = 0.1 * jax.random.normal(kb, (cout,), jnp.float32)
    mean = 0.1 * jax.random.normal(km, (cout,), jnp.float32)
    var = jax.random.uniform(kv, (cout,), jnp.float32, 0.5, 1.5)
    w_eff, b_eff = _fold_bn(w, gamma, beta, mean, var)
    if k == 1:
        w_eff = w_eff.reshape(cin, cout)
    return w_eff, b_eff


def init_tc3_params(key, c1, c2, n=1, e=0.5):
    c_ = int(c2 * e)
    keys = jax.random.split(key, 3 + 2 * n)
    params = {
        "cv1": _conv_params(keys[0], c1, c_, 1),
        "cv2": _conv_params(keys[1], c1, c_, 1),
        "cv3": _conv_params(keys[2], 2 * c_, c2, 1),
        "m": [],
    }
    for i in range(n):
        # TBottleneck(c_, c_, shortcut, g=1, e=1.0) -> inner channels == c_
        params["m"].append((
            _conv_params(keys[3 + 2 * i], c_, c_, 1),   # bottleneck cv1 (1x1)
            _conv_params(keys[4 + 2 * i], c_, c_, 3),   # bottleneck cv2 (3x3)
        ))
    return params


# -------------------------------- forward ----------------------------------

def tc3_forward(params, x, shortcut=True, compute_dtype=jnp.bfloat16):
    """x: [N, T, C1, H, W] -> [N, C2, H, W] (matches torch NCHW outputs)."""
    # last_frame(): take the last frame along T (squeeze is a no-op for N>1).
    xl = x[:, -1]                                   # [N, C1, H, W]
    xl = jnp.transpose(xl, (0, 2, 3, 1))            # [N, H, W, C1]
    N, H, W, C1 = xl.shape
    x2d = xl.reshape(N * H * W, C1).astype(compute_dtype)

    (w1, b1), (w2, b2), (w3, b3) = params["cv1"], params["cv2"], params["cv3"]
    c_ = w1.shape[1]

    # cv1 & cv2 share a single read of x AND a single MXU weight push.
    w12 = jnp.concatenate([w1, w2], axis=1).astype(compute_dtype)
    b12 = jnp.concatenate([b1, b2]).astype(jnp.float32)
    y1, y2 = fused_cv1_cv2(x2d, w12, b12, c_)

    # TODO(synk): TBottleneck.forward re-applies last_frame() to its already 4-D input,
    # which makes the original torch module non-executable for any shape; we implement the
    # intended C3 bottleneck (y + cv2(cv1(y))) instead.
    y = y1.reshape(N, H, W, c_)
    for (wb1, bb1), (wb2, bb2) in params["m"]:
        w2p = wb2.reshape(9, wb2.shape[2], wb2.shape[3]).astype(compute_dtype)
        y = tbottleneck_fused(y, wb1.astype(compute_dtype), bb1, w2p, bb2,
                              add=bool(shortcut))

    # cv3 over the (virtual) channel concat [m(cv1(x)) | cv2(x)].
    out2d = fused_concat_cv3(y.reshape(N * H * W, c_), y2,
                             w3[:c_].astype(compute_dtype),
                             w3[c_:].astype(compute_dtype),
                             b3, x.dtype)
    C2 = w3.shape[1]
    return jnp.transpose(out2d.reshape(N, H, W, C2), (0, 3, 1, 2))  # NCHW


# ------------------------------ f32 reference -------------------------------

def tc3_reference(params, x, shortcut=True):
    xl = jnp.transpose(x[:, -1].astype(jnp.float32), (0, 2, 3, 1))
    (w1, b1), (w2, b2), (w3, b3) = params["cv1"], params["cv2"], params["cv3"]

    def conv1x1(t, w, b):
        return jax.nn.silu(jnp.einsum("nhwc,cd->nhwd", t, w) + b)

    y1 = conv1x1(xl, w1, b1)
    y2 = conv1x1(xl, w2, b2)
    y = y1
    for (wb1, bb1), (wb2, bb2) in params["m"]:
        z = conv1x1(y, wb1, bb1)
        conv = jax.lax.conv_general_dilated(
            z, wb2, window_strides=(1, 1), padding=((1, 1), (1, 1)),
            dimension_numbers=("NHWC", "HWIO", "NHWC"))
        out = jax.nn.silu(conv + bb2)
        y = y + out if shortcut else out
    cat = jnp.concatenate([y, y2], axis=-1)
    out = jax.nn.silu(jnp.einsum("nhwc,cd->nhwd", cat, w3) + b3)
    return jnp.transpose(out, (0, 3, 1, 2))


if __name__ == "__main__":
    key = jax.random.PRNGKey(0)
    kx, kp = jax.random.split(key)

    N, T, C1, H, W = 2, 3, 8, 16, 16
    C2 = 8   # TC3(c1=8, c2=8, n=1, shortcut=True, g=1, e=0.5) -> c_ = 4

    x = jax.random.normal(kx, (N, T, C1, H, W), jnp.float32)
    params = init_tc3_params(kp, C1, C2, n=1, e=0.5)

    fwd = jax.jit(functools.partial(tc3_forward, shortcut=True))
    out = fwd(params, x)
    out = jax.block_until_ready(out)
    assert out.shape == (N, C2, H, W)
    assert bool(jnp.all(jnp.isfinite(out)))

    ref = tc3_reference(params, x, shortcut=True)
    err = float(jnp.max(jnp.abs(out - ref)))
    assert err < 0.15, f"max abs err vs f32 reference: {err}"
    print("KERNEL_OK")
</pallas_src>

<mosaic_0001>
module attributes {stable_mosaic.version = 11 : i64} {
  func.func @_cv12_kernel(%arg0: i32, %arg1: memref<128x8xbf16, #tpu.memory_space<vmem>>, %arg2: memref<8x8xbf16, #tpu.memory_space<vmem>>, %arg3: memref<1x8xf32, #tpu.memory_space<vmem>>, %arg4: memref<128x4xbf16, #tpu.memory_space<vmem>>, %arg5: memref<128x4xbf16, #tpu.memory_space<vmem>>) attributes {dimension_semantics = [#tpu.dimension_semantics<parallel>], iteration_bounds = array<i64: 4>, scalar_prefetch = 0 : i64, scratch_operands = 0 : i64, tpu.core_type = #tpu.core_type<tc>, window_params = [{transform_indices = @transform_0, window_bounds = array<i64: 128, 8>}, {pipeline_mode = #tpu.pipeline_mode<synchronous>, transform_indices = @transform_1, window_bounds = array<i64: 8, 8>}, {pipeline_mode = #tpu.pipeline_mode<synchronous>, transform_indices = @transform_2, window_bounds = array<i64: 1, 8>}, {transform_indices = @transform_3, window_bounds = array<i64: 128, 4>}, {transform_indices = @transform_4, window_bounds = array<i64: 128, 4>}]} {
    %c0 = arith.constant 0 : index
    %c0_0 = arith.constant 0 : index
    %0 = vector.load %arg1[%c0, %c0_0] : memref<128x8xbf16, #tpu.memory_space<vmem>>, vector<128x8xbf16>
    %c0_1 = arith.constant 0 : index
    %c0_2 = arith.constant 0 : index
    %1 = vector.load %arg2[%c0_1, %c0_2] : memref<8x8xbf16, #tpu.memory_space<vmem>>, vector<8x8xbf16>
    %cst = arith.constant dense<0.000000e+00> : vector<128x8xf32>
    %2 = tpu.matmul %0, %1, %cst {dimension_numbers = #tpu.dot_dimension_numbers<[1], [0], [0], [1], [0, 0, 1, 1], [], []>} : vector<128x8xbf16>, vector<8x8xbf16>, vector<128x8xf32> -> vector<128x8xf32>
    %c0_3 = arith.constant 0 : index
    %c0_4 = arith.constant 0 : index
    %3 = vector.load %arg3[%c0_3, %c0_4] : memref<1x8xf32, #tpu.memory_space<vmem>>, vector<1x8xf32>
    %4 = vector.broadcast %3 : vector<1x8xf32> to vector<128x8xf32>
    %5 = arith.addf %2, %4 : vector<128x8xf32>
    %6 = arith.negf %5 : vector<128x8xf32>
    %7 = math.exp %6 : vector<128x8xf32>
    %cst_5 = arith.constant 1.000000e+00 : f32
    %8 = vector.broadcast %cst_5 : f32 to vector<128x8xf32>
    %9 = arith.addf %8, %7 : vector<128x8xf32>
    %10 = arith.divf %8, %9 : vector<128x8xf32>
    %11 = arith.mulf %5, %10 : vector<128x8xf32>
    %12 = vector.extract_strided_slice %11 {offsets = [0, 0], sizes = [128, 4], strides = [1, 1]} : vector<128x8xf32> to vector<128x4xf32>
    %13 = arith.truncf %12 : vector<128x4xf32> to vector<128x4xbf16>
    %c0_6 = arith.constant 0 : index
    %c0_7 = arith.constant 0 : index
    %14 = vector.load %arg4[%c0_6, %c0_7] : memref<128x4xbf16, #tpu.memory_space<vmem>>, vector<128x4xbf16>
    tpu.vector_store %arg4[%c0_6, %c0_7], %13 {strides = array<i32>} : memref<128x4xbf16, #tpu.memory_space<vmem>>, vector<128x4xbf16>,
    %15 = vector.extract_strided_slice %11 {offsets = [0, 4], sizes = [128, 4], strides = [1, 1]} : vector<128x8xf32> to vector<128x4xf32>
    %16 = arith.truncf %15 : vector<128x4xf32> to vector<128x4xbf16>
    %c0_8 = arith.constant 0 : index
    %c0_9 = arith.constant 0 : index
    %17 = vector.load %arg5[%c0_8, %c0_9] : memref<128x4xbf16, #tpu.memory_space<vmem>>, vector<128x4xbf16>
    tpu.vector_store %arg5[%c0_8, %c0_9], %16 {strides = array<i32>} : memref<128x4xbf16, #tpu.memory_space<vmem>>, vector<128x4xbf16>,
    return
  }
  func.func @transform_0(%arg0: i32) -> (i32, i32) {
    %c0_i32 = arith.constant 0 : i32
    %c0_i32_0 = arith.constant 0 : i32
    return %arg0, %c0_i32 : i32, i32
  }
  func.func @transform_1(%arg0: i32) -> (i32, i32) {
    %c0_i32 = arith.constant 0 : i32
    %c0_i32_0 = arith.constant 0 : i32
    %c0_i32_1 = arith.constant 0 : i32
    return %c0_i32, %c0_i32_0 : i32, i32
  }
  func.func @transform_2(%arg0: i32) -> (i32, i32) {
    %c0_i32 = arith.constant 0 : i32
    %c0_i32_0 = arith.constant 0 : i32
    %c0_i32_1 = arith.constant 0 : i32
    return %c0_i32, %c0_i32_0 : i32, i32
  }
  func.func @transform_3(%arg0: i32) -> (i32, i32) {
    %c0_i32 = arith.constant 0 : i32
    %c0_i32_0 = arith.constant 0 : i32
    return %arg0, %c0_i32 : i32, i32
  }
  func.func @transform_4(%arg0: i32) -> (i32, i32) {
    %c0_i32 = arith.constant 0 : i32
    %c0_i32_0 = arith.constant 0 : i32
    return %arg0, %c0_i32 : i32, i32
  }
}

module attributes {stable_mosaic.version = 11 : i64} {
  func.func @_cv3_kernel(%arg0: i32, %arg1: memref<128x4xbf16, #tpu.memory_space<vmem>>, %arg2: memref<128x4xbf16, #tpu.memory_space<vmem>>, %arg3: memref<4x8xbf16, #tpu.memory_space<vmem>>, %arg4: memref<4x8xbf16, #tpu.memory_space<vmem>>, %arg5: memref<1x8xf32, #tpu.memory_space<vmem>>, %arg6: memref<128x8xf32, #tpu.memory_space<vmem>>) attributes {dimension_semantics = [#tpu.dimension_semantics<parallel>], iteration_bounds = array<i64: 4>, scalar_prefetch = 0 : i64, scratch_operands = 0 : i64, tpu.core_type = #tpu.core_type<tc>, window_params = [{transform_indices = @transform_0, window_bounds = array<i64: 128, 4>}, {transform_indices = @transform_1, window_bounds = array<i64: 128, 4>}, {pipeline_mode = #tpu.pipeline_mode<synchronous>, transform_indices = @transform_2, window_bounds = array<i64: 4, 8>}, {pipeline_mode = #tpu.pipeline_mode<synchronous>, transform_indices = @transform_3, window_bounds = array<i64: 4, 8>}, {pipeline_mode = #tpu.pipeline_mode<synchronous>, transform_indices = @transform_4, window_bounds = array<i64: 1, 8>}, {transform_indices = @transform_5, window_bounds = array<i64: 128, 8>}]} {
    %c0 = arith.constant 0 : index
    %c0_0 = arith.constant 0 : index
    %0 = vector.load %arg1[%c0, %c0_0] : memref<128x4xbf16, #tpu.memory_space<vmem>>, vector<128x4xbf16>
    %c0_1 = arith.constant 0 : index
    %c0_2 = arith.constant 0 : index
    %1 = vector.load %arg3[%c0_1, %c0_2] : memref<4x8xbf16, #tpu.memory_space<vmem>>, vector<4x8xbf16>
    %cst = arith.constant dense<0.000000e+00> : vector<128x8xf32>
    %2 = tpu.matmul %0, %1, %cst {dimension_numbers = #tpu.dot_dimension_numbers<[1], [0], [0], [1], [0, 0, 1, 1], [], []>} : vector<128x4xbf16>, vector<4x8xbf16>, vector<128x8xf32> -> vector<128x8xf32>
    %c0_3 = arith.constant 0 : index
    %c0_4 = arith.constant 0 : index
    %3 = vector.load %arg2[%c0_3, %c0_4] : memref<128x4xbf16, #tpu.memory_space<vmem>>, vector<128x4xbf16>
    %c0_5 = arith.constant 0 : index
    %c0_6 = arith.constant 0 : index
    %4 = vector.load %arg4[%c0_5, %c0_6] : memref<4x8xbf16, #tpu.memory_space<vmem>>, vector<4x8xbf16>
    %cst_7 = arith.constant dense<0.000000e+00> : vector<128x8xf32>
    %5 = tpu.matmul %3, %4, %cst_7 {dimension_numbers = #tpu.dot_dimension_numbers<[1], [0], [0], [1], [0, 0, 1, 1], [], []>} : vector<128x4xbf16>, vector<4x8xbf16>, vector<128x8xf32> -> vector<128x8xf32>
    %6 = arith.addf %2, %5 : vector<128x8xf32>
    %c0_8 = arith.constant 0 : index
    %c0_9 = arith.constant 0 : index
    %7 = vector.load %arg5[%c0_8, %c0_9] : memref<1x8xf32, #tpu.memory_space<vmem>>, vector<1x8xf32>
    %8 = vector.broadcast %7 : vector<1x8xf32> to vector<128x8xf32>
    %9 = arith.addf %6, %8 : vector<128x8xf32>
    %10 = arith.negf %9 : vector<128x8xf32>
    %11 = math.exp %10 : vector<128x8xf32>
    %cst_10 = arith.constant 1.000000e+00 : f32
    %12 = vector.broadcast %cst_10 : f32 to vector<128x8xf32>
    %13 = arith.addf %12, %11 : vector<128x8xf32>
    %14 = arith.divf %12, %13 : vector<128x8xf32>
    %15 = arith.mulf %9, %14 : vector<128x8xf32>
    %c0_11 = arith.constant 0 : index
    %c0_12 = arith.constant 0 : index
    %16 = vector.load %arg6[%c0_11, %c0_12] : memref<128x8xf32, #tpu.memory_space<vmem>>, vector<128x8xf32>
    tpu.vector_store %arg6[%c0_11, %c0_12], %15 {strides = array<i32>} : memref<128x8xf32, #tpu.memory_space<vmem>>, vector<128x8xf32>,
    return
  }
  func.func @transform_0(%arg0: i32) -> (i32, i32) {
    %c0_i32 = arith.constant 0 : i32
    %c0_i32_0 = arith.constant 0 : i32
    return %arg0, %c0_i32 : i32, i32
  }
  func.func @transform_1(%arg0: i32) -> (i32, i32) {
    %c0_i32 = arith.constant 0 : i32
    %c0_i32_0 = arith.constant 0 : i32
    return %arg0, %c0_i32 : i32, i32
  }
  func.func @transform_2(%arg0: i32) -> (i32, i32) {
    %c0_i32 = arith.constant 0 : i32
    %c0_i32_0 = arith.constant 0 : i32
    %c0_i32_1 = arith.constant 0 : i32
    return %c0_i32, %c0_i32_0 : i32, i32
  }
  func.func @transform_3(%arg0: i32) -> (i32, i32) {
    %c0_i32 = arith.constant 0 : i32
    %c0_i32_0 = arith.constant 0 : i32
    %c0_i32_1 = arith.constant 0 : i32
    return %c0_i32, %c0_i32_0 : i32, i32
  }
  func.func @transform_4(%arg0: i32) -> (i32, i32) {
    %c0_i32 = arith.constant 0 : i32
    %c0_i32_0 = arith.constant 0 : i32
    %c0_i32_1 = arith.constant 0 : i32
    return %c0_i32, %c0_i32_0 : i32, i32
  }
  func.func @transform_5(%arg0: i32) -> (i32, i32) {
    %c0_i32 = arith.constant 0 : i32
    %c0_i32_0 = arith.constant 0 : i32
    return %arg0, %c0_i32 : i32, i32
  }
}

module attributes {stable_mosaic.version = 11 : i64} {
  func.func @_tbottleneck_kernel(%arg0: i32, %arg1: i32, %arg2: memref<1x16x16x4xbf16, #tpu.memory_space<vmem>>, %arg3: memref<4x4xbf16, #tpu.memory_space<vmem>>, %arg4: memref<1x4xf32, #tpu.memory_space<vmem>>, %arg5: memref<9x4x4xbf16, #tpu.memory_space<vmem>>, %arg6: memref<1x4xf32, #tpu.memory_space<vmem>>, %arg7: memref<1x8x16x4xbf16, #tpu.memory_space<vmem>>, %arg8: memref<10x18x4xbf16, #tpu.memory_space<vmem>>) attributes {dimension_semantics = [#tpu.dimension_semantics<parallel>, #tpu.dimension_semantics<parallel>], iteration_bounds = array<i64: 2, 2>, scalar_prefetch = 0 : i64, scratch_operands = 1 : i64, tpu.core_type = #tpu.core_type<tc>, window_params = [{transform_indices = @transform_0, window_bounds = array<i64: 1, 16, 16, 4>}, {pipeline_mode = #tpu.pipeline_mode<synchronous>, transform_indices = @transform_1, window_bounds = array<i64: 4, 4>}, {pipeline_mode = #tpu.pipeline_mode<synchronous>, transform_indices = @transform_2, window_bounds = array<i64: 1, 4>}, {pipeline_mode = #tpu.pipeline_mode<synchronous>, transform_indices = @transform_3, window_bounds = array<i64: 9, 4, 4>}, {pipeline_mode = #tpu.pipeline_mode<synchronous>, transform_indices = @transform_4, window_bounds = array<i64: 1, 4>}, {transform_indices = @transform_5, window_bounds = array<i64: 1, 8, 16, 4>}]} {
    %c8_i32 = arith.constant 8 : i32
    %0 = arith.muli %arg1, %c8_i32 : i32
    %1 = tpu.assume_multiple %0, 8 : i32
    %cst = arith.constant 0.000000e+00 : bf16
    %2 = vector.broadcast %cst : bf16 to vector<10x1x4xbf16>
    %c0 = arith.constant 0 : index
    %c0_0 = arith.constant 0 : index
    %c0_1 = arith.constant 0 : index
    %3 = vector.load %arg8[%c0, %c0_0, %c0_1] : memref<10x18x4xbf16, #tpu.memory_space<vmem>>, vector<10x1x4xbf16>
    tpu.vector_store %arg8[%c0, %c0_0, %c0_1], %2 {strides = array<i32>} : memref<10x18x4xbf16, #tpu.memory_space<vmem>>, vector<10x1x4xbf16>,
    %cst_2 = arith.constant 0.000000e+00 : bf16
    %4 = vector.broadcast %cst_2 : bf16 to vector<10x1x4xbf16>
    %c0_3 = arith.constant 0 : index
    %c17 = arith.constant 17 : index
    %c0_4 = arith.constant 0 : index
    %5 = vector.load %arg8[%c0_3, %c17, %c0_4] : memref<10x18x4xbf16, #tpu.memory_space<vmem>>, vector<10x1x4xbf16>
    tpu.vector_store %arg8[%c0_3, %c17, %c0_4], %4 {strides = array<i32>} : memref<10x18x4xbf16, #tpu.memory_space<vmem>>, vector<10x1x4xbf16>,
    %c0_5 = arith.constant 0 : index
    %6 = arith.index_cast %1 : i32 to index
    %c0_6 = arith.constant 0 : index
    %c0_7 = arith.constant 0 : index
    %7 = vector.load %arg2[%c0_5, %6, %c0_6, %c0_7] : memref<1x16x16x4xbf16, #tpu.memory_space<vmem>>, vector<1x8x16x4xbf16>
    %8 = vector.shape_cast %7 : vector<1x8x16x4xbf16> to vector<8x16x4xbf16>
    %9 = vector.shape_cast %8 : vector<8x16x4xbf16> to vector<128x4xbf16>
    %c0_8 = arith.constant 0 : index
    %c0_9 = arith.constant 0 : index
    %10 = vector.load %arg3[%c0_8, %c0_9] : memref<4x4xbf16, #tpu.memory_space<vmem>>, vector<4x4xbf16>
    %cst_10 = arith.constant dense<0.000000e+00> : vector<128x4xf32>
    %11 = tpu.matmul %9, %10, %cst_10 {dimension_numbers = #tpu.dot_dimension_numbers<[1], [0], [0], [1], [0, 0, 1, 1], [], []>} : vector<128x4xbf16>, vector<4x4xbf16>, vector<128x4xf32> -> vector<128x4xf32>
    %c0_11 = arith.constant 0 : index
    %c0_12 = arith.constant 0 : index
    %12 = vector.load %arg4[%c0_11, %c0_12] : memref<1x4xf32, #tpu.memory_space<vmem>>, vector<1x4xf32>
    %13 = vector.broadcast %12 : vector<1x4xf32> to vector<128x4xf32>
    %14 = arith.addf %11, %13 : vector<128x4xf32>
    %15 = arith.negf %14 : vector<128x4xf32>
    %16 = math.exp %15 : vector<128x4xf32>
    %cst_13 = arith.constant 1.000000e+00 : f32
    %17 = vector.broadcast %cst_13 : f32 to vector<128x4xf32>
    %18 = arith.addf %17, %16 : vector<128x4xf32>
    %19 = arith.divf %17, %18 : vector<128x4xf32>
    %20 = arith.mulf %14, %19 : vector<128x4xf32>
    %21 = arith.truncf %20 : vector<128x4xf32> to vector<128x4xbf16>
    %22 = vector.shape_cast %21 : vector<128x4xbf16> to vector<8x16x4xbf16>
    %c1 = arith.constant 1 : index
    %c1_14 = arith.constant 1 : index
    %c0_15 = arith.constant 0 : index
    %23 = vector.load %arg8[%c1, %c1_14, %c0_15] : memref<10x18x4xbf16, #tpu.memory_space<vmem>>, vector<8x16x4xbf16>
    tpu.vector_store %arg8[%c1, %c1_14, %c0_15], %22 {strides = array<i32>} : memref<10x18x4xbf16, #tpu.memory_space<vmem>>, vector<8x16x4xbf16>,
    %c0_i32 = arith.constant 0 : i32
    %24 = arith.cmpi eq, %arg1, %c0_i32 : i32
    %25 = arith.extui %24 : i1 to i32
    %c0_i32_16 = arith.constant 0 : i32
    %26 = arith.cmpi ne, %25, %c0_i32_16 : i32
    scf.if %26 {
      %cst_86 = arith.constant 0.000000e+00 : bf16
      %108 = vector.broadcast %cst_86 : bf16 to vector<1x16x4xbf16>
      %c0_87 = arith.constant 0 : index
      %c1_88 = arith.constant 1 : index
      %c0_89 = arith.constant 0 : index
      %109 = vector.load %arg8[%c0_87, %c1_88, %c0_89] : memref<10x18x4xbf16, #tpu.memory_space<vmem>>, vector<1x16x4xbf16>
      tpu.vector_store %arg8[%c0_87, %c1_88, %c0_89], %108 {strides = array<i32>} : memref<10x18x4xbf16, #tpu.memory_space<vmem>>, vector<1x16x4xbf16>,
    } else {
    }
    %c0_i32_17 = arith.constant 0 : i32
    %27 = arith.cmpi sgt, %arg1, %c0_i32_17 : i32
    %28 = arith.extui %27 : i1 to i32
    %c0_i32_18 = arith.constant 0 : i32
    %29 = arith.cmpi ne, %28, %c0_i32_18 : i32
    scf.if %29 {
      %c1_i32_86 = arith.constant 1 : i32
      %108 = arith.subi %1, %c1_i32_86 : i32
      %c0_87 = arith.constant 0 : index
      %109 = arith.index_cast %108 : i32 to index
      %c0_88 = arith.constant 0 : index
      %c0_89 = arith.constant 0 : index
      %110 = vector.load %arg2[%c0_87, %109, %c0_88, %c0_89] : memref<1x16x16x4xbf16, #tpu.memory_space<vmem>>, vector<1x1x16x4xbf16>
      %111 = vector.shape_cast %110 : vector<1x1x16x4xbf16> to vector<1x16x4xbf16>
      %112 = vector.shape_cast %111 : vector<1x16x4xbf16> to vector<16x4xbf16>
      %c0_90 = arith.constant 0 : index
      %c0_91 = arith.constant 0 : index
      %113 = vector.load %arg3[%c0_90, %c0_91] : memref<4x4xbf16, #tpu.memory_space<vmem>>, vector<4x4xbf16>
      %cst_92 = arith.constant dense<0.000000e+00> : vector<16x4xf32>
      %114 = tpu.matmul %112, %113, %cst_92 {dimension_numbers = #tpu.dot_dimension_numbers<[1], [0], [0], [1], [0, 0, 1, 1], [], []>} : vector<16x4xbf16>, vector<4x4xbf16>, vector<16x4xf32> -> vector<16x4xf32>
      %c0_93 = arith.constant 0 : index
      %c0_94 = arith.constant 0 : index
      %115 = vector.load %arg4[%c0_93, %c0_94] : memref<1x4xf32, #tpu.memory_space<vmem>>, vector<1x4xf32>
      %116 = vector.broadcast %115 : vector<1x4xf32> to vector<16x4xf32>
      %117 = arith.addf %114, %116 : vector<16x4xf32>
      %118 = arith.negf %117 : vector<16x4xf32>
      %119 = math.exp %118 : vector<16x4xf32>
      %cst_95 = arith.constant 1.000000e+00 : f32
      %120 = vector.broadcast %cst_95 : f32 to vector<16x4xf32>
      %121 = arith.addf %120, %119 : vector<16x4xf32>
      %122 = arith.divf %120, %121 : vector<16x4xf32>
      %123 = arith.mulf %117, %122 : vector<16x4xf32>
      %124 = arith.truncf %123 : vector<16x4xf32> to vector<16x4xbf16>
      %125 = vector.shape_cast %124 : vector<16x4xbf16> to vector<1x16x4xbf16>
      %c0_96 = arith.constant 0 : index
      %c1_97 = arith.constant 1 : index
      %c0_98 = arith.constant 0 : index
      %126 = vector.load %arg8[%c0_96, %c1_97, %c0_98] : memref<10x18x4xbf16, #tpu.memory_space<vmem>>, vector<1x16x4xbf16>
      tpu.vector_store %arg8[%c0_96, %c1_97, %c0_98], %125 {strides = array<i32>} : memref<10x18x4xbf16, #tpu.memory_space<vmem>>, vector<1x16x4xbf16>,
    } else {
    }
    %c1_i32 = arith.constant 1 : i32
    %30 = arith.cmpi eq, %arg1, %c1_i32 : i32
    %31 = arith.extui %30 : i1 to i32
    %c0_i32_19 = arith.constant 0 : i32
    %32 = arith.cmpi ne, %31, %c0_i32_19 : i32
    scf.if %32 {
      %cst_86 = arith.constant 0.000000e+00 : bf16
      %108 = vector.broadcast %cst_86 : bf16 to vector<1x16x4xbf16>
      %c9 = arith.constant 9 : index
      %c1_87 = arith.constant 1 : index
      %c0_88 = arith.constant 0 : index
      %109 = vector.load %arg8[%c9, %c1_87, %c0_88] : memref<10x18x4xbf16, #tpu.memory_space<vmem>>, vector<1x16x4xbf16>
      tpu.vector_store %arg8[%c9, %c1_87, %c0_88], %108 {strides = array<i32>} : memref<10x18x4xbf16, #tpu.memory_space<vmem>>, vector<1x16x4xbf16>,
    } else {
    }
    %c1_i32_20 = arith.constant 1 : i32
    %33 = arith.cmpi slt, %arg1, %c1_i32_20 : i32
    %34 = arith.extui %33 : i1 to i32
    %c0_i32_21 = arith.constant 0 : i32
    %35 = arith.cmpi ne, %34, %c0_i32_21 : i32
    scf.if %35 {
      %c8_i32_86 = arith.constant 8 : i32
      %108 = arith.addi %1, %c8_i32_86 : i32
      %c0_87 = arith.constant 0 : index
      %109 = arith.index_cast %108 : i32 to index
      %c0_88 = arith.constant 0 : index
      %c0_89 = arith.constant 0 : index
      %110 = vector.load %arg2[%c0_87, %109, %c0_88, %c0_89] : memref<1x16x16x4xbf16, #tpu.memory_space<vmem>>, vector<1x1x16x4xbf16>
      %111 = vector.shape_cast %110 : vector<1x1x16x4xbf16> to vector<1x16x4xbf16>
      %112 = vector.shape_cast %111 : vector<1x16x4xbf16> to vector<16x4xbf16>
      %c0_90 = arith.constant 0 : index
      %c0_91 = arith.constant 0 : index
      %113 = vector.load %arg3[%c0_90, %c0_91] : memref<4x4xbf16, #tpu.memory_space<vmem>>, vector<4x4xbf16>
      %cst_92 = arith.constant dense<0.000000e+00> : vector<16x4xf32>
      %114 = tpu.matmul %112, %113, %cst_92 {dimension_numbers = #tpu.dot_dimension_numbers<[1], [0], [0], [1], [0, 0, 1, 1], [], []>} : vector<16x4xbf16>, vector<4x4xbf16>, vector<16x4xf32> -> vector<16x4xf32>
      %c0_93 = arith.constant 0 : index
      %c0_94 = arith.constant 0 : index
      %115 = vector.load %arg4[%c0_93, %c0_94] : memref<1x4xf32, #tpu.memory_space<vmem>>, vector<1x4xf32>
      %116 = vector.broadcast %115 : vector<1x4xf32> to vector<16x4xf32>
      %117 = arith.addf %114, %116 : vector<16x4xf32>
      %118 = arith.negf %117 : vector<16x4xf32>
      %119 = math.exp %118 : vector<16x4xf32>
      %cst_95 = arith.constant 1.000000e+00 : f32
      %120 = vector.broadcast %cst_95 : f32 to vector<16x4xf32>
      %121 = arith.addf %120, %119 : vector<16x4xf32>
      %122 = arith.divf %120, %121 : vector<16x4xf32>
      %123 = arith.mulf %117, %122 : vector<16x4xf32>
      %124 = arith.truncf %123 : vector<16x4xf32> to vector<16x4xbf16>
      %125 = vector.shape_cast %124 : vector<16x4xbf16> to vector<1x16x4xbf16>
      %c9 = arith.constant 9 : index
      %c1_96 = arith.constant 1 : index
      %c0_97 = arith.constant 0 : index
      %126 = vector.load %arg8[%c9, %c1_96, %c0_97] : memref<10x18x4xbf16, #tpu.memory_space<vmem>>, vector<1x16x4xbf16>
      tpu.vector_store %arg8[%c9, %c1_96, %c0_97], %125 {strides = array<i32>} : memref<10x18x4xbf16, #tpu.memory_space<vmem>>, vector<1x16x4xbf16>,
    } else {
    }
    %cst_22 = arith.constant 0.000000e+00 : f32
    %36 = vector.broadcast %cst_22 : f32 to vector<128x4xf32>
    %c0_23 = arith.constant 0 : index
    %c0_24 = arith.constant 0 : index
    %c0_25 = arith.constant 0 : index
    %37 = vector.load %arg8[%c0_23, %c0_24, %c0_25] : memref<10x18x4xbf16, #tpu.memory_space<vmem>>, vector<8x16x4xbf16>
    %38 = vector.shape_cast %37 : vector<8x16x4xbf16> to vector<128x4xbf16>
    %c0_26 = arith.constant 0 : index
    %c0_27 = arith.constant 0 : index
    %c0_28 = arith.constant 0 : index
    %39 = vector.load %arg5[%c0_26, %c0_27, %c0_28] : memref<9x4x4xbf16, #tpu.memory_space<vmem>>, vector<1x4x4xbf16>
    %40 = vector.shape_cast %39 : vector<1x4x4xbf16> to vector<4x4xbf16>
    %cst_29 = arith.constant dense<0.000000e+00> : vector<128x4xf32>
    %41 = tpu.matmul %38, %40, %cst_29 {dimension_numbers = #tpu.dot_dimension_numbers<[1], [0], [0], [1], [0, 0, 1, 1], [], []>} : vector<128x4xbf16>, vector<4x4xbf16>, vector<128x4xf32> -> vector<128x4xf32>
    %42 = arith.addf %36, %41 : vector<128x4xf32>
    %c0_30 = arith.constant 0 : index
    %c1_31 = arith.constant 1 : index
    %c0_32 = arith.constant 0 : index
    %43 = vector.load %arg8[%c0_30, %c1_31, %c0_32] : memref<10x18x4xbf16, #tpu.memory_space<vmem>>, vector<8x16x4xbf16>
    %44 = vector.shape_cast %43 : vector<8x16x4xbf16> to vector<128x4xbf16>
    %c1_33 = arith.constant 1 : index
    %c0_34 = arith.constant 0 : index
    %c0_35 = arith.constant 0 : index
    %45 = vector.load %arg5[%c1_33, %c0_34, %c0_35] : memref<9x4x4xbf16, #tpu.memory_space<vmem>>, vector<1x4x4xbf16>
    %46 = vector.shape_cast %45 : vector<1x4x4xbf16> to vector<4x4xbf16>
    %cst_36 = arith.constant dense<0.000000e+00> : vector<128x4xf32>
    %47 = tpu.matmul %44, %46, %cst_36 {dimension_numbers = #tpu.dot_dimension_numbers<[1], [0], [0], [1], [0, 0, 1, 1], [], []>} : vector<128x4xbf16>, vector<4x4xbf16>, vector<128x4xf32> -> vector<128x4xf32>
    %48 = arith.addf %42, %47 : vector<128x4xf32>
    %c0_37 = arith.constant 0 : index
    %c2 = arith.constant 2 : index
    %c0_38 = arith.constant 0 : index
    %49 = vector.load %arg8[%c0_37, %c2, %c0_38] : memref<10x18x4xbf16, #tpu.memory_space<vmem>>, vector<8x16x4xbf16>
    %50 = vector.shape_cast %49 : vector<8x16x4xbf16> to vector<128x4xbf16>
    %c2_39 = arith.constant 2 : index
    %c0_40 = arith.constant 0 : index
    %c0_41 = arith.constant 0 : index
    %51 = vector.load %arg5[%c2_39, %c0_40, %c0_41] : memref<9x4x4xbf16, #tpu.memory_space<vmem>>, vector<1x4x4xbf16>
    %52 = vector.shape_cast %51 : vector<1x4x4xbf16> to vector<4x4xbf16>
    %cst_42 = arith.constant dense<0.000000e+00> : vector<128x4xf32>
    %53 = tpu.matmul %50, %52, %cst_42 {dimension_numbers = #tpu.dot_dimension_numbers<[1], [0], [0], [1], [0, 0, 1, 1], [], []>} : vector<128x4xbf16>, vector<4x4xbf16>, vector<128x4xf32> -> vector<128x4xf32>
    %54 = arith.addf %48, %53 : vector<128x4xf32>
    %c1_43 = arith.constant 1 : index
    %c0_44 = arith.constant 0 : index
    %c0_45 = arith.constant 0 : index
    %55 = vector.load %arg8[%c1_43, %c0_44, %c0_45] : memref<10x18x4xbf16, #tpu.memory_space<vmem>>, vector<8x16x4xbf16>
    %56 = vector.shape_cast %55 : vector<8x16x4xbf16> to vector<128x4xbf16>
    %c3 = arith.constant 3 : index
    %c0_46 = arith.constant 0 : index
    %c0_47 = arith.constant 0 : index
    %57 = vector.load %arg5[%c3, %c0_46, %c0_47] : memref<9x4x4xbf16, #tpu.memory_space<vmem>>, vector<1x4x4xbf16>
    %58 = vector.shape_cast %57 : vector<1x4x4xbf16> to vector<4x4xbf16>
    %cst_48 = arith.constant dense<0.000000e+00> : vector<128x4xf32>
    %59 = tpu.matmul %56, %58, %cst_48 {dimension_numbers = #tpu.dot_dimension_numbers<[1], [0], [0], [1], [0, 0, 1, 1], [], []>} : vector<128x4xbf16>, vector<4x4xbf16>, vector<128x4xf32> -> vector<128x4xf32>
    %60 = arith.addf %54, %59 : vector<128x4xf32>
    %c1_49 = arith.constant 1 : index
    %c1_50 = arith.constant 1 : index
    %c0_51 = arith.constant 0 : index
    %61 = vector.load %arg8[%c1_49, %c1_50, %c0_51] : memref<10x18x4xbf16, #tpu.memory_space<vmem>>, vector<8x16x4xbf16>
    %62 = vector.shape_cast %61 : vector<8x16x4xbf16> to vector<128x4xbf16>
    %c4 = arith.constant 4 : index
    %c0_52 = arith.constant 0 : index
    %c0_53 = arith.constant 0 : index
    %63 = vector.load %arg5[%c4, %c0_52, %c0_53] : memref<9x4x4xbf16, #tpu.memory_space<vmem>>, vector<1x4x4xbf16>
    %64 = vector.shape_cast %63 : vector<1x4x4xbf16> to vector<4x4xbf16>
    %cst_54 = arith.constant dense<0.000000e+00> : vector<128x4xf32>
    %65 = tpu.matmul %62, %64, %cst_54 {dimension_numbers = #tpu.dot_dimension_numbers<[1], [0], [0], [1], [0, 0, 1, 1], [], []>} : vector<128x4xbf16>, vector<4x4xbf16>, vector<128x4xf32> -> vector<128x4xf32>
    %66 = arith.addf %60, %65 : vector<128x4xf32>
    %c1_55 = arith.constant 1 : index
    %c2_56 = arith.constant 2 : index
    %c0_57 = arith.constant 0 : index
    %67 = vector.load %arg8[%c1_55, %c2_56, %c0_57] : memref<10x18x4xbf16, #tpu.memory_space<vmem>>, vector<8x16x4xbf16>
    %68 = vector.shape_cast %67 : vector<8x16x4xbf16> to vector<128x4xbf16>
    %c5 = arith.constant 5 : index
    %c0_58 = arith.constant 0 : index
    %c0_59 = arith.constant 0 : index
    %69 = vector.load %arg5[%c5, %c0_58, %c0_59] : memref<9x4x4xbf16, #tpu.memory_space<vmem>>, vector<1x4x4xbf16>
    %70 = vector.shape_cast %69 : vector<1x4x4xbf16> to vector<4x4xbf16>
    %cst_60 = arith.constant dense<0.000000e+00> : vector<128x4xf32>
    %71 = tpu.matmul %68, %70, %cst_60 {dimension_numbers = #tpu.dot_dimension_numbers<[1], [0], [0], [1], [0, 0, 1, 1], [], []>} : vector<128x4xbf16>, vector<4x4xbf16>, vector<128x4xf32> -> vector<128x4xf32>
    %72 = arith.addf %66, %71 : vector<128x4xf32>
    %c2_61 = arith.constant 2 : index
    %c0_62 = arith.constant 0 : index
    %c0_63 = arith.constant 0 : index
    %73 = vector.load %arg8[%c2_61, %c0_62, %c0_63] : memref<10x18x4xbf16, #tpu.memory_space<vmem>>, vector<8x16x4xbf16>
    %74 = vector.shape_cast %73 : vector<8x16x4xbf16> to vector<128x4xbf16>
    %c6 = arith.constant 6 : index
    %c0_64 = arith.constant 0 : index
    %c0_65 = arith.constant 0 : index
    %75 = vector.load %arg5[%c6, %c0_64, %c0_65] : memref<9x4x4xbf16, #tpu.memory_space<vmem>>, vector<1x4x4xbf16>
    %76 = vector.shape_cast %75 : vector<1x4x4xbf16> to vector<4x4xbf16>
    %cst_66 = arith.constant dense<0.000000e+00> : vector<128x4xf32>
    %77 = tpu.matmul %74, %76, %cst_66 {dimension_numbers = #tpu.dot_dimension_numbers<[1], [0], [0], [1], [0, 0, 1, 1], [], []>} : vector<128x4xbf16>, vector<4x4xbf16>, vector<128x4xf32> -> vector<128x4xf32>
    %78 = arith.addf %72, %77 : vector<128x4xf32>
    %c2_67 = arith.constant 2 : index
    %c1_68 = arith.constant 1 : index
    %c0_69 = arith.constant 0 : index
    %79 = vector.load %arg8[%c2_67, %c1_68, %c0_69] : memref<10x18x4xbf16, #tpu.memory_space<vmem>>, vector<8x16x4xbf16>
    %80 = vector.shape_cast %79 : vector<8x16x4xbf16> to vector<128x4xbf16>
    %c7 = arith.constant 7 : index
    %c0_70 = arith.constant 0 : index
    %c0_71 = arith.constant 0 : index
    %81 = vector.load %arg5[%c7, %c0_70, %c0_71] : memref<9x4x4xbf16, #tpu.memory_space<vmem>>, vector<1x4x4xbf16>
    %82 = vector.shape_cast %81 : vector<1x4x4xbf16> to vector<4x4xbf16>
    %cst_72 = arith.constant dense<0.000000e+00> : vector<128x4xf32>
    %83 = tpu.matmul %80, %82, %cst_72 {dimension_numbers = #tpu.dot_dimension_numbers<[1], [0], [0], [1], [0, 0, 1, 1], [], []>} : vector<128x4xbf16>, vector<4x4xbf16>, vector<128x4xf32> -> vector<128x4xf32>
    %84 = arith.addf %78, %83 : vector<128x4xf32>
    %c2_73 = arith.constant 2 : index
    %c2_74 = arith.constant 2 : index
    %c0_75 = arith.constant 0 : index
    %85 = vector.load %arg8[%c2_73, %c2_74, %c0_75] : memref<10x18x4xbf16, #tpu.memory_space<vmem>>, vector<8x16x4xbf16>
    %86 = vector.shape_cast %85 : vector<8x16x4xbf16> to vector<128x4xbf16>
    %c8 = arith.constant 8 : index
    %c0_76 = arith.constant 0 : index
    %c0_77 = arith.constant 0 : index
    %87 = vector.load %arg5[%c8, %c0_76, %c0_77] : memref<9x4x4xbf16, #tpu.memory_space<vmem>>, vector<1x4x4xbf16>
    %88 = vector.shape_cast %87 : vector<1x4x4xbf16> to vector<4x4xbf16>
    %cst_78 = arith.constant dense<0.000000e+00> : vector<128x4xf32>
    %89 = tpu.matmul %86, %88, %cst_78 {dimension_numbers = #tpu.dot_dimension_numbers<[1], [0], [0], [1], [0, 0, 1, 1], [], []>} : vector<128x4xbf16>, vector<4x4xbf16>, vector<128x4xf32> -> vector<128x4xf32>
    %90 = arith.addf %84, %89 : vector<128x4xf32>
    %c0_79 = arith.constant 0 : index
    %c0_80 = arith.constant 0 : index
    %91 = vector.load %arg6[%c0_79, %c0_80] : memref<1x4xf32, #tpu.memory_space<vmem>>, vector<1x4xf32>
    %92 = vector.broadcast %91 : vector<1x4xf32> to vector<128x4xf32>
    %93 = arith.addf %90, %92 : vector<128x4xf32>
    %94 = arith.negf %93 : vector<128x4xf32>
    %95 = math.exp %94 : vector<128x4xf32>
    %cst_81 = arith.constant 1.000000e+00 : f32
    %96 = vector.broadcast %cst_81 : f32 to vector<128x4xf32>
    %97 = arith.addf %96, %95 : vector<128x4xf32>
    %98 = arith.divf %96, %97 : vector<128x4xf32>
    %99 = arith.mulf %93, %98 : vector<128x4xf32>
    %100 = vector.shape_cast %8 : vector<8x16x4xbf16> to vector<128x4xbf16>
    %101 = arith.extf %100 : vector<128x4xbf16> to vector<128x4xf32>
    %102 = arith.addf %99, %101 : vector<128x4xf32>
    %103 = vector.shape_cast %102 : vector<128x4xf32> to vector<8x16x4xf32>
    %104 = arith.truncf %103 : vector<8x16x4xf32> to vector<8x16x4xbf16>
    %c0_82 = arith.constant 0 : index
    %c0_83 = arith.constant 0 : index
    %c0_84 = arith.constant 0 : index
    %c0_85 = arith.constant 0 : index
    %105 = vector.load %arg7[%c0_82, %c0_83, %c0_84, %c0_85] : memref<1x8x16x4xbf16, #tpu.memory_space<vmem>>, vector<1x8x16x4xbf16>
    %106 = vector.shape_cast %105 : vector<1x8x16x4xbf16> to vector<8x16x4xbf16>
    %107 = vector.shape_cast %104 : vector<8x16x4xbf16> to vector<1x8x16x4xbf16>
    tpu.vector_store %arg7[%c0_82, %c0_83, %c0_84, %c0_85], %107 {strides = array<i32>} : memref<1x8x16x4xbf16, #tpu.memory_space<vmem>>, vector<1x8x16x4xbf16>,
    return
  }
  func.func @transform_0(%arg0: i32, %arg1: i32) -> (i32, i32, i32, i32) {
    %c0_i32 = arith.constant 0 : i32
    %c0_i32_0 = arith.constant 0 : i32
    %c0_i32_1 = arith.constant 0 : i32
    %c0_i32_2 = arith.constant 0 : i32
    return %arg0, %c0_i32, %c0_i32_0, %c0_i32_1 : i32, i32, i32, i32
  }
  func.func @transform_1(%arg0: i32, %arg1: i32) -> (i32, i32) {
    %c0_i32 = arith.constant 0 : i32
    %c0_i32_0 = arith.constant 0 : i32
    %c0_i32_1 = arith.constant 0 : i32
    return %c0_i32, %c0_i32_0 : i32, i32
  }
  func.func @transform_2(%arg0: i32, %arg1: i32) -> (i32, i32) {
    %c0_i32 = arith.constant 0 : i32
    %c0_i32_0 = arith.constant 0 : i32
    %c0_i32_1 = arith.constant 0 : i32
    return %c0_i32, %c0_i32_0 : i32, i32
  }
  func.func @transform_3(%arg0: i32, %arg1: i32) -> (i32, i32, i32) {
    %c0_i32 = arith.constant 0 : i32
    %c0_i32_0 = arith.constant 0 : i32
    %c0_i32_1 = arith.constant 0 : i32
    %c0_i32_2 = arith.constant 0 : i32
    return %c0_i32, %c0_i32_0, %c0_i32_1 : i32, i32, i32
  }
  func.func @transform_4(%arg0: i32, %arg1: i32) -> (i32, i32) {
    %c0_i32 = arith.constant 0 : i32
    %c0_i32_0 = arith.constant 0 : i32
    %c0_i32_1 = arith.constant 0 : i32
    return %c0_i32, %c0_i32_0 : i32, i32
  }
  func.func @transform_5(%arg0: i32, %arg1: i32) -> (i32, i32, i32, i32) {
    %c0_i32 = arith.constant 0 : i32
    %c0_i32_0 = arith.constant 0 : i32
    %c0_i32_1 = arith.constant 0 : i32
    return %arg0, %arg1, %c0_i32, %c0_i32_0 : i32, i32, i32, i32
  }
}

</mosaic_0001>

<bundles_post_ra>
// kernel: tc3_forward.5
= control target key start
LH: loop header
LB: loop body
LE: loop exit
PB: predicated region body
PF: predicated region fallthrough
CT: control target
= control target key end

     0   :  { %s1079_s18 = smov 0   ;;  %s1254_s0 = inlined_call_operand.vmem [shape: bf16[512,4], index: 0, kind: input, shape index: {}]   ;;  %s1255_s1 = inlined_call_operand.vmem [shape: bf16[512,4], index: 1, kind: input, shape index: {}]   ;;  %s1256_s2 = inlined_call_operand.vmem [shape: bf16[4,8], index: 2, kind: input, shape index: {}]   ;;  %s1257_s3 = inlined_call_operand.vmem [shape: bf16[4,8], index: 3, kind: input, shape index: {}]   ;;  %s1258_s4 = inlined_call_operand.vmem [shape: f32[1,8], index: 4, kind: input, shape index: {}]   ;;  %s1259_s5 = inlined_call_operand.vmem [shape: f32[512,8], index: 5, kind: output, shape index: {}]  }
   0x1 LB: > { %s835_s19 = sadd.s32 4294967295, %s1047_s18   ;;  %p839_p0 = scmp.ge.s32.totalorder %s1047_s18, 1  ;;  %s1047_s18 = sphi %s1079_s18, %s15_s18  }
   0x2   : > { %p199_p1 = scmp.lt.s32.totalorder %s1047_s18, 5 }
   0x4   : > { %p200_p2 = pnand %p839_p0, %p199_p1 }
   0x5   : > { %s840_s24 = sshll.u32 (!%p200_p2), %s835_s19, 4 }
   0x6   : > { %203 = sbr.rel (%p200_p2) target bundleno = 280 (0x118), region = 40  ;;  %p233_p3 = scmp.lt.s32.totalorder (!%p200_p2), %s840_s24, 63 }
   0xb   : > { %v284_v0 = vld [vmem:[%s1257_s3] sm:$0x3]  ;;  %vm350_vm0 = vcmask 1041408   ;;  %s1261_s24 = smov (!%p233_p3, %s840_s24), 63  ;;  %vm325_vm1 = vcmask 31744   ;;  %vm750_vm2 = vcmask 64512  }
   0xc   : > { %v267_v1 = vld [vmem:[%s1256_s2] sm:$0x3]  ;;  %951 = vmatprep.subr.msk.bf16.mxu0 %vm350_vm0, %v284_v0  ;;  %v352_v2 = vsel %vm350_vm0, %v284_v0, 0  ;;  %s841_s25 = sshll.u32 %s1261_s24, 2  ;;  %s845_s9 = sshll.u32 %s1261_s24, 3 }
   0xd   : > { %952 = vmatprep.subr.msk.bf16.mxu1 %vm350_vm0, %v267_v1  ;;  %v516_v3 = vsel %vm350_vm0, %v267_v1, 0  ;;  %916 = vmatpush3.bf16.msra.mxu0 %v352_v2  ;;  %s1099_s28 = scalar_lea.vmem %s1255_s1, %s841_s25  ;;  %s236_s6 = scalar_lea.vmem %s1254_s0, %s841_s25  ;;  %v1131_v22 = vld [vmem:[%s1258_s4] ss:$0 sm:$0xff] }
   0xe   : > { %934 = vmatpush3.bf16.msra.mxu1 %v516_v3  ;;  %v961_v4 = vld [vmem:[%s1099_s28] sm:$0xff]   ;;  %v963_v6 = vld [vmem:[%s1099_s28 + $0x8] sm:$0xff]   ;;  %v965_v8 = vld [vmem:[%s1099_s28 + $0x10] sm:$0xff]   ;;  %s1201_s12 = scalar_lea.vmem %s1259_s5, %s845_s9 }
   0xf   : > { %v962_v5 = vld [vmem:[%s236_s6] sm:$0xff]   ;;  %917 = vmatprep.mubr.msk.bf16.mxu0 %vm325_vm1, %v961_v4  ;;  %v964_v7 = vld [vmem:[%s236_s6 + $0x8] sm:$0xff]   ;;  %v966_v9 = vld [vmem:[%s236_s6 + $0x10] sm:$0xff]  }
  0x10   : > { %935 = vmatprep.mubr.msk.bf16.mxu1 %vm325_vm1, %v962_v5  ;;  %918 = vmatmul.mubr.msk.bf16.vlgmr.msra.gmra.mxu0 %vm325_vm1, %v963_v6  ;;  %v967_v10 = vld [vmem:[%s1099_s28 + $0x18] sm:$0xff]   ;;  %v969_v12 = vld [vmem:[%s1099_s28 + $0x20] sm:$0xff]   ;;  %v971_v14 = vld [vmem:[%s1099_s28 + $0x28] sm:$0xff]  }
  0x11   : > { %936 = vmatmul.mubr.msk.bf16.vlgmr.msra.gmra.mxu1 %vm325_vm1, %v964_v7  ;;  %921 = vmatprep.mubr.msk.bf16.mxu0 %vm325_vm1, %v965_v8  ;;  %v968_v11 = vld [vmem:[%s236_s6 + $0x18] sm:$0xff]   ;;  %v970_v13 = vld [vmem:[%s236_s6 + $0x20] sm:$0xff]   ;;  %v972_v15 = vld [vmem:[%s236_s6 + $0x28] sm:$0xff]  }
  0x12   : > { %939 = vmatprep.mubr.msk.bf16.mxu1 %vm325_vm1, %v966_v9  ;;  %v973_v16 = vld [vmem:[%s1099_s28 + $0x30] sm:$0xff]   ;;  %v975_v18 = vld [vmem:[%s1099_s28 + $0x38] sm:$0xff]  }
  0x13   : > { %v974_v17 = vld [vmem:[%s236_s6 + $0x30] sm:$0xff]   ;;  %v976_v19 = vld [vmem:[%s236_s6 + $0x38] sm:$0xff]  }
  0x18   : > { %922 = vmatmul.mubr.msk.bf16.gmra.mxu0 %vm325_vm1, %v967_v10 }
  0x19   : > { %940 = vmatmul.mubr.msk.bf16.gmra.mxu1 %vm325_vm1, %v968_v11  ;;  %925 = vmatprep.mubr.msk.bf16.mxu0 %vm325_vm1, %v969_v12 }
  0x1a   : > { %943 = vmatprep.mubr.msk.bf16.mxu1 %vm325_vm1, %v970_v13 }
  0x20   : > { %926 = vmatmul.mubr.msk.bf16.gmra.mxu0 %vm325_vm1, %v971_v14 }
  0x21   : > { %944 = vmatmul.mubr.msk.bf16.gmra.mxu1 %vm325_vm1, %v972_v15  ;;  %929 = vmatprep.mubr.msk.bf16.mxu0 %vm325_vm1, %v973_v16 }
  0x22   : > { %947 = vmatprep.mubr.msk.bf16.mxu1 %vm325_vm1, %v974_v17 }
  0x28   : > { %930 = vmatmul.mubr.msk.bf16.gmra.mxu0 %vm325_vm1, %v975_v18 }
  0x29   : > { %948 = vmatmul.mubr.msk.bf16.gmra.mxu1 %vm325_vm1, %v976_v19 }
  0xd0   : > { %v919_v20 = vpop.f32.mrf.mxu0 }
  0xd1   : > { %v937_v21 = vpop.f32.mrf.mxu1 }
  0xd2   : > { %v561_v23 = vadd.f32 %v937_v21, %v919_v20  ;;  %v388_v24 = vpop.f32.mrf.mxu0 }
  0xd3   : > { %v552_v25 = vpop.f32.mrf.mxu1 }
  0xd4   : > { %v1134_v26 = vadd.f32 %v1131_v22, %v561_v23  ;;  %v553_v27 = vadd.f32 %v552_v25, %v388_v24  ;;  %v920_v28 = vpop.f32.mrf.mxu0 }
  0xd5   : > { %v938_v29 = vpop.f32.mrf.mxu1 }
  0xd6   : > { %v881_v30 = vmul.f32 -1.442695, %v1134_v26  ;;  %v1138_v31 = vadd.f32 %v1131_v22, %v553_v27  ;;  %v564_v32 = vadd.f32 %v938_v29, %v920_v28  ;;  %v391_v33 = vpop.f32.mrf.mxu0 }
  0xd7   : > { %v555_v34 = vpop.f32.mrf.mxu1 }
  0xd8   : > { %977 = vpow2.f32 %v881_v30  ;;  %v879_v35 = vmul.f32 -1.442695, %v1138_v31  ;;  %v1142_v36 = vadd.f32 %v1131_v22, %v564_v32  ;;  %v556_v37 = vadd.f32 %v555_v34, %v391_v33  ;;  %v923_v38 = vpop.f32.mrf.mxu0 }
  0xd9   : > { %v941_v39 = vpop.f32.mrf.mxu1 }
  0xda   : > { %979 = vpow2.f32 %v879_v35  ;;  %v882_v40 = vmul.f32 -1.442695, %v1142_v36  ;;  %v1146_v41 = vadd.f32 %v1131_v22, %v556_v37  ;;  %v577_v42 = vadd.f32 %v941_v39, %v923_v38  ;;  %v404_v43 = vpop.f32.mrf.mxu0 }
  0xdb   : > { %v568_v44 = vpop.f32.mrf.mxu1 }
  0xdc   : > { %981 = vpow2.f32 %v882_v40  ;;  %v880_v45 = vmul.f32 -1.442695, %v1146_v41  ;;  %v1150_v46 = vadd.f32 %v1131_v22, %v577_v42  ;;  %v569_v47 = vadd.f32 %v568_v44, %v404_v43  ;;  %v924_v48 = vpop.f32.mrf.mxu0 }
  0xdd   : > { %v942_v49 = vpop.f32.mrf.mxu1 }
  0xde   : > { %983 = vpow2.f32 %v880_v45  ;;  %v885_v50 = vmul.f32 -1.442695, %v1150_v46  ;;  %v1154_v51 = vadd.f32 %v1131_v22, %v569_v47  ;;  %v580_v52 = vadd.f32 %v942_v49, %v924_v48  ;;  %v407_v53 = vpop.f32.mrf.mxu0 }
  0xdf   : > { %v571_v54 = vpop.f32.mrf.mxu1 }
  0xe0   : > { %985 = vpow2.f32 %v885_v50  ;;  %v883_v55 = vmul.f32 -1.442695, %v1154_v51  ;;  %v1158_v56 = vadd.f32 %v1131_v22, %v580_v52  ;;  %v572_v57 = vadd.f32 %v571_v54, %v407_v53  ;;  %v927_v58 = vpop.f32.mrf.mxu0 }
  0xe1   : > { %v945_v59 = vpop.f32.mrf.mxu1 }
  0xe2   : > { %987 = vpow2.f32 %v883_v55  ;;  %v886_v60 = vmul.f32 -1.442695, %v1158_v56  ;;  %v1162_v61 = vadd.f32 %v1131_v22, %v572_v57  ;;  %v593_v62 = vadd.f32 %v945_v59, %v927_v58  ;;  %v420_v63 = vpop.f32.mrf.mxu0 }
  0xe3   : > { %v584_v0 = vpop.f32.mrf.mxu1 }
  0xe4   : > { %989 = vpow2.f32 %v886_v60  ;;  %v884_v1 = vmul.f32 -1.442695, %v1162_v61  ;;  %v1166_v2 = vadd.f32 %v1131_v22, %v593_v62  ;;  %v585_v3 = vadd.f32 %v584_v0, %v420_v63  ;;  %v928_v4 = vpop.f32.mrf.mxu0 }
  0xe5   : > { %v978_v5 = vpop.eup %977  ;;  %v946_v6 = vpop.f32.mrf.mxu1 }
  0xe6   : > { %v688_v7 = vadd.f32 1.0, %v978_v5  ;;  %991 = vpow2.f32 %v884_v1  ;;  %v889_v8 = vmul.f32 -1.442695, %v1166_v2  ;;  %v1170_v9 = vadd.f32 %v1131_v22, %v585_v3  ;;  %v423_v10 = vpop.f32.mrf.mxu0 }
  0xe7   : > { %v980_v11 = vpop.eup %979  ;;  %v596_v12 = vadd.f32 %v946_v6, %v928_v4  ;;  %v587_v13 = vpop.f32.mrf.mxu1 }
  0xe8   : > { %993 = vrcp.f32 %v688_v7  ;;  %v686_v14 = vadd.f32 1.0, %v980_v11  ;;  %v887_v15 = vmul.f32 -1.442695, %v1170_v9  ;;  %v588_v16 = vadd.f32 %v587_v13, %v423_v10  ;;  %v931_v17 = vpop.f32.mrf.mxu0 }
  0xe9   : > { %v982_v18 = vpop.eup %981  ;;  %995 = vpow2.f32 %v889_v8  ;;  %v1174_v19 = vadd.f32 %v1131_v22, %v596_v12  ;;  %v949_v20 = vpop.f32.mrf.mxu1 }
  0xea   : > { %997 = vrcp.f32 %v686_v14  ;;  %v689_v21 = vadd.f32 1.0, %v982_v18  ;;  %v1177_v23 = vadd.f32 %v1131_v22, %v588_v16  ;;  %v609_v24 = vadd.f32 %v949_v20, %v931_v17  ;;  %v436_v25 = vpop.f32.mrf.mxu0 }
  0xeb   : > { %v984_v27 = vpop.eup %983  ;;  %999 = vpow2.f32 %v887_v15  ;;  %v890_v28 = vmul.f32 -1.442695, %v1174_v19  ;;  %v600_v29 = vpop.f32.mrf.mxu1 }
  0xec   : > { %1001 = vrcp.f32 %v689_v21  ;;  %v687_v30 = vadd.f32 1.0, %v984_v27  ;;  %v888_v32 = vmul.f32 -1.442695, %v1177_v23  ;;  %v1182_v33 = vadd.f32 %v1131_v22, %v609_v24  ;;  %v932_v34 = vpop.f32.mrf.mxu0 }
  0xed   : > { %v986_v35 = vpop.eup %985  ;;  %1003 = vpow2.f32 %v890_v28  ;;  %v601_v37 = vadd.f32 %v600_v29, %v436_v25  ;;  %v950_v38 = vpop.f32.mrf.mxu1 }
  0xee   : > { %1005 = vrcp.f32 %v687_v30  ;;  %v692_v39 = vadd.f32 1.0, %v986_v35  ;;  %v893_v40 = vmul.f32 -1.442695, %v1182_v33  ;;  %v612_v42 = vadd.f32 %v950_v38, %v932_v34  ;;  %v439_v43 = vpop.f32.mrf.mxu0 }
  0xef   : > { %v988_v44 = vpop.eup %987  ;;  %1007 = vpow2.f32 %v888_v32  ;;  %v1186_v45 = vadd.f32 %v1131_v22, %v601_v37  ;;  %v603_v47 = vpop.f32.mrf.mxu1 }
  0xf0   : > { %1009 = vrcp.f32 %v692_v39  ;;  %v690_v48 = vadd.f32 1.0, %v988_v44  ;;  %v1189_v49 = vadd.f32 %v1131_v22, %v612_v42  ;;  %v604_v50 = vadd.f32 %v603_v47, %v439_v43 }
  0xf1   : > { %v990_v52 = vpop.eup %989  ;;  %1011 = vpow2.f32 %v893_v40  ;;  %v891_v53 = vmul.f32 -1.442695, %v1186_v45 }
  0xf2   : > { %1013 = vrcp.f32 %v690_v48  ;;  %v693_v54 = vadd.f32 1.0, %v990_v52  ;;  %v894_v55 = vmul.f32 -1.442695, %v1189_v49  ;;  %v1195_v57 = vadd.f32 %v1131_v22, %v604_v50 }
  0xf3   : > { %v992_v58 = vpop.eup %991  ;;  %1015 = vpow2.f32 %v891_v53 }
  0xf4   : > { %1017 = vrcp.f32 %v693_v54  ;;  %v691_v59 = vadd.f32 1.0, %v992_v58  ;;  %v892_v60 = vmul.f32 -1.442695, %v1195_v57 }
  0xf5   : > { %v994_v62 = vpop.eup %993  ;;  %1019 = vpow2.f32 %v894_v55 }
  0xf6   : > { %v996_v63 = vpop.eup %995  ;;  %v736_v22 = vmul.f32 %v994_v62, %v1134_v26  ;;  %1021 = vrcp.f32 %v691_v59 }
  0xf7   : > { %v998_v0 = vpop.eup %997  ;;  %v696_v1 = vadd.f32 1.0, %v996_v63  ;;  %1023 = vpow2.f32 %v892_v60 }
  0xf8   : > { %v1000_v3 = vpop.eup %999  ;;  %753 = vst.msk [vmem:[%s1201_s12 + $0x10] sm:$0xff] %vm750_vm2, %v736_v22  ;;  %v734_v4 = vmul.f32 %v998_v0, %v1138_v31 }
  0xf9   : > { %v1002_v5 = vpop.eup %1001  ;;  %1025 = vrcp.f32 %v696_v1  ;;  %v694_v6 = vadd.f32 1.0, %v1000_v3 }
  0xfa   : > { %v1004_v7 = vpop.eup %1003  ;;  %751 = vst.msk [vmem:[%s1201_s12] sm:$0xff] %vm750_vm2, %v734_v4  ;;  %v737_v8 = vmul.f32 %v1002_v5, %v1142_v36 }
  0xfb   : > { %v1006_v26 = vpop.eup %1005  ;;  %1027 = vrcp.f32 %v694_v6  ;;  %v697_v10 = vadd.f32 1.0, %v1004_v7 }
  0xfc   : > { %v1008_v11 = vpop.eup %1007  ;;  %754 = vst.msk [vmem:[%s1201_s12 + $0x18] sm:$0xff] %vm750_vm2, %v737_v8  ;;  %v735_v12 = vmul.f32 %v1006_v26, %v1146_v41 }
  0xfd   : > { %v1010_v13 = vpop.eup %1009  ;;  %1029 = vrcp.f32 %v697_v10  ;;  %v695_v31 = vadd.f32 1.0, %v1008_v11 }
  0xfe   : > { %v1012_v14 = vpop.eup %1011  ;;  %752 = vst.msk [vmem:[%s1201_s12 + $0x8] sm:$0xff] %vm750_vm2, %v735_v12  ;;  %v740_v15 = vmul.f32 %v1010_v13, %v1150_v46 }
  0xff   : > { %v1014_v16 = vpop.eup %1013  ;;  %1031 = vrcp.f32 %v695_v31  ;;  %v700_v36 = vadd.f32 1.0, %v1012_v14 }
 0x100   : > { %v1016_v17 = vpop.eup %1015  ;;  %757 = vst.msk [vmem:[%s1201_s12 + $0x30] sm:$0xff] %vm750_vm2, %v740_v15  ;;  %v738_v18 = vmul.f32 %v1014_v16, %v1154_v51 }
 0x101   : > { %v1018_v41 = vpop.eup %1017  ;;  %1033 = vrcp.f32 %v700_v36  ;;  %v698_v20 = vadd.f32 1.0, %v1016_v17 }
 0x102   : > { %v1020_v21 = vpop.eup %1019  ;;  %755 = vst.msk [vmem:[%s1201_s12 + $0x20] sm:$0xff] %vm750_vm2, %v738_v18  ;;  %v741_v24 = vmul.f32 %v1018_v41, %v1158_v56 }
 0x103   : > { %v1022_v46 = vpop.eup %1021  ;;  %1035 = vrcp.f32 %v698_v20  ;;  %v701_v25 = vadd.f32 1.0, %v1020_v21 }
 0x104   : > { %v1024_v27 = vpop.eup %1023  ;;  %758 = vst.msk [vmem:[%s1201_s12 + $0x38] sm:$0xff] %vm750_vm2, %v741_v24  ;;  %v739_v51 = vmul.f32 %v1022_v46, %v1162_v61 }
 0x105   : > { %1037 = vrcp.f32 %v701_v25  ;;  %v699_v28 = vadd.f32 1.0, %v1024_v27 }
 0x106   : > { %v1026_v29 = vpop.eup %1025  ;;  %756 = vst.msk [vmem:[%s1201_s12 + $0x28] sm:$0xff] %vm750_vm2, %v739_v51 }
 0x107   : > { %v744_v30 = vmul.f32 %v1026_v29, %v1166_v2  ;;  %1039 = vrcp.f32 %v699_v28 }
 0x108   : > { %v1028_v56 = vpop.eup %1027 }
 0x109   : > { %761 = vst.msk [vmem:[%s1201_s12 + $0x50] sm:$0xff] %vm750_vm2, %v744_v30  ;;  %v742_v32 = vmul.f32 %v1028_v56, %v1170_v9 }
 0x10a   : > { %v1030_v34 = vpop.eup %1029 }
 0x10b   : > { %759 = vst.msk [vmem:[%s1201_s12 + $0x40] sm:$0xff] %vm750_vm2, %v742_v32  ;;  %v745_v61 = vmul.f32 %v1030_v34, %v1174_v19 }
 0x10c   : > { %v1032_v35 = vpop.eup %1031 }
 0x10d   : > { %762 = vst.msk [vmem:[%s1201_s12 + $0x58] sm:$0xff] %vm750_vm2, %v745_v61  ;;  %v743_v37 = vmul.f32 %v1032_v35, %v1177_v23 }
 0x10e   : > { %v1034_v2 = vpop.eup %1033 }
 0x10f   : > { %760 = vst.msk [vmem:[%s1201_s12 + $0x48] sm:$0xff] %vm750_vm2, %v743_v37  ;;  %v748_v38 = vmul.f32 %v1034_v2, %v1182_v33 }
 0x110   : > { %v1036_v39 = vpop.eup %1035 }
 0x111   : > { %765 = vst.msk [vmem:[%s1201_s12 + $0x70] sm:$0xff] %vm750_vm2, %v748_v38  ;;  %v746_v9 = vmul.f32 %v1036_v39, %v1186_v45 }
 0x112   : > { %v1038_v40 = vpop.eup %1037 }
 0x113   : > { %763 = vst.msk [vmem:[%s1201_s12 + $0x60] sm:$0xff] %vm750_vm2, %v746_v9  ;;  %v749_v19 = vmul.f32 %v1038_v40, %v1189_v49 }
 0x114   : > { %v1040_v42 = vpop.eup %1039 }
 0x115   : > { %766 = vst.msk [vmem:[%s1201_s12 + $0x78] sm:$0xff] %vm750_vm2, %v749_v19  ;;  %v747_v23 = vmul.f32 %v1040_v42, %v1195_v57 }
 0x117   : > { %764 = vst.msk [vmem:[%s1201_s12 + $0x68] sm:$0xff] %vm750_vm2, %v747_v23 }
 0x118 PF: > { %s15_s18 = sadd.s32 1, %s1047_s18  }
 0x119   : > { %p12_p4 = scmp.ge.s32.totalorder %s15_s18, 6  }
 0x11b   :  { %14 = sbr.rel (!%p12_p4) target bundleno = 1 (0x1), region = 73 }

// kernel: tc3_forward.3
= control target key start
LH: loop header
LB: loop body
LE: loop exit
PB: predicated region body
PF: predicated region fallthrough
CT: control target
= control target key end

     0   :  { %s977_s15 = smov 0   ;;  %s1164_s0 = inlined_call_operand.vmem [shape: bf16[512,8], index: 0, kind: input, shape index: {}]   ;;  %s1165_s1 = inlined_call_operand.vmem [shape: bf16[8,8], index: 1, kind: input, shape index: {}]   ;;  %s1166_s2 = inlined_call_operand.vmem [shape: f32[1,8], index: 2, kind: input, shape index: {}]   ;;  %s1167_s3 = inlined_call_operand.vmem [shape: bf16[512,4], index: 3, kind: output, shape index: {0}]   ;;  %s1168_s4 = inlined_call_operand.vmem [shape: bf16[512,4], index: 4, kind: output, shape index: {1}]  }
   0x1 LB: > { %s753_s16 = sadd.s32 4294967295, %s949_s15   ;;  %p757_p0 = scmp.ge.s32.totalorder %s949_s15, 1  ;;  %s949_s15 = sphi %s977_s15, %s15_s15  }
   0x2   : > { %p166_p1 = scmp.lt.s32.totalorder %s949_s15, 5 }
   0x4   : > { %p167_p2 = pnand %p757_p0, %p166_p1 }
   0x5   : > { %s758_s19 = sshll.u32 (!%p167_p2), %s753_s16, 4  ;;  %s951_s29 = smov (!%p167_p2), 124  }
   0x6   : > { %170 = sbr.rel (%p167_p2) target bundleno = 392 (0x188), region = 32  ;;  %p198_p3 = scmp.lt.s32.totalorder (!%p167_p2), %s758_s19, 63 }
   0xb   : > { %v232_v0 = vld [vmem:[%s1165_s1] sm:$0xf]  ;;  %vm305_vm0 = vcmask 1043456   ;;  %s1170_s19 = smov (!%p198_p3, %s758_s19), 63  ;;  %vm280_vm1 = vcmask 64512   ;;  %vm582_vm2 = vcmask 27648  }
   0xc   : > { %860 = vmatprep.subr.msk.bf16.mxu0 %vm305_vm0, %v232_v0  ;;  %861 = vmatprep.subr.msk.bf16.mxu1 %vm305_vm0, %v232_v0  ;;  %v307_v1 = vsel %vm305_vm0, %v232_v0, 0  ;;  %s988_s20 = sshll.u32 %s1170_s19, 2  ;;  %v764_v10 = vld [vmem:[%s1166_s2] ss:$0 sm:$0xff] }
   0xd   : > { %841 = vmatpush3.bf16.msra.mxu0 %v307_v1  ;;  %859 = vmatpush3.bf16.msra.mxu1 %v307_v1  ;;  %s201_s23 = scalar_lea.vmem %s1164_s0, %s988_s20  ;;  %s1058_s28 = scalar_lea.vmem %s1167_s3, %s988_s20 }
   0xe   : > { %v871_v2 = vld [vmem:[%s201_s23] sm:$0xff]   ;;  %v873_v4 = vld [vmem:[%s201_s23 + $0x8] sm:$0xff]   ;;  %v875_v6 = vld [vmem:[%s201_s23 + $0x10] sm:$0xff]   ;;  %s1127_s6 = scalar_lea.vmem %s1168_s4, %s988_s20 }
   0xf   : > { %v872_v3 = vld [vmem:[%s201_s23 + $0x20] sm:$0xff]   ;;  %842 = vmatprep.mubr.msk.bf16.mxu0 %vm280_vm1, %v871_v2  ;;  %v874_v5 = vld [vmem:[%s201_s23 + $0x28] sm:$0xff]   ;;  %v876_v7 = vld [vmem:[%s201_s23 + $0x30] sm:$0xff]  }
  0x10   : > { %850 = vmatprep.mubr.msk.bf16.mxu1 %vm280_vm1, %v872_v3  ;;  %843 = vmatmul.mubr.msk.bf16.vlgmr.msra.gmra.mxu0 %vm280_vm1, %v873_v4  ;;  %v877_v8 = vld [vmem:[%s201_s23 + $0x18] sm:$0xff]  }
  0x11   : > { %851 = vmatmul.mubr.msk.bf16.vlgmr.msra.gmra.mxu1 %vm280_vm1, %v874_v5  ;;  %846 = vmatprep.mubr.msk.bf16.mxu0 %vm280_vm1, %v875_v6  ;;  %v878_v9 = vld [vmem:[%s201_s23 + $0x38] sm:$0xff]  }
  0x12   : > { %854 = vmatprep.mubr.msk.bf16.mxu1 %vm280_vm1, %v876_v7 }
  0x18   : > { %847 = vmatmul.mubr.msk.bf16.gmra.mxu0 %vm280_vm1, %v877_v8 }
  0x19   : > { %855 = vmatmul.mubr.msk.bf16.gmra.mxu1 %vm280_vm1, %v878_v9 }
  0xd0   : > { %v844_v11 = vpop.f32.mrf.mxu0 }
  0xd1   : > { %v1005_v12 = vadd.f32 %v844_v11, %v764_v10  ;;  %v852_v13 = vpop.f32.mrf.mxu1 }
  0xd2   : > { %v1007_v14 = vadd.f32 %v852_v13, %v764_v10  ;;  %v343_v15 = vpop.f32.mrf.mxu0 }
  0xd3   : > { %v783_v16 = vmul.f32 -1.442695, %v1005_v12  ;;  %v1010_v17 = vadd.f32 %v764_v10, %v343_v15  ;;  %v375_v18 = vpop.f32.mrf.mxu1 }
  0xd4   : > { %v791_v19 = vmul.f32 -1.442695, %v1007_v14  ;;  %v1013_v20 = vadd.f32 %v764_v10, %v375_v18  ;;  %v845_v21 = vpop.f32.mrf.mxu0 }
  0xd5   : > { %879 = vpow2.f32 %v783_v16  ;;  %v781_v22 = vmul.f32 -1.442695, %v1010_v17  ;;  %v1016_v23 = vadd.f32 %v845_v21, %v764_v10  ;;  %v853_v24 = vpop.f32.mrf.mxu1 }
  0xd6   : > { %881 = vpow2.f32 %v791_v19  ;;  %v789_v25 = vmul.f32 -1.442695, %v1013_v20  ;;  %v1019_v26 = vadd.f32 %v853_v24, %v764_v10  ;;  %v346_v27 = vpop.f32.mrf.mxu0 }
  0xd7   : > { %883 = vpow2.f32 %v781_v22  ;;  %v784_v28 = vmul.f32 -1.442695, %v1016_v23  ;;  %v1022_v29 = vadd.f32 %v764_v10, %v346_v27  ;;  %v378_v30 = vpop.f32.mrf.mxu1 }
  0xd8   : > { %885 = vpow2.f32 %v789_v25  ;;  %v792_v31 = vmul.f32 -1.442695, %v1019_v26  ;;  %v1025_v32 = vadd.f32 %v764_v10, %v378_v30  ;;  %v848_v33 = vpop.f32.mrf.mxu0 }
  0xd9   : > { %887 = vpow2.f32 %v784_v28  ;;  %v782_v34 = vmul.f32 -1.442695, %v1022_v29  ;;  %v1028_v35 = vadd.f32 %v848_v33, %v764_v10  ;;  %v856_v36 = vpop.f32.mrf.mxu1 }
  0xda   : > { %889 = vpow2.f32 %v792_v31  ;;  %v790_v37 = vmul.f32 -1.442695, %v1025_v32  ;;  %v1031_v38 = vadd.f32 %v856_v36, %v764_v10  ;;  %v359_v39 = vpop.f32.mrf.mxu0 }
  0xdb   : > { %891 = vpow2.f32 %v782_v34  ;;  %v787_v40 = vmul.f32 -1.442695, %v1028_v35  ;;  %v1034_v41 = vadd.f32 %v764_v10, %v359_v39  ;;  %v391_v42 = vpop.f32.mrf.mxu1 }
  0xdc   : > { %893 = vpow2.f32 %v790_v37  ;;  %v795_v43 = vmul.f32 -1.442695, %v1031_v38  ;;  %v1037_v44 = vadd.f32 %v764_v10, %v391_v42  ;;  %v849_v45 = vpop.f32.mrf.mxu0 }
  0xdd   : > { %895 = vpow2.f32 %v787_v40  ;;  %v785_v46 = vmul.f32 -1.442695, %v1034_v41  ;;  %v1040_v47 = vadd.f32 %v849_v45, %v764_v10  ;;  %v857_v48 = vpop.f32.mrf.mxu1 }
  0xde   : > { %897 = vpow2.f32 %v795_v43  ;;  %v793_v49 = vmul.f32 -1.442695, %v1037_v44  ;;  %v1043_v50 = vadd.f32 %v857_v48, %v764_v10  ;;  %v362_v51 = vpop.f32.mrf.mxu0 }
  0xdf   : > { %899 = vpow2.f32 %v785_v46  ;;  %v788_v52 = vmul.f32 -1.442695, %v1040_v47  ;;  %v1046_v53 = vadd.f32 %v764_v10, %v362_v51  ;;  %v394_v54 = vpop.f32.mrf.mxu1 }
  0xe0   : > { %901 = vpow2.f32 %v793_v49  ;;  %v796_v55 = vmul.f32 -1.442695, %v1043_v50  ;;  %v1049_v56 = vadd.f32 %v764_v10, %v394_v54 }
  0xe1   : > { %903 = vpow2.f32 %v788_v52  ;;  %v786_v57 = vmul.f32 -1.442695, %v1046_v53 }
  0xe2   : > { %v880_v58 = vpop.eup %879  ;;  %905 = vpow2.f32 %v796_v55  ;;  %v794_v59 = vmul.f32 -1.442695, %v1049_v56 }
  0xe3   : > { %v882_v60 = vpop.eup %881  ;;  %v456_v61 = vadd.f32 1.0, %v880_v58  ;;  %907 = vpow2.f32 %v786_v57 }
  0xe4   : > { %v884_v62 = vpop.eup %883  ;;  %v464_v63 = vadd.f32 1.0, %v882_v60  ;;  %909 = vpow2.f32 %v794_v59 }
  0xe5   : > { %v886_v0 = vpop.eup %885  ;;  %911 = vrcp.f32 %v456_v61  ;;  %v454_v1 = vadd.f32 1.0, %v884_v62 }
  0xe6   : > { %v888_v2 = vpop.eup %887  ;;  %913 = vrcp.f32 %v464_v63  ;;  %v462_v3 = vadd.f32 1.0, %v886_v0 }
  0xe7   : > { %v890_v4 = vpop.eup %889  ;;  %915 = vrcp.f32 %v454_v1  ;;  %v457_v5 = vadd.f32 1.0, %v888_v2 }
  0xe8   : > { %v892_v6 = vpop.eup %891  ;;  %917 = vrcp.f32 %v462_v3  ;;  %v465_v7 = vadd.f32 1.0, %v890_v4 }
  0xe9   : > { %v894_v8 = vpop.eup %893  ;;  %919 = vrcp.f32 %v457_v5  ;;  %v455_v9 = vadd.f32 1.0, %v892_v6 }
  0xea   : > { %v896_v10 = vpop.eup %895  ;;  %921 = vrcp.f32 %v465_v7  ;;  %v463_v11 = vadd.f32 1.0, %v894_v8 }
  0xeb   : > { %v898_v13 = vpop.eup %897  ;;  %923 = vrcp.f32 %v455_v9  ;;  %v460_v15 = vadd.f32 1.0, %v896_v10 }
  0xec   : > { %v900_v16 = vpop.eup %899  ;;  %925 = vrcp.f32 %v463_v11  ;;  %v468_v18 = vadd.f32 1.0, %v898_v13 }
  0xed   : > { %v902_v19 = vpop.eup %901  ;;  %927 = vrcp.f32 %v460_v15  ;;  %v458_v21 = vadd.f32 1.0, %v900_v16 }
  0xee   : > { %v904_v22 = vpop.eup %903  ;;  %929 = vrcp.f32 %v468_v18  ;;  %v466_v24 = vadd.f32 1.0, %v902_v19 }
  0xef   : > { %v906_v25 = vpop.eup %905  ;;  %931 = vrcp.f32 %v458_v21  ;;  %v461_v27 = vadd.f32 1.0, %v904_v22 }
  0xf0   : > { %v908_v28 = vpop.eup %907  ;;  %933 = vrcp.f32 %v466_v24  ;;  %v469_v30 = vadd.f32 1.0, %v906_v25 }
  0xf1   : > { %v910_v31 = vpop.eup %909  ;;  %935 = vrcp.f32 %v461_v27  ;;  %v459_v33 = vadd.f32 1.0, %v908_v28 }
  0xf2   : > { %v912_v34 = vpop.eup %911  ;;  %937 = vrcp.f32 %v469_v30  ;;  %v467_v36 = vadd.f32 1.0, %v910_v31 }
  0xf3   : > { %v914_v37 = vpop.eup %913  ;;  %939 = vrcp.f32 %v459_v33  ;;  %v504_v39 = vmul.f32 %v912_v34, %v1005_v12 }
  0xf4   : > { %v916_v40 = vpop.eup %915  ;;  %941 = vrcp.f32 %v467_v36  ;;  %v512_v42 = vmul.f32 %v914_v37, %v1007_v14 }
  0xf5   : > { %v918_v43 = vpop.eup %917  ;;  %v502_v45 = vmul.f32 %v916_v40, %v1010_v17  ;;  %v817_v46 = vpack.c.bf16 %v504_v39, %v504_v39 }
  0xf6   : > { %v920_v48 = vpop.eup %919  ;;  %v510_v12 = vmul.f32 %v918_v43, %v1013_v20  ;;  %v825_v49 = vpack.c.bf16 %v512_v42, %v512_v42 }
  0xf7   : > { %v922_v51 = vpop.eup %921  ;;  %v815_v52 = vpack.c.bf16 %v502_v45, %v502_v45  ;;  %v505_v54 = vmul.f32 %v920_v48, %v1016_v23  ;;  %603 = vrot.lane.b32.xlu1 %v817_v46, %s951_s29  ;;  %585 = vst.msk [vmem:[%s1058_s28 + $0x8] sm:$0xf] %vm582_vm2, %v817_v46 }
  0xf8   : > { %v924_v14 = vpop.eup %923  ;;  %v823_v55 = vpack.c.bf16 %v510_v12, %v510_v12  ;;  %v513_v17 = vmul.f32 %v922_v51, %v1019_v26  ;;  %619 = vrot.lane.b32.xlu0 %v825_v49, %s951_s29  ;;  %593 = vst.msk [vmem:[%s1058_s28 + $0x28] sm:$0xf] %vm582_vm2, %v825_v49 }
  0xf9   : > { %v926_v20 = vpop.eup %925  ;;  %583 = vst.msk [vmem:[%s1058_s28] sm:$0xf] %vm582_vm2, %v815_v52  ;;  %v818_v57 = vpack.c.bf16 %v505_v54, %v505_v54  ;;  %v503_v23 = vmul.f32 %v924_v14, %v1022_v29 }
  0xfa   : > { %v928_v58 = vpop.eup %927  ;;  %591 = vst.msk [vmem:[%s1058_s28 + $0x20] sm:$0xf] %vm582_vm2, %v823_v55  ;;  %v826_v59 = vpack.c.bf16 %v513_v17, %v513_v17  ;;  %v511_v60 = vmul.f32 %v926_v20, %v1025_v32 }
  0xfb   : > { %v930_v26 = vpop.eup %929  ;;  %586 = vst.msk [vmem:[%s1058_s28 + $0xc] sm:$0xf] %vm582_vm2, %v818_v57  ;;  %v816_v61 = vpack.c.bf16 %v503_v23, %v503_v23  ;;  %v508_v62 = vmul.f32 %v928_v58, %v1028_v35  ;;  %605 = vrot.lane.b32.xlu1 %v818_v57, %s951_s29 }
  0xfc   : > { %v932_v63 = vpop.eup %931  ;;  %594 = vst.msk [vmem:[%s1058_s28 + $0x2c] sm:$0xf] %vm582_vm2, %v826_v59  ;;  %v824_v29 = vpack.c.bf16 %v511_v60, %v511_v60  ;;  %v516_v0 = vmul.f32 %v930_v26, %v1031_v38  ;;  %599 = vrot.lane.b32.xlu0 %v815_v52, %s951_s29 }
  0xfd   : > { %v934_v32 = vpop.eup %933  ;;  %584 = vst.msk [vmem:[%s1058_s28 + $0x4] sm:$0xf] %vm582_vm2, %v816_v61  ;;  %v821_v1 = vpack.c.bf16 %v508_v62, %v508_v62  ;;  %v506_v2 = vmul.f32 %v932_v63, %v1034_v41 }
  0xfe   : > { %v936_v35 = vpop.eup %935  ;;  %592 = vst.msk [vmem:[%s1058_s28 + $0x24] sm:$0xf] %vm582_vm2, %v824_v29  ;;  %v829_v3 = vpack.c.bf16 %v516_v0, %v516_v0  ;;  %v514_v4 = vmul.f32 %v934_v32, %v1037_v44 }
  0xff   : > { %v938_v5 = vpop.eup %937  ;;  %589 = vst.msk [vmem:[%s1058_s28 + $0x18] sm:$0xf] %vm582_vm2, %v821_v1  ;;  %v819_v38 = vpack.c.bf16 %v506_v2, %v506_v2  ;;  %v509_v6 = vmul.f32 %v936_v35, %v1040_v47  ;;  %621 = vrot.lane.b32.xlu1 %v826_v59, %s951_s29 }
 0x100   : > { %v940_v7 = vpop.eup %939  ;;  %597 = vst.msk [vmem:[%s1058_s28 + $0x38] sm:$0xf] %vm582_vm2, %v829_v3  ;;  %v827_v41 = vpack.c.bf16 %v514_v4, %v514_v4  ;;  %v517_v8 = vmul.f32 %v938_v5, %v1043_v50  ;;  %615 = vrot.lane.b32.xlu0 %v823_v55, %s951_s29 }
 0x101   : > { %v942_v44 = vpop.eup %941  ;;  %587 = vst.msk [vmem:[%s1058_s28 + $0x10] sm:$0xf] %vm582_vm2, %v819_v38  ;;  %v822_v9 = vpack.c.bf16 %v509_v6, %v509_v6  ;;  %v507_v10 = vmul.f32 %v940_v7, %v1046_v53 }
 0x102   : > { %595 = vst.msk [vmem:[%s1058_s28 + $0x30] sm:$0xf] %vm582_vm2, %v827_v41  ;;  %v830_v47 = vpack.c.bf16 %v517_v8, %v517_v8  ;;  %v515_v11 = vmul.f32 %v942_v44, %v1049_v56 }
 0x103   : > { %590 = vst.msk [vmem:[%s1058_s28 + $0x1c] sm:$0xf] %vm582_vm2, %v822_v9  ;;  %v820_v13 = vpack.c.bf16 %v507_v10, %v507_v10  ;;  %617 = vrot.lane.b32.xlu1 %v824_v29, %s951_s29 }
 0x104   : > { %598 = vst.msk [vmem:[%s1058_s28 + $0x3c] sm:$0xf] %vm582_vm2, %v830_v47  ;;  %v828_v50 = vpack.c.bf16 %v515_v11, %v515_v11  ;;  %601 = vrot.lane.b32.xlu0 %v816_v61, %s951_s29 }
 0x105   : > { %588 = vst.msk [vmem:[%s1058_s28 + $0x14] sm:$0xf] %vm582_vm2, %v820_v13 }
 0x106   : > { %596 = vst.msk [vmem:[%s1058_s28 + $0x34] sm:$0xf] %vm582_vm2, %v828_v50 }
 0x107   : > { %613 = vrot.lane.b32.xlu1 %v822_v9, %s951_s29 }
 0x108   : > { %611 = vrot.lane.b32.xlu0 %v821_v1, %s951_s29 }
 0x10b   : > { %609 = vrot.lane.b32.xlu1 %v820_v13, %s951_s29 }
 0x10c   : > { %607 = vrot.lane.b32.xlu0 %v819_v38, %s951_s29 }
 0x10f   : > { %625 = vrot.lane.b32.xlu1 %v828_v50, %s951_s29 }
 0x110   : > { %623 = vrot.lane.b32.xlu0 %v827_v41, %s951_s29 }
 0x113   : > { %629 = vrot.lane.b32.xlu1 %v830_v47, %s951_s29 }
 0x114   : > { %627 = vrot.lane.b32.xlu0 %v829_v3, %s951_s29 }
 0x169   : > { %v604_v53 = vpop.permute.xlu1 %603 }
 0x16a   : > { %v620_v56 = vpop.permute.xlu0 %619  ;;  %649 = vst.msk [vmem:[%s1127_s6 + $0x8] sm:$0xf] %vm582_vm2, %v604_v53 }
 0x16b   : > { %657 = vst.msk [vmem:[%s1127_s6 + $0x28] sm:$0xf] %vm582_vm2, %v620_v56 }
 0x16d   : > { %v606_v15 = vpop.permute.xlu1 %605 }
 0x16e   : > { %650 = vst.msk [vmem:[%s1127_s6 + $0xc] sm:$0xf] %vm582_vm2, %v606_v15  ;;  %v600_v16 = vpop.permute.xlu0 %599 }
 0x16f   : > { %647 = vst.msk [vmem:[%s1127_s6] sm:$0xf] %vm582_vm2, %v600_v16 }
 0x171   : > { %v622_v18 = vpop.permute.xlu1 %621 }
 0x172   : > { %658 = vst.msk [vmem:[%s1127_s6 + $0x2c] sm:$0xf] %vm582_vm2, %v622_v18  ;;  %v616_v19 = vpop.permute.xlu0 %615 }
 0x173   : > { %655 = vst.msk [vmem:[%s1127_s6 + $0x20] sm:$0xf] %vm582_vm2, %v616_v19 }
 0x175   : > { %v618_v21 = vpop.permute.xlu1 %617 }
 0x176   : > { %656 = vst.msk [vmem:[%s1127_s6 + $0x24] sm:$0xf] %vm582_vm2, %v618_v21  ;;  %v602_v22 = vpop.permute.xlu0 %601 }
 0x177   : > { %648 = vst.msk [vmem:[%s1127_s6 + $0x4] sm:$0xf] %vm582_vm2, %v602_v22 }
 0x179   : > { %v614_v24 = vpop.permute.xlu1 %613 }
 0x17a   : > { %654 = vst.msk [vmem:[%s1127_s6 + $0x1c] sm:$0xf] %vm582_vm2, %v614_v24  ;;  %v612_v25 = vpop.permute.xlu0 %611 }
 0x17b   : > { %653 = vst.msk [vmem:[%s1127_s6 + $0x18] sm:$0xf] %vm582_vm2, %v612_v25 }
 0x17d   : > { %v610_v27 = vpop.permute.xlu1 %609 }
 0x17e   : > { %652 = vst.msk [vmem:[%s1127_s6 + $0x14] sm:$0xf] %vm582_vm2, %v610_v27  ;;  %v608_v28 = vpop.permute.xlu0 %607 }
 0x17f   : > { %651 = vst.msk [vmem:[%s1127_s6 + $0x10] sm:$0xf] %vm582_vm2, %v608_v28 }
 0x181   : > { %v626_v30 = vpop.permute.xlu1 %625 }
 0x182   : > { %660 = vst.msk [vmem:[%s1127_s6 + $0x34] sm:$0xf] %vm582_vm2, %v626_v30  ;;  %v624_v31 = vpop.permute.xlu0 %623 }
 0x183   : > { %659 = vst.msk [vmem:[%s1127_s6 + $0x30] sm:$0xf] %vm582_vm2, %v624_v31 }
 0x185   : > { %v630_v33 = vpop.permute.xlu1 %629 }
 0x186   : > { %662 = vst.msk [vmem:[%s1127_s6 + $0x3c] sm:$0xf] %vm582_vm2, %v630_v33  ;;  %v628_v34 = vpop.permute.xlu0 %627 }
 0x187   : > { %661 = vst.msk [vmem:[%s1127_s6 + $0x38] sm:$0xf] %vm582_vm2, %v628_v34 }
 0x188 PF: > { %s15_s15 = sadd.s32 1, %s949_s15  }
 0x189   : > { %p12_p4 = scmp.ge.s32.totalorder %s15_s15, 6  }
 0x18b   :  { %14 = sbr.rel (!%p12_p4) target bundleno = 1 (0x1), region = 74 }

// kernel: tc3_forward.4
= control target key start
LH: loop header
LB: loop body
LE: loop exit
PB: predicated region body
PF: predicated region fallthrough
CT: control target
= control target key end

     0   :  { %s4897_s18 = smov 0   ;;  %s4899_s19 = smov 0   ;;  %s6350_s0 = inlined_call_operand.vmem [shape: bf16[2,16,16,4], index: 0, kind: input, shape index: {}]   ;;  %s6351_s1 = inlined_call_operand.vmem [shape: bf16[4,4], index: 1, kind: input, shape index: {}]   ;;  %s6352_s2 = inlined_call_operand.vmem [shape: f32[1,4], index: 2, kind: input, shape index: {}]   ;;  %s6353_s3 = inlined_call_operand.vmem [shape: bf16[9,4,4], index: 3, kind: input, shape index: {}]   ;;  %s6354_s4 = inlined_call_operand.vmem [shape: f32[1,4], index: 4, kind: input, shape index: {}]   ;;  %s6355_s5 = inlined_call_operand.vmem [shape: bf16[2,16,16,4], index: 5, kind: output, shape index: {}]  }
   0x1   :  { %s4901_s20 = smov 0   ;;  %s4903_s21 = smov 0  }
   0x2   :  { %s4905_s22 = smov 0  }
   0x3 LB: > { %s24_s23 = sadd.s32 1, %s4851_s20  ;;  %s27_s24 = sadd.s32 1, %s4855_s21  ;;  %s4859_s22 = sphi %s4905_s22, %s15_s22   ;;  %s4855_s21 = sphi %s4903_s21, %s6447_s21   ;;  %s4851_s20 = sphi %s4901_s20, %s6446_s20   ;;  %s4847_s19 = sphi %s4899_s19, %s6445_s19   ;;  %s4843_s18 = sphi %s4897_s18, %s6444_s18  }
   0x4   : > { %p25_p0 = scmp.ge.s32.totalorder %s24_s23, 2  ;;  %p3951_p1 = scmp.ge.s32.totalorder %s4859_s22, 1 }
   0x5   : > { %p201_p2 = scmp.lt.s32.totalorder %s4859_s22, 5 }
   0x6   : > { %s6449_s23 = smov (%p25_p0, %s24_s23), 0  ;;  %s6451_s24 = smov (!%p25_p0, %s27_s24), %s4855_s21 }
   0x7   : > { %p202_p3 = pnand %p3951_p1, %p201_p2  ;;  %p29_p4 = scmp.ge.s32.totalorder %s6451_s24, 2 }
   0x9   : > { %s6453_s24 = smov (%p29_p4, %s6451_s24), 0  ;;  %205 = sbr.rel (%p202_p3) target bundleno = 1229 (0x4cd), region = 40 }
   0xe   : > { %v336_v0 = vld [vmem:[%s6351_s1] sm:$0x3]  ;;  %vm409_vm0 = vcmask 1041408   ;;  %p234_p5 = scmp.lt.s32.totalorder %s4847_s19, 1  ;;  %s4933_s27 = sshll.u32 %s4843_s18, 3  ;;  %vm252_vm1 = vcmask 24576  }
   0xf   : > { %4577 = vmatprep.subr.msk.bf16.mxu0 %vm409_vm0, %v336_v0  ;;  %4578 = vmatprep.subr.msk.bf16.mxu1 %vm409_vm0, %v336_v0  ;;  %v411_v1 = vsel %vm409_vm0, %v336_v0, 0  ;;  %p242_p6 = scmp.lt.s32.totalorder %s4933_s27, 15  ;;  %s4248_s28 = sshll.u32 %s4843_s18, 6  ;;  %vm253_vm2 = vsmask.f32 256  ;;  %vm384_vm6 = vcmask 31744  }
  0x10   : > { %4382 = vmatpush3.bf16.msra.mxu0 %v411_v1  ;;  %4574 = vmatpush3.bf16.msra.mxu1 %v411_v1  ;;  %s6455_s19 = smov (!%p234_p5, %s4847_s19), 1  ;;  %vm4942_vm3 = vmand %vm252_vm1, %vm253_vm2  ;;  %v255_v3 = vld [vmem:[#allocation2] sm:$0x1]  ;;  %v261_v4 = vld [vmem:[#allocation2 + $0x18] sm:$0x1]  ;;  %vm833_vm7 = vcmask 27648  }
  0x11   : > { %s243_s29 = scalar_select %p242_p6, %s4933_s27, 15  ;;  %v256_v5 = vsel %vm4942_vm3, 0, %v255_v3  ;;  %v262_v6 = vsel %vm4942_vm3, 0, %v261_v4  ;;  %v282_v7 = vld [vmem:[#allocation2 + $0x6c] sm:$0x1] }
  0x12   : > { %s4246_s30 = sshll.u32 %s6455_s19, 7  ;;  %s3956_s6 = sshll.u32 %s6455_s19, 5  ;;  %257 = vst [vmem:[#allocation2] sm:$0x1] %v256_v5  ;;  %263 = vst [vmem:[#allocation2 + $0x18] sm:$0x1] %v262_v6 }
  0x13   : > { %v283_v8 = vsel %vm4942_vm3, 0, %v282_v7  ;;  %vm285_vm4 = vsmask.f32 7938  ;;  %s4956_s9 = scalar_lea.vmem %s6350_s0, %s4246_s30  ;;  %s3955_s10 = sshll.u32 %s243_s29, 1  ;;  %v287_v10 = vld [vmem:[#allocation2 + $0x8] sm:$0x1] }
  0x14   : > { %284 = vst [vmem:[#allocation2 + $0x6c] sm:$0x1] %v283_v8  ;;  %vm4960_vm5 = vmand %vm252_vm1, %vm285_vm4  ;;  %v314_v11 = vld [vmem:[#allocation2 + $0x74] sm:$0x1]  ;;  %s246_s11 = sadd.s32 %s3956_s6, %s3955_s10  ;;  %s4965_s12 = scalar_lea.vmem %s4956_s9, %s4248_s28  ;;  %v273_v22 = vld [vmem:[#allocation2 + $0x48] sm:$0x1] }
  0x15   : > { %v288_v12 = vsel %vm4960_vm5, 0, %v287_v10  ;;  %v315_v13 = vsel %vm4960_vm5, 0, %v314_v11  ;;  %s3957_s13 = sshll.u32 %s246_s11, 2  ;;  %v4972_v14 = vld [vmem:[%s4965_s12] sm:$0xff]   ;;  %v4978_v16 = vld [vmem:[%s4965_s12 + $0x8] sm:$0xff]   ;;  %v4989_v18 = vld [vmem:[%s4965_s12 + $0x10] sm:$0xff]  }
  0x16   : > { %6376 = vst [vmem:[#allocation3_spill] sm:$0xff] %v4972_v14  ;;  %v4975_v15 = vld [vmem:[%s4965_s12 + $0x20] sm:$0xff]   ;;  %6378 = vst [vmem:[#allocation5_spill] sm:$0xff] %v4978_v16  ;;  %s4983_s16 = scalar_lea.vmem %s6355_s5, %s3957_s13  ;;  %v4986_v17 = vld [vmem:[%s4965_s12 + $0x28] sm:$0xff]   ;;  %4383 = vmatprep.mubr.msk.bf16.mxu0 %vm384_vm6, %v4972_v14  ;;  %v274_v23 = vsel %vm4942_vm3, 0, %v273_v22  ;;  %p4010_p7 = scmp.ne.s32.totalorder %s4843_s18, 0 }
  0x17   : > { %6377 = vst [vmem:[#allocation4_spill] sm:$0xff] %v4975_v15  ;;  %289 = vst [vmem:[#allocation2 + $0x8] sm:$0x1] %v288_v12  ;;  %v4992_v19 = vld [vmem:[%s4965_s12 + $0x30] sm:$0xff]   ;;  %4391 = vmatprep.mubr.msk.bf16.mxu1 %vm384_vm6, %v4975_v15  ;;  %4384 = vmatmul.mubr.msk.bf16.vlgmr.msra.gmra.mxu0 %vm384_vm6, %v4978_v16  ;;  %v5007_v20 = vld [vmem:[%s4965_s12 + $0x18] sm:$0xff]  }
  0x18   : > { %316 = vst [vmem:[#allocation2 + $0x74] sm:$0x1] %v315_v13  ;;  %6379 = vst [vmem:[#allocation6_spill] sm:$0xff] %v4986_v17  ;;  %4392 = vmatmul.mubr.msk.bf16.vlgmr.msra.gmra.mxu1 %vm384_vm6, %v4986_v17  ;;  %4387 = vmatprep.mubr.msk.bf16.mxu0 %vm384_vm6, %v4989_v18  ;;  %v5010_v21 = vld [vmem:[%s4965_s12 + $0x38] sm:$0xff]   ;;  %v258_v24 = vld [vmem:[#allocation2 + $0xc] sm:$0x1] }
  0x19   : > { %6380 = vst [vmem:[#allocation7_spill] sm:$0xff] %v4989_v18  ;;  %6381 = vst [vmem:[#allocation8_spill] sm:$0xff] %v4992_v19  ;;  %4395 = vmatprep.mubr.msk.bf16.mxu1 %vm384_vm6, %v4992_v19  ;;  %v270_v25 = vld [vmem:[#allocation2 + $0x3c] sm:$0x1]  ;;  %v259_v26 = vsel %vm4942_vm3, 0, %v258_v24 }
  0x1a   : > { %6382 = vst [vmem:[#allocation9_spill] sm:$0xff] %v5007_v20  ;;  %6383 = vst [vmem:[#allocation10_spill] sm:$0xff] %v5010_v21  ;;  %v271_v27 = vsel %vm4942_vm3, 0, %v270_v25  ;;  %v293_v28 = vld [vmem:[#allocation2 + $0x20] sm:$0x1] }
  0x1b   : > { %275 = vst [vmem:[#allocation2 + $0x48] sm:$0x1] %v274_v23  ;;  %260 = vst [vmem:[#allocation2 + $0xc] sm:$0x1] %v259_v26  ;;  %v305_v29 = vld [vmem:[#allocation2 + $0x50] sm:$0x1] }
  0x1c   : > { %272 = vst [vmem:[#allocation2 + $0x3c] sm:$0x1] %v271_v27  ;;  %v294_v30 = vsel %vm4960_vm5, 0, %v293_v28  ;;  %v306_v31 = vsel %vm4960_vm5, 0, %v305_v29  ;;  %v290_v32 = vld [vmem:[#allocation2 + $0x14] sm:$0x1]  ;;  %vm5105_vm9 = vmand %vm833_vm7, %vm285_vm4 }
  0x1d   : > { %295 = vst [vmem:[#allocation2 + $0x20] sm:$0x1] %v294_v30  ;;  %307 = vst [vmem:[#allocation2 + $0x50] sm:$0x1] %v306_v31  ;;  %v291_v33 = vsel %vm4960_vm5, 0, %v290_v32 }
  0x1e   : > { %292 = vst [vmem:[#allocation2 + $0x14] sm:$0x1] %v291_v33  ;;  %v302_v34 = vld [vmem:[#allocation2 + $0x44] sm:$0x1]  ;;  %v267_v36 = vld [vmem:[#allocation2 + $0x30] sm:$0x1] }
  0x1f   : > { %4388 = vmatmul.mubr.msk.bf16.gmra.mxu0 %vm384_vm6, %v5007_v20  ;;  %v303_v35 = vsel %vm4960_vm5, 0, %v302_v34  ;;  %v279_v37 = vld [vmem:[#allocation2 + $0x60] sm:$0x1]  ;;  %v268_v38 = vsel %vm4942_vm3, 0, %v267_v36  ;;  %v264_v40 = vld [vmem:[#allocation2 + $0x24] sm:$0x1] }
  0x20   : > { %4396 = vmatmul.mubr.msk.bf16.gmra.mxu1 %vm384_vm6, %v5010_v21  ;;  %304 = vst [vmem:[#allocation2 + $0x44] sm:$0x1] %v303_v35  ;;  %v280_v39 = vsel %vm4942_vm3, 0, %v279_v37  ;;  %269 = vst [vmem:[#allocation2 + $0x30] sm:$0x1] %v268_v38  ;;  %v265_v41 = vsel %vm4942_vm3, 0, %v264_v40 }
  0x21   : > { %281 = vst [vmem:[#allocation2 + $0x60] sm:$0x1] %v280_v39  ;;  %266 = vst [vmem:[#allocation2 + $0x24] sm:$0x1] %v265_v41  ;;  %v276_v42 = vld [vmem:[#allocation2 + $0x54] sm:$0x1] }
  0x22   : > { %v277_v43 = vsel %vm4942_vm3, 0, %v276_v42  ;;  %v299_v44 = vld [vmem:[#allocation2 + $0x38] sm:$0x1]  ;;  %v311_v46 = vld [vmem:[#allocation2 + $0x68] sm:$0x1] }
  0x23   : > { %278 = vst [vmem:[#allocation2 + $0x54] sm:$0x1] %v277_v43  ;;  %v300_v45 = vsel %vm4960_vm5, 0, %v299_v44  ;;  %v312_v47 = vsel %vm4960_vm5, 0, %v311_v46  ;;  %v296_v48 = vld [vmem:[#allocation2 + $0x2c] sm:$0x1] }
  0x24   : > { %301 = vst [vmem:[#allocation2 + $0x38] sm:$0x1] %v300_v45  ;;  %313 = vst [vmem:[#allocation2 + $0x68] sm:$0x1] %v312_v47  ;;  %v308_v49 = vld [vmem:[#allocation2 + $0x5c] sm:$0x1] }
  0x25   : > { %v297_v50 = vsel %vm4960_vm5, 0, %v296_v48  ;;  %v309_v51 = vsel %vm4960_vm5, 0, %v308_v49  ;;  %v3961_v52 = vld [vmem:[%s6352_s2] ss:$0 sm:$0xff]  ;;  %vm670_vm8 = vsmask.f32 4368 }
  0x26   : > { %298 = vst [vmem:[#allocation2 + $0x2c] sm:$0x1] %v297_v50  ;;  %310 = vst [vmem:[#allocation2 + $0x5c] sm:$0x1] %v309_v51 }
  0x27   : > { %vm5126_vm10 = vmor %vm253_vm2, %vm670_vm8 }
  0xd7   : > { %v4385_v53 = vpop.f32.mrf.mxu0 }
  0xd8   : > { %v4393_v54 = vpop.f32.mrf.mxu1  ;;  %v5049_v55 = vadd.f32 %v4385_v53, %v3961_v52 }
  0xd9   : > { %v5051_v56 = vadd.f32 %v4393_v54, %v3961_v52  ;;  %v447_v57 = vpop.f32.mrf.mxu0 }
  0xda   : > { %v479_v58 = vpop.f32.mrf.mxu1  ;;  %v3980_v59 = vmul.f32 -1.442695, %v5049_v55  ;;  %v5055_v61 = vadd.f32 %v3961_v52, %v447_v57 }
  0xdb   : > { %v3988_v60 = vmul.f32 -1.442695, %v5051_v56  ;;  %v5057_v62 = vadd.f32 %v3961_v52, %v479_v58  ;;  %v4386_v63 = vpop.f32.mrf.mxu0 }
  0xdc   : > { %v4394_v0 = vpop.f32.mrf.mxu1  ;;  %4651 = vpow2.f32 %v3980_v59  ;;  %v3978_v1 = vmul.f32 -1.442695, %v5055_v61  ;;  %v5061_v4 = vadd.f32 %v4386_v63, %v3961_v52 }
  0xdd   : > { %v3986_v3 = vmul.f32 -1.442695, %v5057_v62  ;;  %4653 = vpow2.f32 %v3988_v60  ;;  %v5063_v5 = vadd.f32 %v4394_v0, %v3961_v52  ;;  %v450_v6 = vpop.f32.mrf.mxu0 }
  0xde   : > { %v482_v7 = vpop.f32.mrf.mxu1  ;;  %4655 = vpow2.f32 %v3978_v1  ;;  %v3981_v8 = vmul.f32 -1.442695, %v5061_v4  ;;  %v5066_v9 = vadd.f32 %v3961_v52, %v450_v6 }
  0xdf   : > { %v5068_v10 = vadd.f32 %v3961_v52, %v482_v7  ;;  %4657 = vpow2.f32 %v3986_v3  ;;  %v3989_v11 = vmul.f32 -1.442695, %v5063_v5  ;;  %v4389_v12 = vpop.f32.mrf.mxu0 }
  0xe0   : > { %v4397_v13 = vpop.f32.mrf.mxu1  ;;  %4659 = vpow2.f32 %v3981_v8  ;;  %v3979_v22 = vmul.f32 -1.442695, %v5066_v9  ;;  %v5073_v24 = vadd.f32 %v4389_v12, %v3961_v52 }
  0xe1   : > { %v3987_v23 = vmul.f32 -1.442695, %v5068_v10  ;;  %4661 = vpow2.f32 %v3989_v11  ;;  %v5075_v25 = vadd.f32 %v4397_v13, %v3961_v52  ;;  %v463_v26 = vpop.f32.mrf.mxu0 }
  0xe2   : > { %v495_v27 = vpop.f32.mrf.mxu1  ;;  %4663 = vpow2.f32 %v3979_v22  ;;  %v3984_v28 = vmul.f32 -1.442695, %v5073_v24  ;;  %v5078_v29 = vadd.f32 %v3961_v52, %v463_v26 }
  0xe3   : > { %v5080_v30 = vadd.f32 %v3961_v52, %v495_v27  ;;  %4665 = vpow2.f32 %v3987_v23  ;;  %v3992_v31 = vmul.f32 -1.442695, %v5075_v25  ;;  %v4390_v32 = vpop.f32.mrf.mxu0 }
  0xe4   : > { %v4398_v33 = vpop.f32.mrf.mxu1  ;;  %4667 = vpow2.f32 %v3984_v28  ;;  %v3982_v34 = vmul.f32 -1.442695, %v5078_v29  ;;  %v5085_v36 = vadd.f32 %v4390_v32, %v3961_v52 }
  0xe5   : > { %v3990_v35 = vmul.f32 -1.442695, %v5080_v30  ;;  %4669 = vpow2.f32 %v3992_v31  ;;  %v5087_v37 = vadd.f32 %v4398_v33, %v3961_v52  ;;  %v466_v38 = vpop.f32.mrf.mxu0 }
  0xe6   : > { %v498_v39 = vpop.f32.mrf.mxu1  ;;  %4671 = vpow2.f32 %v3982_v34  ;;  %v3985_v40 = vmul.f32 -1.442695, %v5085_v36  ;;  %v5090_v41 = vadd.f32 %v3961_v52, %v466_v38 }
  0xe7   : > { %v5092_v42 = vadd.f32 %v3961_v52, %v498_v39  ;;  %4673 = vpow2.f32 %v3990_v35  ;;  %v3993_v43 = vmul.f32 -1.442695, %v5087_v37 }
  0xe8   : > { %4675 = vpow2.f32 %v3985_v40  ;;  %v3983_v44 = vmul.f32 -1.442695, %v5090_v41 }
  0xe9   : > { %v3991_v45 = vmul.f32 -1.442695, %v5092_v42  ;;  %v4652_v46 = vpop.eup %4651  ;;  %4677 = vpow2.f32 %v3993_v43 }
  0xea   : > { %v4654_v47 = vpop.eup %4653  ;;  %v560_v48 = vadd.f32 1.0, %v4652_v46  ;;  %4679 = vpow2.f32 %v3983_v44 }
  0xeb   : > { %v4656_v49 = vpop.eup %4655  ;;  %v568_v50 = vadd.f32 1.0, %v4654_v47  ;;  %4681 = vpow2.f32 %v3991_v45 }
  0xec   : > { %v4658_v51 = vpop.eup %4657  ;;  %4683 = vrcp.f32 %v560_v48  ;;  %v558_v52 = vadd.f32 1.0, %v4656_v49 }
  0xed   : > { %v4660_v53 = vpop.eup %4659  ;;  %4685 = vrcp.f32 %v568_v50  ;;  %v566_v54 = vadd.f32 1.0, %v4658_v51 }
  0xee   : > { %v4662_v57 = vpop.eup %4661  ;;  %4687 = vrcp.f32 %v558_v52  ;;  %v561_v58 = vadd.f32 1.0, %v4660_v53 }
  0xef   : > { %v4664_v59 = vpop.eup %4663  ;;  %4689 = vrcp.f32 %v566_v54  ;;  %v569_v60 = vadd.f32 1.0, %v4662_v57 }
  0xf0   : > { %v4666_v63 = vpop.eup %4665  ;;  %4691 = vrcp.f32 %v561_v58  ;;  %v559_v1 = vadd.f32 1.0, %v4664_v59 }
  0xf1   : > { %v4668_v0 = vpop.eup %4667  ;;  %4693 = vrcp.f32 %v569_v60  ;;  %v567_v6 = vadd.f32 1.0, %v4666_v63  ;;  %v843_v63 = vld [vmem:[#allocation2 + $0x18] sm:$0xf] }
  0xf2   : > { %v4670_v3 = vpop.eup %4669  ;;  %v564_v8 = vadd.f32 1.0, %v4668_v0  ;;  %4695 = vrcp.f32 %v559_v1 }
  0xf3   : > { %v4672_v7 = vpop.eup %4671  ;;  %v572_v12 = vadd.f32 1.0, %v4670_v3  ;;  %4697 = vrcp.f32 %v567_v6 }
  0xf4   : > { %v4674_v11 = vpop.eup %4673  ;;  %v562_v22 = vadd.f32 1.0, %v4672_v7  ;;  %4699 = vrcp.f32 %v564_v8  ;;  %v871_v8 = vld [vmem:[#allocation2 + $0x48] sm:$0xf] }
  0xf5   : > { %v4676_v13 = vpop.eup %4675  ;;  %v570_v26 = vadd.f32 1.0, %v4674_v11  ;;  %4701 = vrcp.f32 %v572_v12 }
  0xf6   : > { %v4678_v23 = vpop.eup %4677  ;;  %v565_v28 = vadd.f32 1.0, %v4676_v13  ;;  %4703 = vrcp.f32 %v562_v22 }
  0xf7   : > { %v4680_v27 = vpop.eup %4679  ;;  %v573_v32 = vadd.f32 1.0, %v4678_v23  ;;  %4705 = vrcp.f32 %v570_v26 }
  0xf8   : > { %v4682_v31 = vpop.eup %4681  ;;  %v563_v34 = vadd.f32 1.0, %v4680_v27  ;;  %4707 = vrcp.f32 %v565_v28  ;;  %v835_v27 = vld [vmem:[#allocation2 + $0xc] sm:$0xf] }
  0xf9   : > { %v4684_v33 = vpop.eup %4683  ;;  %v571_v39 = vadd.f32 1.0, %v4682_v31  ;;  %4709 = vrcp.f32 %v573_v32 }
  0xfa   : > { %v4686_v35 = vpop.eup %4685  ;;  %v608_v38 = vmul.f32 %v4684_v33, %v5049_v55  ;;  %4711 = vrcp.f32 %v563_v34  ;;  %v864_v34 = vld [vmem:[#allocation2 + $0x3c] sm:$0xf] }
  0xfb   : > { %v4688_v40 = vpop.eup %4687  ;;  %v616_v43 = vmul.f32 %v4686_v35, %v5051_v56  ;;  %4713 = vrcp.f32 %v571_v39 }
  0xfc   : > { %v4690_v44 = vpop.eup %4689  ;;  %v4251_v45 = vpack.c.bf16 %v608_v38, %v608_v38  ;;  %v606_v46 = vmul.f32 %v4688_v40, %v5055_v61 }
  0xfd   : > { %v4692_v47 = vpop.eup %4691  ;;  %v4259_v48 = vpack.c.bf16 %v616_v43, %v616_v43  ;;  %v614_v49 = vmul.f32 %v4690_v44, %v5057_v62 }
  0xfe   : > { %v4694_v50 = vpop.eup %4693  ;;  %v690_v55 = vshrl.u32 %v4251_v45, 16  ;;  %v4249_v51 = vpack.c.bf16 %v606_v46, %v606_v46  ;;  %v609_v52 = vmul.f32 %v4692_v47, %v5061_v4  ;;  %v693_v56 = vshll.u32 %v4251_v45, 16  ;;  %v847_v46 = vld [vmem:[#allocation2 + $0x20] sm:$0x1] }
  0xff   : > { %v758_v53 = vshrl.u32 %v4259_v48, 16  ;;  %v4257_v54 = vpack.c.bf16 %v614_v49, %v614_v49  ;;  %v617_v57 = vmul.f32 %v4694_v50, %v5063_v5  ;;  %v761_v61 = vshll.u32 %v4259_v48, 16  ;;  %v4696_v6 = vpop.eup %4695 }
 0x100   : > { %v692_v58 = vrot.slane %v690_v55, 7  ;;  %v673_v59 = vshrl.u32 %v4249_v51, 16  ;;  %v4252_v60 = vpack.c.bf16 %v609_v52, %v609_v52  ;;  %v676_v4 = vshll.u32 %v4249_v51, 16  ;;  %v4698_v13 = vpop.eup %4697 }
 0x101   : > { %v5109_v0 = vrot.slane %v758_v53, 7  ;;  %v741_v1 = vshrl.u32 %v4257_v54, 16  ;;  %v4260_v3 = vpack.c.bf16 %v617_v57, %v617_v57  ;;  %v744_v11 = vshll.u32 %v4257_v54, 16  ;;  %v4700_v31 = vpop.eup %4699 }
 0x102   : > { %v695_v7 = vor.u32 %v693_v56, %v692_v58  ;;  %v5111_v5 = vrot.slane %v673_v59, 7  ;;  %v698_v12 = vshrl.u32 %v4252_v60, 16  ;;  %v696_v22 = vrot.slane %v692_v58, 4  ;;  %v4702_v39 = vpop.eup %4701 }
 0x103   : > { %v763_v23 = vor.u32 %v761_v61, %v5109_v0  ;;  %v764_v26 = vrot.slane %v5109_v0, 4  ;;  %v5115_v28 = vrot.slane %v741_v1, 7  ;;  %v701_v38 = vshll.u32 %v4252_v60, 16  ;;  %v4704_v48 = vpop.eup %4703  ;;  %v875_v60 = vld [vmem:[#allocation2 + $0x50] sm:$0x1] }
 0x104   : > { %v844_v32 = vsel %vm5105_vm9, %v695_v7, %v843_v63  ;;  %v678_v33 = vor.u32 %v676_v4, %v5111_v5  ;;  %v700_v35 = vrot.slane %v698_v12, 7  ;;  %v679_v43 = vrot.slane %v5111_v5, 4  ;;  %v4706_v52 = vpop.eup %4705 }
 0x105   : > { %845 = vst [vmem:[#allocation2 + $0x18] sm:$0xf] %v844_v32  ;;  %v872_v40 = vsel %vm5105_vm9, %v763_v23, %v871_v8  ;;  %v746_v44 = vor.u32 %v744_v11, %v5115_v28  ;;  %v766_v47 = vshrl.u32 %v4260_v3, 16  ;;  %v769_v51 = vshll.u32 %v4260_v3, 16  ;;  %v4708_v58 = vpop.eup %4707 }
 0x106   : > { %873 = vst [vmem:[#allocation2 + $0x48] sm:$0xf] %v872_v40  ;;  %v836_v49 = vsel %vm5105_vm9, %v678_v33, %v835_v27  ;;  %v703_v50 = vor.u32 %v701_v38, %v700_v35  ;;  %v705_v55 = vrot.slane %v700_v35, 4  ;;  %v607_v54 = vmul.f32 %v4696_v6, %v5066_v9  ;;  %v4710_v4 = vpop.eup %4709 }
 0x107   : > { %837 = vst [vmem:[#allocation2 + $0xc] sm:$0xf] %v836_v49  ;;  %v865_v56 = vsel %vm5105_vm9, %v746_v44, %v864_v34  ;;  %v768_v53 = vrot.slane %v766_v47, 7  ;;  %v615_v57 = vmul.f32 %v4698_v13, %v5068_v10  ;;  %v612_v63 = vmul.f32 %v4700_v31, %v5073_v24  ;;  %v4712_v6 = vpop.eup %4711  ;;  %v840_v34 = vld [vmem:[#allocation2 + $0x14] sm:$0x1] }
 0x108   : > { %866 = vst [vmem:[#allocation2 + $0x3c] sm:$0xf] %v865_v56  ;;  %v704_v61 = vsel %vm5126_vm10, %v696_v22, %v703_v50  ;;  %v848_v59 = vsel %vm4942_vm3, %v705_v55, %v847_v46  ;;  %v620_v0 = vmul.f32 %v4702_v39, %v5075_v25  ;;  %v4250_v10 = vpack.c.bf16 %v607_v54, %v607_v54  ;;  %v4714_v13 = vpop.eup %4713  ;;  %v868_v39 = vld [vmem:[#allocation2 + $0x44] sm:$0x1]  ;;  %v885_v56 = vld [vmem:[#allocation2 + $0x60] sm:$0xf] }
 0x109   : > { %846 = vst.msk [vmem:[#allocation2 + $0x1c] sm:$0xf] %vm833_vm7, %v704_v61  ;;  %849 = vst [vmem:[#allocation2 + $0x20] sm:$0x1] %v848_v59  ;;  %v771_v9 = vor.u32 %v769_v51, %v768_v53  ;;  %v773_v1 = vrot.slane %v768_v53, 4  ;;  %v4258_v3 = vpack.c.bf16 %v615_v57, %v615_v57  ;;  %v4255_v7 = vpack.c.bf16 %v612_v63, %v612_v63 }
 0x10a   : > { %v4263_v8 = vpack.c.bf16 %v620_v0, %v620_v0  ;;  %v610_v11 = vmul.f32 %v4704_v48, %v5078_v29  ;;  %v618_v12 = vmul.f32 %v4706_v52, %v5080_v30  ;;  %v747_v24 = vrot.slane %v5115_v28, 4  ;;  %v857_v48 = vld [vmem:[#allocation2 + $0x30] sm:$0xf]  ;;  %v850_v0 = vld [vmem:[#allocation2 + $0x24] sm:$0xf] }
 0x10b   : > { %v772_v25 = vsel %vm5126_vm10, %v764_v26, %v771_v9  ;;  %v876_v22 = vsel %vm4942_vm3, %v773_v1, %v875_v60  ;;  %v681_v23 = vshrl.u32 %v4250_v10, 16  ;;  %v684_v27 = vshll.u32 %v4250_v10, 16 }
 0x10c   : > { %874 = vst.msk [vmem:[#allocation2 + $0x4c] sm:$0xf] %vm833_vm7, %v772_v25  ;;  %877 = vst [vmem:[#allocation2 + $0x50] sm:$0x1] %v876_v22  ;;  %v749_v31 = vshrl.u32 %v4258_v3, 16  ;;  %v752_v32 = vshll.u32 %v4258_v3, 16  ;;  %v4253_v38 = vpack.c.bf16 %v610_v11, %v610_v11  ;;  %v4261_v44 = vpack.c.bf16 %v618_v12, %v618_v12 }
 0x10d   : > { %v724_v33 = vshrl.u32 %v4255_v7, 16  ;;  %v683_v29 = vrot.slane %v681_v23, 7  ;;  %v727_v30 = vshll.u32 %v4255_v7, 16  ;;  %v792_v35 = vshrl.u32 %v4263_v8, 16 }
 0x10e   : > { %v751_v28 = vrot.slane %v749_v31, 7  ;;  %v795_v26 = vshll.u32 %v4263_v8, 16  ;;  %v707_v50 = vshrl.u32 %v4253_v38, 16  ;;  %v613_v53 = vmul.f32 %v4708_v58, %v5085_v36 }
 0x10f   : > { %v5151_v40 = vrot.slane %v724_v33, 7  ;;  %v686_v46 = vor.u32 %v684_v27, %v683_v29  ;;  %v688_v47 = vrot.slane %v683_v29, 4  ;;  %v5153_v49 = vrot.slane %v792_v35, 7  ;;  %v861_v29 = vld [vmem:[#allocation2 + $0x38] sm:$0x1] }
 0x110   : > { %v754_v55 = vor.u32 %v752_v32, %v751_v28  ;;  %v756_v51 = vrot.slane %v751_v28, 4  ;;  %v5171_v5 = vrot.slane %v707_v50, 7  ;;  %v710_v58 = vshll.u32 %v4253_v38, 16 }
 0x111   : > { %v729_v52 = vor.u32 %v727_v30, %v5151_v40  ;;  %v687_v54 = vsel %vm5126_vm10, %v679_v43, %v686_v46  ;;  %v841_v57 = vsel %vm4942_vm3, %v688_v47, %v840_v34  ;;  %v797_v61 = vor.u32 %v795_v26, %v5153_v49  ;;  %v889_v26 = vld [vmem:[#allocation2 + $0x68] sm:$0x1] }
 0x112   : > { %839 = vst.msk [vmem:[#allocation2 + $0x10] sm:$0xf] %vm833_vm7, %v687_v54  ;;  %842 = vst [vmem:[#allocation2 + $0x14] sm:$0x1] %v841_v57  ;;  %v755_v59 = vsel %vm5126_vm10, %v747_v24, %v754_v55  ;;  %v869_v60 = vsel %vm4942_vm3, %v756_v51, %v868_v39  ;;  %v775_v63 = vshrl.u32 %v4261_v44, 16  ;;  %v4256_v9 = vpack.c.bf16 %v613_v53, %v613_v53 }
 0x113   : > { %v858_v36 = vsel %vm5105_vm9, %v729_v52, %v857_v48  ;;  %867 = vst.msk [vmem:[#allocation2 + $0x40] sm:$0xf] %vm833_vm7, %v755_v59  ;;  %870 = vst [vmem:[#allocation2 + $0x44] sm:$0x1] %v869_v60  ;;  %v886_v43 = vsel %vm5105_vm9, %v797_v61, %v885_v56  ;;  %v621_v1 = vmul.f32 %v4710_v4, %v5087_v37  ;;  %v778_v8 = vshll.u32 %v4261_v44, 16 }
 0x114   : > { %859 = vst [vmem:[#allocation2 + $0x30] sm:$0xf] %v858_v36  ;;  %887 = vst [vmem:[#allocation2 + $0x60] sm:$0xf] %v886_v43  ;;  %v611_v10 = vmul.f32 %v4712_v6, %v5090_v41  ;;  %v712_v3 = vor.u32 %v710_v58, %v5171_v5  ;;  %v777_v7 = vrot.slane %v775_v63, 7  ;;  %v619_v11 = vmul.f32 %v4714_v13, %v5092_v42 }
 0x115   : > { %v730_v12 = vrot.slane %v5151_v40, 4  ;;  %v878_v24 = vld [vmem:[#allocation2 + $0x54] sm:$0xf]  ;;  %v732_v25 = vshrl.u32 %v4256_v9, 16  ;;  %v4264_v22 = vpack.c.bf16 %v621_v1, %v621_v1  ;;  %v798_v27 = vrot.slane %v5153_v49, 4 }
 0x116   : > { %v4254_v23 = vpack.c.bf16 %v611_v10, %v611_v10  ;;  %v851_v31 = vsel %vm5105_vm9, %v712_v3, %v850_v0  ;;  %v780_v37 = vor.u32 %v778_v8, %v777_v7  ;;  %v4262_v4 = vpack.c.bf16 %v619_v11, %v619_v11  ;;  %v854_v51 = vld [vmem:[#allocation2 + $0x2c] sm:$0x1]  ;;  %v882_v52 = vld [vmem:[#allocation2 + $0x5c] sm:$0x1] }
 0x117   : > { %852 = vst [vmem:[#allocation2 + $0x24] sm:$0xf] %v851_v31  ;;  %v734_v41 = vrot.slane %v732_v25, 7  ;;  %v735_v6 = vshll.u32 %v4256_v9, 16  ;;  %v800_v32 = vshrl.u32 %v4264_v22, 16  ;;  %v713_v42 = vrot.slane %v5171_v5, 4 }
 0x118   : > { %v715_v33 = vshrl.u32 %v4254_v23, 16  ;;  %v879_v13 = vsel %vm5105_vm9, %v780_v37, %v878_v24  ;;  %v803_v34 = vshll.u32 %v4264_v22, 16  ;;  %v783_v30 = vshrl.u32 %v4262_v4, 16 }
 0x119   : > { %880 = vst [vmem:[#allocation2 + $0x54] sm:$0xf] %v879_v13  ;;  %v737_v35 = vor.u32 %v735_v6, %v734_v41  ;;  %v739_v38 = vrot.slane %v734_v41, 4  ;;  %v802_v28 = vrot.slane %v800_v32, 7  ;;  %v781_v40 = vrot.slane %v777_v7, 4 }
 0x11a   : > { %v717_v39 = vrot.slane %v715_v33, 7  ;;  %v718_v44 = vshll.u32 %v4254_v23, 16  ;;  %v785_v46 = vrot.slane %v783_v30, 7  ;;  %v786_v47 = vshll.u32 %v4262_v4, 16 }
 0x11b   : > { %v738_v48 = vsel %vm5126_vm10, %v730_v12, %v737_v35  ;;  %v862_v49 = vsel %vm4942_vm3, %v739_v38, %v861_v29  ;;  %v805_v50 = vor.u32 %v803_v34, %v802_v28  ;;  %v807_v55 = vrot.slane %v802_v28, 4 }
 0x11c   : > { %860 = vst.msk [vmem:[#allocation2 + $0x34] sm:$0xf] %vm833_vm7, %v738_v48  ;;  %863 = vst [vmem:[#allocation2 + $0x38] sm:$0x1] %v862_v49  ;;  %v720_v56 = vor.u32 %v718_v44, %v717_v39  ;;  %v722_v53 = vrot.slane %v717_v39, 4  ;;  %v788_v54 = vor.u32 %v786_v47, %v785_v46  ;;  %v790_v57 = vrot.slane %v785_v46, 4 }
 0x11d   : > { %v806_v61 = vsel %vm5126_vm10, %v798_v27, %v805_v50  ;;  %v890_v59 = vsel %vm4942_vm3, %v807_v55, %v889_v26  ;;  %895 = sbr.rel (%p4010_p7) target bundleno = 293 (0x125), region = 44 }
 0x11e   : > { %888 = vst.msk [vmem:[#allocation2 + $0x64] sm:$0xf] %vm833_vm7, %v806_v61  ;;  %891 = vst [vmem:[#allocation2 + $0x68] sm:$0x1] %v890_v59  ;;  %v721_v60 = vsel %vm5126_vm10, %v713_v42, %v720_v56  ;;  %v855_v36 = vsel %vm4942_vm3, %v722_v53, %v854_v51  ;;  %v789_v5 = vsel %vm5126_vm10, %v781_v40, %v788_v54 }
 0x11f   : > { %v883_v43 = vsel %vm4942_vm3, %v790_v57, %v882_v52  ;;  %853 = vst.msk [vmem:[#allocation2 + $0x28] sm:$0xf] %vm833_vm7, %v721_v60  ;;  %856 = vst [vmem:[#allocation2 + $0x2c] sm:$0x1] %v855_v36 }
 0x120   : > { %881 = vst.msk [vmem:[#allocation2 + $0x58] sm:$0xf] %vm833_vm7, %v789_v5  ;;  %884 = vst [vmem:[#allocation2 + $0x5c] sm:$0x1] %v883_v43 }
 0x122   : > { %v896_v58 = vld [vmem:[#allocation2] sm:$0xf]  ;;  %v900_v63 = vld [vmem:[#allocation2 + $0x8] sm:$0x1]  ;;  %v4861_v9 = vmov 0  }
 0x123   : > { %v897_v0 = vsel %vm5105_vm9, 0, %v896_v58  ;;  %899 = vst.msk [vmem:[#allocation2 + $0x4] sm:$0xf] %vm833_vm7, %v4861_v9  ;;  %v901_v1 = vsel %vm4942_vm3, 0, %v900_v63 }
 0x124   : > { %898 = vst [vmem:[#allocation2] sm:$0xf] %v897_v0  ;;  %902 = vst [vmem:[#allocation2 + $0x8] sm:$0x1] %v901_v1 }
 0x125 PF: > { %p4011_p8 = scmp.le.s32.totalorder %s4843_s18, 0 }
 0x126   : > { %s4012_s28 = sadd.s32 (!%p4011_p8), 4294967295, %s4933_s27 }
 0x127   : > { %906 = sbr.rel (%p4011_p8) target bundleno = 548 (0x224), region = 48  ;;  %s4265_s29 = sshll.u32 (!%p4011_p8), %s4012_s28, 3 }
 0x128   : > { %s910_s30 = scalar_lea.vmem (!%p4011_p8), %s4956_s9, %s4265_s29 }
 0x12c   : > { %v913_v10 = vld [vmem:[%s6351_s1] sm:$0x3]  ;;  %v4862_v3 = vmov 0.0   ;;  %vm4863_vm11 = vmmov 0   ;;  %v1017_v48 = vld [vmem:[#allocation2 + $0x8] sm:$0x1] }
 0x12d   : > { %4399 = vmatprep.subr.bf16.mxu0 %v4862_v3  ;;  %v930_v7 = vsel %vm409_vm0, %v913_v10, 0  ;;  %4401 = vmatprep.mubr.msk.bf16.mxu0 %vm4863_vm11, %v4862_v3  ;;  %v4715_v8 = vld [vmem:[%s910_s30] sm:$0xff]  }
 0x12e   : > { %4400 = vmatpush3.bf16.msra.mxu0 %v930_v7  ;;  %v4015_v11 = vld [vmem:[%s6352_s2] ss:$0 sm:$0xff] }
 0x12f   : > { %v1013_v39 = vld [vmem:[#allocation2] sm:$0xf] }
 0x131   : > { %4402 = vmatmul.mubr.msk.bf16.vlgmr.msra.gmra.mxu0 %vm384_vm6, %v4715_v8 }
 0x1f1   : > { %v966_v12 = vpop.f32.mrf.mxu0 }
 0x1f2   : > { %v967_v24 = vadd.f32 %v4015_v11, %v966_v12 }
 0x1f3   : > { %v4403_v25 = vpop.f32.mrf.mxu0 }
 0x1f4   : > { %v4018_v22 = vmul.f32 -1.442695, %v967_v24 }
 0x1f5   : > { %v969_v23 = vpop.f32.mrf.mxu0 }
 0x1f6   : > { %4716 = vpow2.f32 %v4018_v22  ;;  %v970_v27 = vadd.f32 %v4015_v11, %v969_v23 }
 0x1f7   : > { %v4404_v31 = vpop.f32.mrf.mxu0 }
 0x1f8   : > { %v4019_v37 = vmul.f32 -1.442695, %v970_v27 }
 0x1fa   : > { %4718 = vpow2.f32 %v4019_v37 }
 0x203   : > { %v4717_v4 = vpop.eup %4716 }
 0x204   : > { %v979_v41 = vadd.f32 1.0, %v4717_v4 }
 0x206   : > { %4720 = vrcp.f32 %v979_v41 }
 0x207   : > { %v4719_v6 = vpop.eup %4718 }
 0x208   : > { %v980_v32 = vadd.f32 1.0, %v4719_v6 }
 0x20a   : > { %4722 = vrcp.f32 %v980_v32 }
 0x213   : > { %v4721_v33 = vpop.eup %4720 }
 0x214   : > { %v985_v42 = vmul.f32 %v4721_v33, %v967_v24 }
 0x216   : > { %v4266_v13 = vpack.c.bf16 %v985_v42, %v985_v42 }
 0x217   : > { %v4723_v29 = vpop.eup %4722 }
 0x218   : > { %v994_v34 = vshrl.u32 %v4266_v13, 16  ;;  %v986_v30 = vmul.f32 %v4723_v29, %v970_v27  ;;  %v997_v38 = vshll.u32 %v4266_v13, 16 }
 0x21a   : > { %v996_v35 = vrot.slane %v994_v34, 7  ;;  %v4267_v28 = vpack.c.bf16 %v986_v30, %v986_v30 }
 0x21c   : > { %v999_v40 = vor.u32 %v997_v38, %v996_v35  ;;  %v1002_v26 = vshrl.u32 %v4267_v28, 16  ;;  %v1005_v47 = vshll.u32 %v4267_v28, 16  ;;  %v1000_v49 = vrot.slane %v996_v35, 4 }
 0x21e   : > { %v1014_v44 = vsel %vm5105_vm9, %v999_v40, %v1013_v39  ;;  %v1004_v46 = vrot.slane %v1002_v26, 7 }
 0x21f   : > { %1015 = vst [vmem:[#allocation2] sm:$0xf] %v1014_v44 }
 0x220   : > { %v1007_v50 = vor.u32 %v1005_v47, %v1004_v46  ;;  %v1009_v55 = vrot.slane %v1004_v46, 4 }
 0x222   : > { %v1008_v51 = vsel %vm5126_vm10, %v1000_v49, %v1007_v50  ;;  %v1018_v52 = vsel %vm4942_vm3, %v1009_v55, %v1017_v48 }
 0x223   : > { %1016 = vst.msk [vmem:[#allocation2 + $0x4] sm:$0xf] %vm833_vm7, %v1008_v51  ;;  %1019 = vst [vmem:[#allocation2 + $0x8] sm:$0x1] %v1018_v52 }
 0x224 PF: > { %p4022_p9 = scmp.ne.s32.totalorder %s4843_s18, 1 }
 0x226   : > { %1023 = sbr.rel (%p4022_p9) target bundleno = 558 (0x22e), region = 52 }
 0x22b   : > { %v1025_v56 = vld [vmem:[#allocation2 + $0x6c] sm:$0xf]  ;;  %v1029_v53 = vld [vmem:[#allocation2 + $0x74] sm:$0x1]  ;;  %v4864_v57 = vmov 0  }
 0x22c   : > { %v1026_v54 = vsel %vm5105_vm9, 0, %v1025_v56  ;;  %1028 = vst.msk [vmem:[#allocation2 + $0x70] sm:$0xf] %vm833_vm7, %v4864_v57  ;;  %v1030_v61 = vsel %vm4942_vm3, 0, %v1029_v53 }
 0x22d   : > { %1027 = vst [vmem:[#allocation2 + $0x6c] sm:$0xf] %v1026_v54  ;;  %1031 = vst [vmem:[#allocation2 + $0x74] sm:$0x1] %v1030_v61 }
 0x22e PF: > { %p4023_p10 = scmp.ge.s32.totalorder %s4843_s18, 1 }
 0x230   : > { %1035 = sbr.rel (%p4023_p10) target bundleno = 813 (0x32d), region = 56 }
 0x235   : > { %v1042_v59 = vld [vmem:[%s6351_s1] sm:$0x3]  ;;  %v4865_v60 = vmov 0.0   ;;  %vm4866_vm12 = vmmov 0   ;;  %v1143_v32 = vld [vmem:[#allocation2 + $0x6c] sm:$0xf] }
 0x236   : > { %4405 = vmatprep.subr.bf16.mxu0 %v4865_v60  ;;  %v1059_v36 = vsel %vm409_vm0, %v1042_v59, 0  ;;  %4407 = vmatprep.mubr.msk.bf16.mxu0 %vm4866_vm12, %v4865_v60  ;;  %v4724_v5 = vld [vmem:[%s4965_s12 + $0x40] sm:$0xff]   ;;  %v1147_v30 = vld [vmem:[#allocation2 + $0x74] sm:$0x1] }
 0x237   : > { %4406 = vmatpush3.bf16.msra.mxu0 %v1059_v36  ;;  %v4028_v43 = vld [vmem:[%s6352_s2] ss:$0 sm:$0xff] }
 0x23a   : > { %4408 = vmatmul.mubr.msk.bf16.vlgmr.msra.gmra.mxu0 %vm384_vm6, %v4724_v5 }
 0x2fa   : > { %v1095_v58 = vpop.f32.mrf.mxu0 }
 0x2fb   : > { %v1096_v63 = vadd.f32 %v4028_v43, %v1095_v58 }
 0x2fc   : > { %v4409_v0 = vpop.f32.mrf.mxu0 }
 0x2fd   : > { %v4031_v9 = vmul.f32 -1.442695, %v1096_v63 }
 0x2fe   : > { %v1098_v1 = vpop.f32.mrf.mxu0 }
 0x2ff   : > { %4725 = vpow2.f32 %v4031_v9  ;;  %v1099_v10 = vadd.f32 %v4028_v43, %v1098_v1 }
 0x300   : > { %v4410_v3 = vpop.f32.mrf.mxu0 }
 0x301   : > { %v4032_v7 = vmul.f32 -1.442695, %v1099_v10 }
 0x303   : > { %4727 = vpow2.f32 %v4032_v7 }
 0x30c   : > { %v4726_v8 = vpop.eup %4725 }
 0x30d   : > { %v1108_v11 = vadd.f32 1.0, %v4726_v8 }
 0x30f   : > { %4729 = vrcp.f32 %v1108_v11 }
 0x310   : > { %v4728_v12 = vpop.eup %4727 }
 0x311   : > { %v1109_v24 = vadd.f32 1.0, %v4728_v12 }
 0x313   : > { %4731 = vrcp.f32 %v1109_v24 }
 0x31c   : > { %v4730_v25 = vpop.eup %4729 }
 0x31d   : > { %v1114_v22 = vmul.f32 %v4730_v25, %v1096_v63 }
 0x31f   : > { %v4269_v23 = vpack.c.bf16 %v1114_v22, %v1114_v22 }
 0x320   : > { %v4732_v27 = vpop.eup %4731 }
 0x321   : > { %v1123_v31 = vshrl.u32 %v4269_v23, 16  ;;  %v1115_v37 = vmul.f32 %v4732_v27, %v1099_v10  ;;  %v1126_v41 = vshll.u32 %v4269_v23, 16 }
 0x323   : > { %v1125_v4 = vrot.slane %v1123_v31, 7  ;;  %v4270_v6 = vpack.c.bf16 %v1115_v37, %v1115_v37 }
 0x325   : > { %v1128_v33 = vor.u32 %v1126_v41, %v1125_v4  ;;  %v1131_v42 = vshrl.u32 %v4270_v6, 16  ;;  %v1134_v34 = vshll.u32 %v4270_v6, 16  ;;  %v1129_v35 = vrot.slane %v1125_v4, 4 }
 0x327   : > { %v1144_v13 = vsel %vm5105_vm9, %v1128_v33, %v1143_v32  ;;  %v1133_v29 = vrot.slane %v1131_v42, 7 }
 0x328   : > { %1145 = vst [vmem:[#allocation2 + $0x6c] sm:$0xf] %v1144_v13 }
 0x329   : > { %v1136_v38 = vor.u32 %v1134_v34, %v1133_v29  ;;  %v1138_v28 = vrot.slane %v1133_v29, 4 }
 0x32b   : > { %v1137_v39 = vsel %vm5126_vm10, %v1129_v35, %v1136_v38  ;;  %v1148_v40 = vsel %vm4942_vm3, %v1138_v28, %v1147_v30 }
 0x32c   : > { %1146 = vst.msk [vmem:[#allocation2 + $0x70] sm:$0xf] %vm833_vm7, %v1137_v39  ;;  %1149 = vst [vmem:[#allocation2 + $0x74] sm:$0x1] %v1148_v40 }
 0x32d PF: > { %v4035_v62 = vld [vmem:[%s6353_s3 + $0x2] sm:$0x3]  ;;  %v5259_v44 = vld [vmem:[#allocation2 + $0x4] sm:$0xf]  ;;  %v5264_v2 = vld [vmem:[#allocation2 + $0x8] sm:$0x1] }
 0x32e   : > { %v5257_v26 = vld [vmem:[#allocation2] sm:$0xf]  ;;  %4580 = vmatprep.subr.msk.bf16.mxu1 %vm409_vm0, %v4035_v62  ;;  %4579 = vmatprep.subr.msk.bf16.mxu0 %vm409_vm0, %v4035_v62  ;;  %v1421_v45 = vsel %vm409_vm0, %v4035_v62, 0  ;;  %vm1175_vm13 = vsmask.f32 3328  ;;  %v1188_v48 = vshll.u32 %v5259_v44, 16 }
 0x32f   : > { %v1179_v46 = vshrl.u32 %v5257_v26, 16  ;;  %4576 = vmatpush3.bf16.msra.mxu1 %v1421_v45  ;;  %4412 = vmatpush3.bf16.msra.mxu0 %v1421_v45  ;;  %v1182_v47 = vshll.u32 %v5257_v26, 16  ;;  %v1192_v49 = vshrl.u32 %v5259_v44, 16  ;;  %vm1176_vm14 = vsmask.f32 7440 }
 0x330   : > { %v1198_v55 = vshll.u32 %v5264_v2, 16  ;;  %v5271_v51 = vld [vmem:[#allocation2 + $0x30] sm:$0xf]  ;;  %v1190_v56 = vrot.slane %v1188_v48, 5  ;;  %v5273_v54 = vld [vmem:[#allocation2 + $0x34] sm:$0xf]  ;;  %vm5289_vm15 = vmor %vm1175_vm13, %vm1176_vm14 }
 0x331   : > { %v1181_v50 = vrot.slane %v1179_v46, 4  ;;  %v1184_v52 = vrot.slane %v1182_v47, 5  ;;  %v1194_v53 = vrot.slane %v1192_v49, 4  ;;  %v1275_v57 = vshrl.u32 %v5271_v51, 16  ;;  %v5276_v59 = vld [vmem:[#allocation2 + $0x38] sm:$0x1] }
 0x332   : > { %v1200_v61 = vrot.slane %v1198_v55, 5  ;;  %v1278_v60 = vshll.u32 %v5271_v51, 16  ;;  %v1284_v36 = vshll.u32 %v5273_v54, 16  ;;  %v1288_v5 = vshrl.u32 %v5273_v54, 16  ;;  %v1166_v9 = vld [vmem:[%s6353_s3] sm:$0x3] }
 0x333   : > { %v1185_v43 = vor.u32 %v1184_v52, %v1181_v50  ;;  %v1195_v58 = vor.u32 %v1194_v53, %v1190_v56  ;;  %v1277_v63 = vrot.slane %v1275_v57, 4  ;;  %v1294_v0 = vshll.u32 %v5276_v59, 16  ;;  %v5285_v1 = vld [vmem:[#allocation2 + $0xc] sm:$0xf]  ;;  %4581 = vmatprep.subr.msk.bf16.mxu1 %vm409_vm0, %v1166_v9  ;;  %v5294_v11 = vld [vmem:[#allocation2 + $0x10] sm:$0xf] }
 0x334   : > { %v1280_v3 = vrot.slane %v1278_v60, 5  ;;  %v1286_v7 = vrot.slane %v1284_v36, 5  ;;  %v1290_v8 = vrot.slane %v1288_v5, 4  ;;  %v5296_v27 = vld [vmem:[#allocation2 + $0x14] sm:$0x1]  ;;  %v1203_v31 = vshrl.u32 %v5285_v1, 16 }
 0x335   : > { %v1186_v12 = vrot.slane %v1185_v43, 4  ;;  %v1196_v24 = vrot.slane %v1195_v58, 4  ;;  %v1296_v25 = vrot.slane %v1294_v0, 5  ;;  %v1206_v37 = vshll.u32 %v5285_v1, 16  ;;  %v5306_v33 = vld [vmem:[#allocation2 + $0x3c] sm:$0xf] }
 0x336   : > { %v1281_v22 = vor.u32 %v1280_v3, %v1277_v63  ;;  %v1291_v23 = vor.u32 %v1290_v8, %v1286_v7  ;;  %v1212_v6 = vshll.u32 %v5294_v11, 16  ;;  %v1216_v32 = vshrl.u32 %v5294_v11, 16  ;;  %v4076_v42 = vld [vmem:[%s6353_s3 + $0x4] sm:$0x3]  ;;  %v5313_v40 = vld [vmem:[#allocation2 + $0x40] sm:$0xf] }
 0x337   : > { %v1191_v4 = vsel %vm5289_vm15, %v1186_v12, %v1190_v56  ;;  %v1201_v41 = vsel %vm5289_vm15, %v1196_v24, %v1200_v61  ;;  %v1205_v30 = vrot.slane %v1203_v31, 4  ;;  %4582 = vmatprep.subr.msk.bf16.mxu0 %vm409_vm0, %v4076_v42  ;;  %v1208_v35 = vrot.slane %v1206_v37, 5  ;;  %v5323_v47 = vld [vmem:[#allocation2 + $0x44] sm:$0x1]  ;;  %v5326_v56 = vld [vmem:[#allocation2 + $0x18] sm:$0xf] }
 0x338   : > { %v4036_v13 = vcombine.low %v1191_v4, %v1201_v41  ;;  %v1282_v29 = vrot.slane %v1281_v22, 4  ;;  %v1292_v34 = vrot.slane %v1291_v23, 4  ;;  %v1214_v38 = vrot.slane %v1212_v6, 5  ;;  %v5334_v63 = vld [vmem:[#allocation2 + $0x1c] sm:$0xf] }
 0x339   : > { %v1218_v28 = vrot.slane %v1216_v32, 4  ;;  %v1222_v39 = vshll.u32 %v5296_v27, 16  ;;  %v5321_v46 = vsel %vm409_vm0, %v1166_v9, 0  ;;  %v1299_v48 = vshrl.u32 %v5306_v33, 16  ;;  %v5344_v23 = vld [vmem:[#allocation2 + $0x48] sm:$0xf] }
 0x33a   : > { %4413 = vmatprep.mubr.msk.bf16.mxu0 %vm384_vm6, %v4036_v13  ;;  %v1287_v62 = vsel %vm5289_vm15, %v1282_v29, %v1286_v7  ;;  %v1297_v45 = vsel %vm5289_vm15, %v1292_v34, %v1296_v25  ;;  %v1209_v50 = vor.u32 %v1208_v35, %v1205_v30  ;;  %v1302_v57 = vshll.u32 %v5306_v33, 16  ;;  %v5336_v7 = vld [vmem:[#allocation2 + $0x20] sm:$0x1]  ;;  %v5346_v6 = vld [vmem:[#allocation2 + $0x4c] sm:$0xf] }
 0x33b   : > { %v4040_v49 = vcombine.low %v1287_v62, %v1297_v45  ;;  %v1219_v55 = vor.u32 %v1218_v28, %v1214_v38  ;;  %v1224_v52 = vrot.slane %v1222_v39, 5  ;;  %v1301_v53 = vrot.slane %v1299_v48, 4  ;;  %v5351_v34 = vld [vmem:[#allocation2 + $0x50] sm:$0x1]  ;;  %v5356_v39 = vld [vmem:[#allocation2 + $0x24] sm:$0xf] }
 0x33c   : > { %v1308_v61 = vshll.u32 %v5313_v40, 16  ;;  %v1312_v60 = vshrl.u32 %v5313_v40, 16  ;;  %v1210_v36 = vrot.slane %v1209_v50, 4  ;;  %v1318_v43 = vshll.u32 %v5323_v47, 16  ;;  %v5361_v50 = vld [vmem:[%s6353_s3 + $0x8] sm:$0x3] }
 0x33d   : > { %4421 = vmatprep.mubr.msk.bf16.mxu1 %vm384_vm6, %v4040_v49  ;;  %v1220_v5 = vrot.slane %v1219_v55, 4  ;;  %v1818_v58 = vsel %vm409_vm0, %v4076_v42, 0  ;;  %v1304_v0 = vrot.slane %v1302_v57, 5  ;;  %v1227_v8 = vshrl.u32 %v5326_v56, 16 }
 0x33e   : > { %v1310_v9 = vrot.slane %v1308_v61, 5  ;;  %v1314_v3 = vrot.slane %v1312_v60, 4  ;;  %v1215_v12 = vsel %vm5289_vm15, %v1210_v36, %v1214_v38  ;;  %v1320_v25 = vrot.slane %v1318_v43, 5  ;;  %v5370_v43 = vld [vmem:[#allocation2 + $0x28] sm:$0xf] }
 0x33f   : > { %v1225_v24 = vsel %vm5289_vm15, %v1220_v5, %v1224_v52  ;;  %v1230_v22 = vshll.u32 %v5326_v56, 16  ;;  %v1305_v37 = vor.u32 %v1304_v0, %v1301_v53  ;;  %v1229_v41 = vrot.slane %v1227_v8, 4 }
 0x340   : > { %v4037_v31 = vcombine.low %v1215_v12, %v1225_v24  ;;  %v1315_v4 = vor.u32 %v1314_v3, %v1310_v9  ;;  %v1236_v42 = vshll.u32 %v5334_v63, 16  ;;  %v1240_v13 = vshrl.u32 %v5334_v63, 16  ;;  %v5377_v12 = vld [vmem:[#allocation2 + $0x54] sm:$0xf]  ;;  %v5382_v24 = vld [vmem:[%s6353_s3 + $0x6] sm:$0x3] }
 0x341   : > { %v1232_v32 = vrot.slane %v1230_v22, 5  ;;  %v1246_v29 = vshll.u32 %v5336_v7, 16  ;;  %v1306_v30 = vrot.slane %v1305_v37, 4  ;;  %v1323_v38 = vshrl.u32 %v5344_v23, 16 }
 0x342   : > { %4414 = vmatmul.mubr.msk.bf16.vlgmr.msra.gmra.mxu0 %vm384_vm6, %v4037_v31  ;;  %v1316_v35 = vrot.slane %v1315_v4, 4  ;;  %v1326_v28 = vshll.u32 %v5344_v23, 16  ;;  %v1238_v45 = vrot.slane %v1236_v42, 5  ;;  %v1242_v48 = vrot.slane %v1240_v13, 4  ;;  %v5388_v4 = vld [vmem:[#allocation2 + $0x58] sm:$0xf] }
 0x343   : > { %4448 = vmatpush3.bf16.msra.mxu0 %v1818_v58  ;;  %v1233_v62 = vor.u32 %v1232_v32, %v1229_v41  ;;  %v1248_v49 = vrot.slane %v1246_v29, 5  ;;  %v1311_v55 = vsel %vm5289_vm15, %v1306_v30, %v1310_v9  ;;  %v1325_v53 = vrot.slane %v1323_v38, 4  ;;  %v5372_v58 = vld [vmem:[#allocation2 + $0x2c] sm:$0x1] }
 0x344   : > { %v1321_v52 = vsel %vm5289_vm15, %v1316_v35, %v1320_v25  ;;  %v1328_v57 = vrot.slane %v1326_v28, 5  ;;  %4584 = vmatprep.subr.msk.bf16.mxu0 %vm409_vm0, %v5361_v50  ;;  %v1243_v36 = vor.u32 %v1242_v48, %v1238_v45  ;;  %v1332_v5 = vshll.u32 %v5346_v6, 16 }
 0x345   : > { %v4041_v61 = vcombine.low %v1311_v55, %v1321_v52  ;;  %v1234_v60 = vrot.slane %v1233_v62, 4  ;;  %v1336_v9 = vshrl.u32 %v5346_v6, 16  ;;  %v1342_v3 = vshll.u32 %v5351_v34, 16 }
 0x346   : > { %v1329_v0 = vor.u32 %v1328_v57, %v1325_v53  ;;  %v1251_v8 = vshrl.u32 %v5356_v39, 16  ;;  %vm1708_vm1 = vcmask 1042432   ;;  %v1244_v22 = vrot.slane %v1243_v36, 4  ;;  %v5400_v53 = vld [vmem:[#allocation2 + $0x5c] sm:$0x1] }
 0x347   : > { %4422 = vmatmul.mubr.msk.bf16.vlgmr.msra.gmra.mxu1 %vm384_vm6, %v4041_v61  ;;  %v1239_v25 = vsel %vm5289_vm15, %v1234_v60, %v1238_v45  ;;  %v1334_v31 = vrot.slane %v1332_v5, 5  ;;  %v1254_v37 = vshll.u32 %v5356_v39, 16  ;;  %v1338_v32 = vrot.slane %v1336_v9, 4  ;;  %v1684_v5 = vld [vmem:[#allocation2] sm:$0xe] }
 0x348   : > { %4430 = vmatpush3.bf16.msra.mxu1 %v5321_v46  ;;  %v1330_v41 = vrot.slane %v1329_v0, 4  ;;  %v1344_v42 = vrot.slane %v1342_v3, 5  ;;  %v1253_v13 = vrot.slane %v1251_v8, 4  ;;  %v1249_v29 = vsel %vm5289_vm15, %v1244_v22, %v1248_v49 }
 0x349   : > { %v1256_v30 = vrot.slane %v1254_v37, 5  ;;  %v1260_v35 = vshll.u32 %v5370_v43, 16  ;;  %v1264_v38 = vshrl.u32 %v5370_v43, 16  ;;  %4583 = vmatprep.subr.msk.bf16.mxu1 %vm409_vm0, %v5382_v24  ;;  %v4038_v28 = vcombine.low %v1239_v25, %v1249_v29 }
 0x34a   : > { %v1335_v62 = vsel %vm5289_vm15, %v1330_v41, %v1334_v31  ;;  %v1339_v46 = vor.u32 %v1338_v32, %v1334_v31  ;;  %v1270_v45 = vshll.u32 %v5372_v58, 16  ;;  %v1347_v49 = vshrl.u32 %v5377_v12, 16 }
 0x34b   : > { %v1257_v48 = vor.u32 %v1256_v30, %v1253_v13  ;;  %v1262_v55 = vrot.slane %v1260_v35, 5  ;;  %v1266_v52 = vrot.slane %v1264_v38, 4  ;;  %4417 = vmatprep.mubr.msk.bf16.mxu0 %vm384_vm6, %v4038_v28  ;;  %v1350_v60 = vshll.u32 %v5377_v12, 16  ;;  %v1685_v30 = vld [vmem:[#allocation2 + $0xc] sm:$0xe] }
 0x34c   : > { %v1340_v57 = vrot.slane %v1339_v46, 4  ;;  %v1272_v61 = vrot.slane %v1270_v45, 5  ;;  %v1356_v36 = vshll.u32 %v5388_v4, 16  ;;  %v1349_v3 = vrot.slane %v1347_v49, 4 }
 0x34d   : > { %v1258_v0 = vrot.slane %v1257_v48, 4  ;;  %v1267_v9 = vor.u32 %v1266_v52, %v1262_v55  ;;  %v1360_v8 = vshrl.u32 %v5388_v4, 16  ;;  %v1352_v22 = vrot.slane %v1350_v60, 5 }
 0x34e   : > { %v1345_v25 = vsel %vm5289_vm15, %v1340_v57, %v1344_v42  ;;  %v1358_v31 = vrot.slane %v1356_v36, 5  ;;  %v1366_v37 = vshll.u32 %v5400_v53, 16  ;;  %v1716_v35 = vrot.slane %v5264_v2, 5 }
 0x34f   : > { %v4042_v41 = vcombine.low %v1335_v62, %v1345_v25  ;;  %v1263_v32 = vsel %vm5289_vm15, %v1258_v0, %v1262_v55  ;;  %v1268_v13 = vrot.slane %v1267_v9, 4  ;;  %v1362_v29 = vrot.slane %v1360_v8, 4  ;;  %v1686_v55 = vld [vmem:[#allocation2 + $0x18] sm:$0xe] }
 0x350   : > { %v1353_v38 = vor.u32 %v1352_v22, %v1349_v3  ;;  %vm1709_vm2 = vcmask 1046532   ;;  %v4068_v28 = vrot.slane %v1684_v5, 9  ;;  %v1368_v45 = vrot.slane %v1366_v37, 5 }
 0x351   : > { %4425 = vmatprep.mubr.msk.bf16.mxu1 %vm384_vm6, %v4042_v41  ;;  %v1273_v42 = vsel %vm5289_vm15, %v1268_v13, %v1272_v61  ;;  %v1363_v46 = vor.u32 %v1362_v29, %v1358_v31  ;;  %vm5417_vm3 = vmor %vm1708_vm1, %vm1709_vm2  ;;  %v1713_v48 = vrot.slane %v5259_v44, 5  ;;  %v1723_v2 = vrot.slane %v5296_v27, 5  ;;  %v1687_v27 = vld [vmem:[#allocation2 + $0x24] sm:$0xe]  ;;  %v1688_v29 = vld [vmem:[#allocation2 + $0x30] sm:$0xe] }
 0x352   : > { %v4039_v52 = vcombine.low %v1263_v32, %v1273_v42  ;;  %v1354_v49 = vrot.slane %v1353_v38, 4  ;;  %v4069_v57 = vrot.slane %v1685_v30, 9  ;;  %v1720_v5 = vrot.slane %v5294_v11, 5 }
 0x353   : > { %v1364_v60 = vrot.slane %v1363_v46, 4  ;;  %v1714_v36 = vsel %vm5417_vm3, %v4068_v28, %v1713_v48  ;;  %v1715_v61 = vrot.slane %v1713_v48, 4  ;;  %v4052_v9 = vcombine.low %v5257_v26, %v5259_v44  ;;  %v1689_v46 = vld [vmem:[#allocation2 + $0x3c] sm:$0xe] }
 0x354   : > { %4418 = vmatmul.mubr.msk.bf16.gmra.mxu0 %vm384_vm6, %v4039_v52  ;;  %v1359_v0 = vsel %vm5289_vm15, %v1354_v49, %v1358_v31  ;;  %v4070_v3 = vrot.slane %v1686_v55, 9  ;;  %v1721_v22 = vsel %vm5417_vm3, %v4069_v57, %v1720_v5  ;;  %v1722_v37 = vrot.slane %v1720_v5, 4  ;;  %v1690_v57 = vld [vmem:[#allocation2 + $0x48] sm:$0xe] }
 0x355   : > { %v1369_v8 = vsel %vm5289_vm15, %v1364_v60, %v1368_v45  ;;  %v1717_v25 = vsel %vm5417_vm3, %v1715_v61, %v1716_v35  ;;  %v1727_v13 = vrot.slane %v5334_v63, 5  ;;  %v1730_v31 = vrot.slane %v5336_v7, 5  ;;  %v1691_v61 = vld [vmem:[#allocation2 + $0x54] sm:$0xe] }
 0x356   : > { %v4043_v41 = vcombine.low %v1359_v0, %v1369_v8  ;;  %v4077_v32 = vcombine.low %v1714_v36, %v1717_v25  ;;  %v1724_v26 = vsel %vm5417_vm3, %v1722_v37, %v1723_v2  ;;  %v4071_v44 = vrot.slane %v1687_v27, 9 }
 0x357   : > { %v1734_v30 = vrot.slane %v5370_v43, 5  ;;  %v4078_v35 = vcombine.low %v1721_v22, %v1724_v26  ;;  %v1728_v38 = vsel %vm5417_vm3, %v4070_v3, %v1727_v13  ;;  %v1729_v28 = vrot.slane %v1727_v13, 4 }
 0x358   : > { %4426 = vmatmul.mubr.msk.bf16.gmra.mxu1 %vm384_vm6, %v4043_v41  ;;  %4449 = vmatprep.mubr.msk.bf16.mxu0 %vm384_vm6, %v4077_v32  ;;  %v1737_v42 = vrot.slane %v5372_v58, 5  ;;  %v1744_v7 = vrot.slane %v5276_v59, 5  ;;  %v2016_v45 = vsel %vm409_vm0, %v5382_v24, 0  ;;  %v4072_v55 = vrot.slane %v1688_v29, 9  ;;  %v5482_v32 = vld [vmem:[#allocation2 + $0x10] sm:$0xf] }
 0x359   : > { %4431 = vmatprep.mubr.msk.bf16.mxu1 %vm384_vm6, %v4052_v9  ;;  %v1736_v48 = vrot.slane %v1734_v30, 4  ;;  %v2398_v2 = vsel %vm409_vm0, %v5361_v50, 0  ;;  %v1731_v52 = vsel %vm5417_vm3, %v1729_v28, %v1730_v31  ;;  %v1735_v49 = vsel %vm5417_vm3, %v4071_v44, %v1734_v30  ;;  %v5464_v50 = vld [vmem:[%s6353_s3 + $0xc] sm:$0x3]  ;;  %v5502_v29 = vld [vmem:[#allocation2 + $0x14] sm:$0x1] }
 0x35a   : > { %v1741_v58 = vrot.slane %v5273_v54, 5  ;;  %v4079_v59 = vcombine.low %v1728_v38, %v1731_v52  ;;  %v4073_v36 = vrot.slane %v1689_v46, 9  ;;  %v1748_v24 = vrot.slane %v5313_v40, 5  ;;  %v2134_v38 = vld [vmem:[#allocation2 + $0x18] sm:$0xf] }
 0x35b   : > { %v1738_v60 = vsel %vm5417_vm3, %v1736_v48, %v1737_v42  ;;  %v4053_v5 = vcombine.low %v5285_v1, %v5294_v11  ;;  %v1751_v3 = vrot.slane %v5323_v47, 5  ;;  %v4054_v27 = vcombine.low %v5326_v56, %v5334_v63  ;;  %v2131_v11 = vld [vmem:[#allocation2 + $0xc] sm:$0xf]  ;;  %v5487_v56 = vld [vmem:[%s6353_s3 + $0xa] sm:$0x3] }
 0x35c   : > { %4450 = vmatmul.mubr.msk.bf16.vlgmr.msra.gmra.mxu0 %vm384_vm6, %v4078_v35  ;;  %v1742_v0 = vsel %vm5417_vm3, %v4072_v55, %v1741_v58  ;;  %v1743_v9 = vrot.slane %v1741_v58, 4  ;;  %v4055_v8 = vcombine.low %v5356_v39, %v5370_v43  ;;  %v1750_v25 = vrot.slane %v1748_v24, 4  ;;  %v5524_v58 = vld [vmem:[#allocation2 + $0x20] sm:$0x1] }
 0x35d   : > { %4484 = vmatpush3.bf16.msra.mxu0 %v2398_v2  ;;  %4453 = vmatprep.mubr.msk.bf16.mxu0 %vm384_vm6, %v4079_v59  ;;  %v1755_v1 = vrot.slane %v5346_v6, 5  ;;  %v4080_v22 = vcombine.low %v1735_v49, %v1738_v60  ;;  %v4056_v37 = vcombine.low %v5271_v51, %v5273_v54  ;;  %v4074_v41 = vrot.slane %v1690_v57, 9 }
 0x35e   : > { %v1745_v47 = vsel %vm5417_vm3, %v1743_v9, %v1744_v7  ;;  %4586 = vmatprep.subr.msk.bf16.mxu0 %vm409_vm0, %v5464_v50  ;;  %v5493_v39 = vsel %vm5417_vm3, %v4073_v36, %v1748_v24  ;;  %v1758_v51 = vrot.slane %v5351_v34, 5  ;;  %v4075_v54 = vrot.slane %v1691_v61, 9 }
 0x35f   : > { %v4081_v63 = vcombine.low %v1742_v0, %v1745_v47  ;;  %v5499_v43 = vsel %vm5417_vm3, %v1750_v25, %v1751_v3  ;;  %v1757_v13 = vrot.slane %v1755_v1, 4  ;;  %v1762_v31 = vrot.slane %v5388_v4, 5  ;;  %v5538_v25 = vld [vmem:[#allocation2 + $0x28] sm:$0xf] }
 0x360   : > { %4432 = vmatmul.mubr.msk.bf16.vlgmr.msra.gmra.mxu1 %vm384_vm6, %v4053_v5  ;;  %v2156_v26 = vshrl.u32 %v2131_v11, 16  ;;  %v1765_v44 = vrot.slane %v5400_v53, 5  ;;  %v2159_v30 = vshll.u32 %v2131_v11, 16  ;;  %v2165_v34 = vshll.u32 %v5482_v32, 16  ;;  %v2137_v5 = vld [vmem:[#allocation2 + $0x24] sm:$0xf] }
 0x361   : > { %4466 = vmatpush3.bf16.msra.mxu1 %v2016_v45  ;;  %4435 = vmatprep.mubr.msk.bf16.mxu1 %vm384_vm6, %v4054_v27  ;;  %v2169_v35 = vshrl.u32 %v5482_v32, 16  ;;  %v4057_v28 = vcombine.low %v5306_v33, %v5313_v40  ;;  %v1756_v42 = vsel %vm5417_vm3, %v4074_v41, %v1755_v1  ;;  %v1764_v46 = vrot.slane %v1762_v31, 4  ;;  %v5514_v45 = vld [vmem:[#allocation2 + $0x1c] sm:$0xf] }
 0x362   : > { %v2158_v7 = vrot.slane %v2156_v26, 4  ;;  %4585 = vmatprep.subr.msk.bf16.mxu1 %vm409_vm0, %v5487_v56  ;;  %v2161_v53 = vrot.slane %v2159_v30, 5  ;;  %v5516_v48 = vrot.slane %v2165_v34, 5  ;;  %v2175_v2 = vshll.u32 %v5502_v29, 16 }
 0x363   : > { %v2171_v55 = vrot.slane %v2169_v35, 4  ;;  %v4082_v52 = vcombine.low %v5493_v39, %v5499_v43  ;;  %v1759_v49 = vsel %vm5417_vm3, %v1757_v13, %v1758_v51  ;;  %v2180_v57 = vshrl.u32 %v2134_v38, 16  ;;  %v5544_v51 = vld [vmem:[#allocation2 + $0x2c] sm:$0x1] }
 0x364   : > { %4454 = vmatmul.mubr.msk.bf16.gmra.mxu0 %vm384_vm6, %v4080_v22  ;;  %v2183_v59 = vshll.u32 %v2134_v38, 16  ;;  %v5529_v60 = vsel %vm5417_vm3, %v4075_v54, %v1762_v31  ;;  %v5533_v36 = vsel %vm5417_vm3, %v1764_v46, %v1765_v44  ;;  %v2162_v24 = vor.u32 %v2161_v53, %v2158_v7  ;;  %v2140_v44 = vld [vmem:[#allocation2 + $0x30] sm:$0xf]  ;;  %v5563_v46 = vld [vmem:[#allocation2 + $0x38] sm:$0x1] }
 0x365   : > { %4457 = vmatprep.mubr.msk.bf16.mxu0 %vm384_vm6, %v4081_v63  ;;  %v2172_v61 = vor.u32 %v2171_v55, %v5516_v48  ;;  %v2182_v0 = vrot.slane %v2180_v57, 4  ;;  %v2189_v3 = vshll.u32 %v5514_v45, 16  ;;  %v2193_v27 = vshrl.u32 %v5514_v45, 16  ;;  %v2143_v7 = vld [vmem:[#allocation2 + $0x3c] sm:$0xf] }
 0x366   : > { %v2185_v9 = vrot.slane %v2183_v59, 5  ;;  %v2163_v1 = vrot.slane %v2162_v24, 4  ;;  %v2177_v22 = vrot.slane %v2175_v2, 5  ;;  %v2199_v47 = vshll.u32 %v5524_v58, 16 }
 0x367   : > { %v2173_v11 = vrot.slane %v2172_v61, 4  ;;  %v5542_v63 = vrot.slane %v2189_v3, 5  ;;  %v2195_v39 = vrot.slane %v2193_v27, 4  ;;  %v2204_v54 = vshrl.u32 %v2137_v5, 16 }
 0x368   : > { %4436 = vmatmul.mubr.msk.bf16.gmra.mxu1 %vm384_vm6, %v4055_v8  ;;  %v2186_v41 = vor.u32 %v2185_v9, %v2182_v0  ;;  %v4058_v43 = vcombine.low %v5344_v23, %v5346_v6  ;;  %v4083_v13 = vcombine.low %v1756_v42, %v1759_v49  ;;  %v4059_v31 = vcombine.low %v5377_v12, %v5388_v4 }
 0x369   : > { %4439 = vmatprep.mubr.msk.bf16.mxu1 %vm384_vm6, %v4056_v37  ;;  %v2207_v26 = vshll.u32 %v2137_v5, 16  ;;  %v4084_v8 = vcombine.low %v5529_v60, %v5533_v36  ;;  %v2168_v30 = vsel %vm5289_vm15, %v2163_v1, %v5516_v48  ;;  %v2196_v34 = vor.u32 %v2195_v39, %v5542_v63  ;;  %v5557_v37 = vld [vmem:[#allocation2 + $0x34] sm:$0xf]  ;;  %v5570_v36 = vld [vmem:[#allocation2 + $0x40] sm:$0xf] }
 0x36a   : > { %v2206_v35 = vrot.slane %v2204_v54, 4  ;;  %v2178_v23 = vsel %vm5289_vm15, %v2173_v11, %v2177_v22  ;;  %v2213_v38 = vshll.u32 %v5538_v25, 16  ;;  %v2217_v42 = vshrl.u32 %v5538_v25, 16  ;;  %v5575_v1 = vld [vmem:[#allocation2 + $0x44] sm:$0x1] }
 0x36b   : > { %v2209_v6 = vrot.slane %v2207_v26, 5  ;;  %v2187_v53 = vrot.slane %v2186_v41, 4  ;;  %v2201_v48 = vrot.slane %v2199_v47, 5  ;;  %v2228_v55 = vshrl.u32 %v2140_v44, 16 }
 0x36c   : > { %4458 = vmatmul.mubr.msk.bf16.gmra.mxu0 %vm384_vm6, %v4082_v52  ;;  %v2231_v2 = vshll.u32 %v2140_v44, 16  ;;  %v5567_v57 = vrot.slane %v2213_v38, 5  ;;  %v2219_v59 = vrot.slane %v2217_v42, 4  ;;  %v2223_v60 = vshll.u32 %v5544_v51, 16 }
 0x36d   : > { %4461 = vmatprep.mubr.msk.bf16.mxu0 %vm384_vm6, %v4083_v13  ;;  %v2210_v49 = vor.u32 %v2209_v6, %v2206_v35  ;;  %v2197_v24 = vrot.slane %v2196_v34, 4  ;;  %v2230_v61 = vrot.slane %v2228_v55, 4  ;;  %v2237_v0 = vshll.u32 %v5557_v37, 16  ;;  %v5591_v34 = vld [vmem:[#allocation2 + $0x4c] sm:$0xf] }
 0x36e   : > { %v2233_v5 = vrot.slane %v2231_v2, 5  ;;  %v4111_v52 = vcombine.low %v2168_v30, %v2178_v23  ;;  %v2220_v3 = vor.u32 %v2219_v59, %v5567_v57  ;;  %v2241_v27 = vshrl.u32 %v5557_v37, 16  ;;  %v2146_v30 = vld [vmem:[#allocation2 + $0x48] sm:$0xf] }
 0x36f   : > { %v2211_v9 = vrot.slane %v2210_v49, 4  ;;  %v5581_v22 = vrot.slane %v2237_v0, 5  ;;  %v2247_v47 = vshll.u32 %v5563_v46, 16  ;;  %v2252_v41 = vshrl.u32 %v2143_v7, 16 }
 0x370   : > { %4440 = vmatmul.mubr.msk.bf16.gmra.mxu1 %vm384_vm6, %v4057_v28  ;;  %v2234_v11 = vor.u32 %v2233_v5, %v2230_v61  ;;  %v2221_v39 = vrot.slane %v2220_v3, 4  ;;  %v2225_v54 = vrot.slane %v2223_v60, 5  ;;  %v2243_v13 = vrot.slane %v2241_v27, 4  ;;  %v5608_v3 = vld [vmem:[#allocation2 + $0x58] sm:$0xf] }
 0x371   : > { %4443 = vmatprep.mubr.msk.bf16.mxu1 %vm384_vm6, %v4058_v43  ;;  %v2255_v26 = vshll.u32 %v2143_v7, 16  ;;  %v2192_v44 = vsel %vm5289_vm15, %v2187_v53, %v5542_v63  ;;  %v2202_v33 = vsel %vm5289_vm15, %v2197_v24, %v2201_v48  ;;  %v2254_v40 = vrot.slane %v2252_v41, 4  ;;  %v4741_v53 = vld [vmem:[#allocation2 + $0xc] sm:$0xff]   ;;  %v2149_v24 = vld [vmem:[#allocation2 + $0x54] sm:$0xf] }
 0x372   : > { %v2261_v28 = vshll.u32 %v5570_v36, 16  ;;  %v2216_v43 = vsel %vm5289_vm15, %v2211_v9, %v5567_v57  ;;  %v2244_v35 = vor.u32 %v2243_v13, %v5581_v22  ;;  %v2265_v6 = vshrl.u32 %v5570_v36, 16 }
 0x373   : > { %v2257_v23 = vrot.slane %v2255_v26, 5  ;;  %v2235_v63 = vrot.slane %v2234_v11, 4  ;;  %v2249_v38 = vrot.slane %v2247_v47, 5  ;;  %v2271_v7 = vshll.u32 %v5575_v1, 16 }
 0x374   : > { %4462 = vmatmul.mubr.msk.bf16.gmra.mxu0 %vm384_vm6, %v4084_v8  ;;  %v5599_v42 = vrot.slane %v2261_v28, 5  ;;  %v2226_v48 = vsel %vm5289_vm15, %v2221_v39, %v2225_v54  ;;  %v2267_v2 = vrot.slane %v2265_v6, 4  ;;  %v2276_v49 = vshrl.u32 %v2146_v30, 16 }
 0x375   : > { %4485 = vmatprep.mubr.msk.bf16.mxu0 %vm384_vm6, %v4111_v52  ;;  %v2258_v55 = vor.u32 %v2257_v23, %v2254_v40  ;;  %v2245_v57 = vrot.slane %v2244_v35, 4  ;;  %v2279_v59 = vshll.u32 %v2146_v30, 16  ;;  %v2285_v60 = vshll.u32 %v5591_v34, 16  ;;  %v5614_v52 = vld [vmem:[#allocation2 + $0x50] sm:$0x1]  ;;  %v4742_v35 = vld [vmem:[#allocation2 + $0x18] sm:$0xff]  }
 0x376   : > { %v2289_v8 = vshrl.u32 %v5591_v34, 16  ;;  %v4112_v61 = vcombine.low %v2192_v44, %v2202_v33  ;;  %v2268_v0 = vor.u32 %v2267_v2, %v5599_v42  ;;  %v2273_v9 = vrot.slane %v2271_v7, 5  ;;  %v2152_v40 = vld [vmem:[#allocation2 + $0x60] sm:$0xf]  ;;  %v4743_v23 = vld [vmem:[#allocation2 + $0x24] sm:$0xff]  }
 0x377   : > { %v2259_v5 = vrot.slane %v2258_v55, 4  ;;  %v2278_v27 = vrot.slane %v2276_v49, 4  ;;  %v2281_v11 = vrot.slane %v2279_v59, 5  ;;  %v5616_v47 = vrot.slane %v2285_v60, 5  ;;  %v5645_v55 = vld [vmem:[#allocation2 + $0x64] sm:$0xf] }
 0x378   : > { %4444 = vmatmul.mubr.msk.bf16.gmra.mxu1 %vm384_vm6, %v4059_v31  ;;  %v2291_v41 = vrot.slane %v2289_v8, 4  ;;  %v2851_v39 = vsel %vm409_vm0, %v5464_v50, 0  ;;  %v4113_v54 = vcombine.low %v2216_v43, %v2226_v48  ;;  %v2269_v13 = vrot.slane %v2268_v0, 4  ;;  %v5626_v31 = vld [vmem:[#allocation2 + $0x5c] sm:$0x1] }
 0x379   : > { %4467 = vmatprep.mubr.msk.bf16.mxu1 %vm384_vm6, %v4741_v53  ;;  %v2300_v26 = vshrl.u32 %v2149_v24, 16  ;;  %v2240_v12 = vsel %vm5289_vm15, %v2235_v63, %v5581_v22  ;;  %v2250_v4 = vsel %vm5289_vm15, %v2245_v57, %v2249_v38  ;;  %v2303_v44 = vshll.u32 %v2149_v24, 16  ;;  %v5637_v22 = vld [vmem:[%s6353_s3 + $0x10] sm:$0x3] }
 0x37a   : > { %v2309_v33 = vshll.u32 %v5608_v3, 16  ;;  %v2264_v50 = vsel %vm5289_vm15, %v2259_v5, %v5599_v42  ;;  %v2295_v28 = vshll.u32 %v5614_v52, 16  ;;  %v2313_v43 = vshrl.u32 %v5608_v3, 16 }
 0x37b   : > { %v2302_v30 = vrot.slane %v2300_v26, 4  ;;  %v2274_v6 = vsel %vm5289_vm15, %v2269_v13, %v2273_v9  ;;  %v2282_v63 = vor.u32 %v2281_v11, %v2278_v27  ;;  %v2292_v38 = vor.u32 %v2291_v41, %v5616_v47  ;;  %v5660_v26 = vld [vmem:[#allocation2 + $0x68] sm:$0x1] }
 0x37c   : > { %4486 = vmatmul.mubr.msk.bf16.vlgmr.msra.gmra.mxu0 %vm384_vm6, %v4112_v61  ;;  %v2305_v42 = vrot.slane %v2303_v44, 5  ;;  %v2311_v7 = vrot.slane %v2309_v33, 5  ;;  %v2315_v53 = vrot.slane %v2313_v43, 4  ;;  %v2319_v48 = vshll.u32 %v5626_v31, 16  ;;  %v5654_v61 = vld [vmem:[%s6353_s3 + $0xe] sm:$0x3] }
 0x37d   : > { %4520 = vmatpush3.bf16.msra.mxu0 %v2851_v39  ;;  %4489 = vmatprep.mubr.msk.bf16.mxu0 %vm384_vm6, %v4113_v54  ;;  %v2324_v2 = vshrl.u32 %v2152_v40, 16  ;;  %v2652_v49 = vsel %vm409_vm0, %v5487_v56, 0  ;;  %v2327_v59 = vshll.u32 %v2152_v40, 16  ;;  %v4114_v60 = vcombine.low %v2240_v12, %v2250_v4  ;;  %v4744_v44 = vld [vmem:[#allocation2 + $0x30] sm:$0xff]   ;;  %v4745_v40 = vld [vmem:[#allocation2 + $0x3c] sm:$0xff]  }
 0x37e   : > { %v2306_v57 = vor.u32 %v2305_v42, %v2302_v30  ;;  %4588 = vmatprep.subr.msk.bf16.mxu0 %vm409_vm0, %v5637_v22  ;;  %v2297_v8 = vrot.slane %v2295_v28, 5  ;;  %v2316_v24 = vor.u32 %v2315_v53, %v2311_v7  ;;  %v4115_v5 = vcombine.low %v2264_v50, %v2274_v6  ;;  %v2513_v6 = vld [vmem:[#allocation2 + $0xc] sm:$0xe] }
 0x37f   : > { %v2283_v0 = vrot.slane %v2282_v63, 4  ;;  %v2333_v9 = vshll.u32 %v5645_v55, 16  ;;  %v2337_v56 = vshrl.u32 %v5645_v55, 16  ;;  %v2293_v27 = vrot.slane %v2292_v38, 4  ;;  %v2514_v38 = vld [vmem:[#allocation2 + $0x18] sm:$0xe] }
 0x380   : > { %4468 = vmatmul.mubr.msk.bf16.vlgmr.msra.gmra.mxu1 %vm384_vm6, %v4742_v35  ;;  %v2321_v11 = vrot.slane %v2319_v48, 5  ;;  %v2326_v41 = vrot.slane %v2324_v2, 4  ;;  %v2329_v39 = vrot.slane %v2327_v59, 5  ;;  %v2307_v54 = vrot.slane %v2306_v57, 4 }
 0x381   : > { %4502 = vmatpush3.bf16.msra.mxu1 %v2652_v49  ;;  %4471 = vmatprep.mubr.msk.bf16.mxu1 %vm384_vm6, %v4743_v23  ;;  %v2317_v13 = vrot.slane %v2316_v24, 4  ;;  %v2335_v12 = vrot.slane %v2333_v9, 5  ;;  %v2339_v4 = vrot.slane %v2337_v56, 4  ;;  %v2288_v33 = vsel %vm5289_vm15, %v2283_v0, %v5616_v47  ;;  %v4747_v0 = vld [vmem:[#allocation2 + $0x54] sm:$0xff]  }
 0x382   : > { %4587 = vmatprep.subr.msk.bf16.mxu1 %vm409_vm0, %v5654_v61  ;;  %v2298_v50 = vsel %vm5289_vm15, %v2293_v27, %v2297_v8  ;;  %v2330_v28 = vor.u32 %v2329_v39, %v2326_v41  ;;  %v2343_v43 = vshll.u32 %v5660_v26, 16  ;;  %v2312_v35 = vsel %vm5289_vm15, %v2307_v54, %v2311_v7  ;;  %v4746_v8 = vld [vmem:[#allocation2 + $0x48] sm:$0xff]   ;;  %v2516_v41 = vld [vmem:[#allocation2 + $0x30] sm:$0xe]  ;;  %v4749_v54 = vld [vmem:[#allocation2 + $0x18] sm:$0xff]  }
 0x383   : > { %v2340_v30 = vor.u32 %v2339_v4, %v2335_v12  ;;  %v2322_v23 = vsel %vm5289_vm15, %v2317_v13, %v2321_v11  ;;  %v2547_v63 = vrot.slane %v5482_v32, 5  ;;  %v4116_v47 = vcombine.low %v2288_v33, %v2298_v50  ;;  %v2966_v50 = vld [vmem:[#allocation2 + $0x18] sm:$0xf] }
 0x384   : > { %4490 = vmatmul.mubr.msk.bf16.gmra.mxu0 %vm384_vm6, %v4114_v60  ;;  %v2554_v42 = vrot.slane %v5514_v45, 5  ;;  %v4117_v53 = vcombine.low %v2312_v35, %v2322_v23  ;;  %v2331_v48 = vrot.slane %v2330_v28, 4  ;;  %v2345_v49 = vrot.slane %v2343_v43, 5 }
 0x385   : > { %4493 = vmatprep.mubr.msk.bf16.mxu0 %vm384_vm6, %v4115_v5  ;;  %v2341_v2 = vrot.slane %v2340_v30, 4  ;;  %v4127_v57 = vrot.slane %v2513_v6, 9  ;;  %v2549_v7 = vrot.slane %v2547_v63, 4  ;;  %v2550_v59 = vrot.slane %v5502_v29, 5  ;;  %v2515_v5 = vld [vmem:[#allocation2 + $0x24] sm:$0xe] }
 0x386   : > { %v4128_v60 = vrot.slane %v2514_v38, 9  ;;  %v2556_v32 = vrot.slane %v2554_v42, 4  ;;  %v2557_v24 = vrot.slane %v5524_v58, 5  ;;  %v2561_v45 = vrot.slane %v5538_v25, 5  ;;  %v2520_v38 = vld [vmem:[#allocation2 + $0x60] sm:$0xe] }
 0x387   : > { %v2336_v9 = vsel %vm5289_vm15, %v2331_v48, %v2335_v12  ;;  %v2346_v56 = vsel %vm5289_vm15, %v2341_v2, %v2345_v49  ;;  %v2548_v29 = vsel %vm5417_vm3, %v4127_v57, %v2547_v63  ;;  %v2551_v27 = vsel %vm5417_vm3, %v2549_v7, %v2550_v59  ;;  %v2519_v63 = vld [vmem:[#allocation2 + $0x54] sm:$0xe] }
 0x388   : > { %4472 = vmatmul.mubr.msk.bf16.gmra.mxu1 %vm384_vm6, %v4744_v44  ;;  %v5695_v58 = vsel %vm5417_vm3, %v4128_v60, %v2554_v42  ;;  %v4129_v25 = vrot.slane %v2515_v5, 9  ;;  %v2564_v11 = vrot.slane %v5544_v51, 5  ;;  %v4118_v39 = vcombine.low %v2336_v9, %v2346_v56  ;;  %v2517_v44 = vld [vmem:[#allocation2 + $0x3c] sm:$0xe]  ;;  %v4750_v5 = vld [vmem:[#allocation2 + $0x24] sm:$0xff]  }
 0x389   : > { %4475 = vmatprep.mubr.msk.bf16.mxu1 %vm384_vm6, %v4745_v40  ;;  %v5701_v13 = vsel %vm5417_vm3, %v2556_v32, %v2557_v24  ;;  %v2563_v12 = vrot.slane %v2561_v45, 4  ;;  %v2568_v4 = vrot.slane %v5557_v37, 5  ;;  %v5707_v33 = vsel %vm409_vm0, %v5654_v61, 0  ;;  %v2518_v40 = vld [vmem:[#allocation2 + $0x48] sm:$0xe] }
 0x38a   : > { %v5711_v51 = vsel %vm409_vm0, %v5637_v22, 0  ;;  %v4136_v28 = vcombine.low %v2548_v29, %v2551_v27  ;;  %v4130_v30 = vrot.slane %v2516_v41, 9  ;;  %v2575_v43 = vrot.slane %v5570_v36, 5  ;;  %v5715_v37 = vld [vmem:[#allocation2 + $0x1c] sm:$0xf] }
 0x38b   : > { %v2582_v35 = vrot.slane %v5591_v34, 5  ;;  %v4137_v23 = vcombine.low %v5695_v58, %v5701_v13  ;;  %v5721_v61 = vsel %vm5417_vm3, %v4129_v25, %v2561_v45  ;;  %v2571_v22 = vrot.slane %v5563_v46, 5  ;;  %v4751_v45 = vld [vmem:[#allocation2 + $0x30] sm:$0xff]   ;;  %v2968_v27 = vld [vmem:[#allocation2 + $0x20] sm:$0x1] }
 0x38c   : > { %4494 = vmatmul.mubr.msk.bf16.gmra.mxu0 %vm384_vm6, %v4116_v47  ;;  %v4131_v6 = vrot.slane %v2517_v44, 9  ;;  %v4748_v47 = vld [vmem:[#allocation2 + $0x60] sm:$0xff]   ;;  %v5727_v36 = vsel %vm5417_vm3, %v2563_v12, %v2564_v11  ;;  %v2570_v34 = vrot.slane %v2568_v4, 4  ;;  %v2991_v42 = vshrl.u32 %v2966_v50, 16 }
 0x38d   : > { %4497 = vmatprep.mubr.msk.bf16.mxu0 %vm384_vm6, %v4117_v53  ;;  %v2994_v53 = vshll.u32 %v2966_v50, 16  ;;  %v2578_v48 = vrot.slane %v5575_v1, 5  ;;  %v4132_v2 = vrot.slane %v2518_v40, 9  ;;  %v3000_v46 = vshll.u32 %v5715_v37, 16  ;;  %v2969_v41 = vld [vmem:[#allocation2 + $0x24] sm:$0xf] }
 0x38e   : > { %v3004_v49 = vshrl.u32 %v5715_v37, 16  ;;  %v2577_v57 = vrot.slane %v2575_v43, 4  ;;  %v2584_v7 = vrot.slane %v2582_v35, 4  ;;  %v2585_v59 = vrot.slane %v5614_v52, 5 }
 0x38f   : > { %v2589_v60 = vrot.slane %v5608_v3, 5  ;;  %v5739_v32 = vsel %vm5417_vm3, %v4130_v30, %v2568_v4  ;;  %v4133_v24 = vrot.slane %v2519_v63, 9  ;;  %v4134_v1 = vrot.slane %v2520_v38, 9  ;;  %v5767_v4 = vld [vmem:[#allocation2 + $0x28] sm:$0xf] }
 0x390   : > { %4476 = vmatmul.mubr.msk.bf16.gmra.mxu1 %vm384_vm6, %v4746_v8  ;;  %v4138_v8 = vcombine.low %v5721_v61, %v5727_v36  ;;  %v2596_v52 = vrot.slane %v5645_v55, 5  ;;  %v2993_v3 = vrot.slane %v2991_v42, 4  ;;  %v2996_v9 = vrot.slane %v2994_v53, 5 }
 0x391   : > { %4479 = vmatprep.mubr.msk.bf16.mxu1 %vm384_vm6, %v4747_v0  ;;  %v5744_v0 = vsel %vm5417_vm3, %v2570_v34, %v2571_v22  ;;  %v5750_v56 = vsel %vm5417_vm3, %v4131_v6, %v2575_v43  ;;  %v5754_v29 = vsel %vm5417_vm3, %v4132_v2, %v2582_v35  ;;  %v5756_v25 = vrot.slane %v3000_v46, 5  ;;  %v2972_v43 = vld [vmem:[#allocation2 + $0x30] sm:$0xf]  ;;  %v5780_v6 = vld [vmem:[#allocation2 + $0x34] sm:$0xf]  ;;  %v4752_v46 = vld [vmem:[#allocation2 + $0x3c] sm:$0xff]  }
 0x392   : > { %v3006_v11 = vrot.slane %v3004_v49, 4  ;;  %v5760_v55 = vsel %vm5417_vm3, %v2577_v57, %v2578_v48  ;;  %v2592_v12 = vrot.slane %v5626_v31, 5  ;;  %v5771_v44 = vsel %vm5417_vm3, %v4133_v24, %v2589_v60 }
 0x393   : > { %v5775_v40 = vsel %vm5417_vm3, %v4134_v1, %v2596_v52  ;;  %v2599_v50 = vrot.slane %v5660_v26, 5  ;;  %v3382_v30 = vrot.slane %v5715_v37, 5  ;;  %v2598_v35 = vrot.slane %v2596_v52, 4 }
 0x394   : > { %4498 = vmatmul.mubr.msk.bf16.gmra.mxu0 %vm384_vm6, %v4118_v39  ;;  %v5764_v39 = vsel %vm5417_vm3, %v2584_v7, %v2585_v59  ;;  %v2997_v31 = vor.u32 %v2996_v9, %v2993_v3  ;;  %v3010_v61 = vshll.u32 %v2968_v27, 16  ;;  %v3015_v22 = vshrl.u32 %v2969_v41, 16  ;;  %v3349_v9 = vld [vmem:[#allocation2 + $0x24] sm:$0xe] }
 0x395   : > { %4521 = vmatprep.mubr.msk.bf16.mxu0 %vm384_vm6, %v4749_v54  ;;  %v2591_v54 = vrot.slane %v2589_v60, 4  ;;  %v3007_v63 = vor.u32 %v3006_v11, %v5756_v25  ;;  %v3024_v26 = vshll.u32 %v5767_v4, 16  ;;  %v3028_v37 = vshrl.u32 %v5767_v4, 16  ;;  %v4753_v60 = vld [vmem:[#allocation2 + $0x48] sm:$0xff]  }
 0x396   : > { %v3039_v38 = vshrl.u32 %v2972_v43, 16  ;;  %v3042_v42 = vshll.u32 %v2972_v43, 16  ;;  %v3384_v53 = vrot.slane %v3382_v30, 4  ;;  %v3385_v48 = vrot.slane %v2968_v27, 5  ;;  %v5838_v43 = vld [vmem:[#allocation2 + $0x40] sm:$0xf] }
 0x397   : > { %v5789_v36 = vsel %vm5417_vm3, %v2591_v54, %v2592_v12  ;;  %v3052_v2 = vshrl.u32 %v5780_v6, 16  ;;  %v5799_v49 = vsel %vm5417_vm3, %v2598_v35, %v2599_v50  ;;  %v2998_v57 = vrot.slane %v2997_v31, 4  ;;  %v2975_v54 = vld [vmem:[#allocation2 + $0x3c] sm:$0xf] }
 0x398   : > { %4480 = vmatmul.mubr.msk.bf16.gmra.mxu1 %vm384_vm6, %v4748_v47  ;;  %v3018_v47 = vshll.u32 %v2969_v41, 16  ;;  %v3012_v7 = vrot.slane %v3010_v61, 5  ;;  %v3017_v59 = vrot.slane %v3015_v22, 4  ;;  %v3008_v24 = vrot.slane %v3007_v63, 4 }
 0x399   : > { %4503 = vmatprep.mubr.msk.bf16.mxu1 %vm384_vm6, %v4136_v28  ;;  %v3348_v28 = vld [vmem:[#allocation2 + $0x18] sm:$0xe]  ;;  %v3030_v58 = vrot.slane %v3028_v37, 4  ;;  %v4139_v13 = vcombine.low %v5739_v32, %v5744_v0  ;;  %v3041_v52 = vrot.slane %v3039_v38, 4  ;;  %v3044_v3 = vrot.slane %v3042_v42, 5  ;;  %v4755_v38 = vld [vmem:[#allocation2 + $0x60] sm:$0xff]  }
 0x39a   : > { %v4186_v34 = vrot.slane %v3348_v28, 9  ;;  %v3020_v1 = vrot.slane %v3018_v47, 5  ;;  %v3054_v11 = vrot.slane %v3052_v2, 4  ;;  %v4141_v32 = vcombine.low %v5754_v29, %v5764_v39  ;;  %v3350_v47 = vld [vmem:[#allocation2 + $0x30] sm:$0xe] }
 0x39b   : > { %v4142_v0 = vcombine.low %v5771_v44, %v5789_v36  ;;  %v3003_v41 = vsel %vm5289_vm15, %v2998_v57, %v5756_v25  ;;  %v3013_v12 = vsel %vm5289_vm15, %v3008_v24, %v3012_v7  ;;  %v4187_v31 = vrot.slane %v3349_v9, 9  ;;  %v2978_v7 = vld [vmem:[#allocation2 + $0x48] sm:$0xf] }
 0x39c   : > { %4522 = vmatmul.mubr.msk.bf16.vlgmr.msra.gmra.mxu0 %vm384_vm6, %v4750_v5  ;;  %v5803_v5 = vrot.slane %v3024_v26, 5  ;;  %v3021_v50 = vor.u32 %v3020_v1, %v3017_v59  ;;  %v3389_v25 = vrot.slane %v5767_v4, 5  ;;  %v3045_v61 = vor.u32 %v3044_v3, %v3041_v52 }
 0x39d   : > { %4556 = vmatpush3.bf16.msra.mxu0 %v5711_v51  ;;  %4525 = vmatprep.mubr.msk.bf16.mxu0 %vm384_vm6, %v4751_v45  ;;  %v3048_v51 = vshll.u32 %v5780_v6, 16  ;;  %v5809_v45 = vld [vmem:[#allocation2 + $0x2c] sm:$0x1]  ;;  %v3063_v26 = vshrl.u32 %v2975_v54, 16  ;;  %v3066_v37 = vshll.u32 %v2975_v54, 16  ;;  %v5846_v42 = vcombine.low %v3003_v41, %v3013_v12 }
 0x39e   : > { %v3031_v28 = vor.u32 %v3030_v58, %v5803_v5  ;;  %v3076_v4 = vshrl.u32 %v5838_v43, 16  ;;  %v3392_v57 = vrot.slane %v5809_v45, 5  ;;  %v5855_v59 = vsel %vm5417_vm3, %v4187_v31, %v3389_v25  ;;  %v3351_v54 = vld [vmem:[#allocation2 + $0x3c] sm:$0xe] }
 0x39f   : > { %v5819_v27 = vrot.slane %v3048_v51, 5  ;;  %v3022_v51 = vrot.slane %v3021_v50, 4  ;;  %v3046_v24 = vrot.slane %v3045_v61, 4  ;;  %v4188_v1 = vrot.slane %v3350_v47, 9 }
 0x3a0   : > { %4504 = vmatmul.mubr.msk.bf16.vlgmr.msra.gmra.mxu1 %vm384_vm6, %v4137_v23  ;;  %v4140_v23 = vcombine.low %v5750_v56, %v5760_v55  ;;  %v4143_v56 = vcombine.low %v5775_v40, %v5799_v49  ;;  %v5831_v55 = vld [vmem:[#allocation2 + $0x38] sm:$0x1]  ;;  %v3032_v2 = vrot.slane %v3031_v28, 4  ;;  %v3065_v52 = vrot.slane %v3063_v26, 4  ;;  %v4756_v26 = vld [vmem:[#allocation2 + $0x6c] sm:$0xff]  }
 0x3a1   : > { %4538 = vmatpush3.bf16.msra.mxu1 %v5707_v33  ;;  %4507 = vmatprep.mubr.msk.bf16.mxu1 %vm384_vm6, %v4138_v8  ;;  %v5813_v33 = vsel %vm5417_vm3, %v4186_v34, %v3382_v30  ;;  %v5817_v8 = vsel %vm5417_vm3, %v3384_v53, %v3385_v48  ;;  %v3034_v30 = vshll.u32 %v5809_v45, 16  ;;  %v3055_v22 = vor.u32 %v3054_v11, %v5819_v27  ;;  %v4754_v34 = vld [vmem:[#allocation2 + $0x54] sm:$0xff]   ;;  %v5861_v45 = vld [vmem:[#allocation2 + $0x44] sm:$0x1] }
 0x3a2   : > { %v4195_v35 = vcombine.low %v5813_v33, %v5817_v8  ;;  %v3058_v63 = vshll.u32 %v5831_v55, 16  ;;  %v3396_v53 = vrot.slane %v5780_v6, 5  ;;  %v3072_v48 = vshll.u32 %v5838_v43, 16  ;;  %v5857_v6 = vld [vmem:[#allocation2 + $0x4c] sm:$0xf] }
 0x3a3   : > { %v3056_v58 = vrot.slane %v3055_v22, 4  ;;  %v3068_v3 = vrot.slane %v3066_v37, 5  ;;  %v3399_v9 = vrot.slane %v5831_v55, 5  ;;  %v3078_v41 = vrot.slane %v3076_v4, 4 }
 0x3a4   : > { %4526 = vmatmul.mubr.msk.bf16.gmra.mxu0 %vm384_vm6, %v4752_v46  ;;  %v3036_v46 = vrot.slane %v3034_v30, 5  ;;  %v5863_v11 = vrot.slane %v3072_v48, 5  ;;  %v3087_v12 = vshrl.u32 %v2978_v7, 16  ;;  %v3090_v50 = vshll.u32 %v2978_v7, 16 }
 0x3a5   : > { %4529 = vmatprep.mubr.msk.bf16.mxu0 %vm384_vm6, %v4753_v60  ;;  %v3391_v60 = vrot.slane %v3389_v25, 4  ;;  %v3096_v28 = vshll.u32 %v5857_v6, 16  ;;  %v3100_v30 = vshrl.u32 %v5857_v6, 16  ;;  %v3027_v31 = vsel %vm5289_vm15, %v3022_v51, %v5803_v5 }
 0x3a6   : > { %v3037_v55 = vsel %vm5289_vm15, %v3032_v2, %v3036_v46  ;;  %v5879_v61 = vsel %vm5417_vm3, %v4188_v1, %v3396_v53  ;;  %v3051_v22 = vsel %vm5289_vm15, %v3046_v24, %v5819_v27  ;;  %v3069_v47 = vor.u32 %v3068_v3, %v3065_v52  ;;  %v3352_v46 = vld [vmem:[#allocation2 + $0x48] sm:$0xe] }
 0x3a7   : > { %v5875_v25 = vsel %vm5417_vm3, %v3391_v60, %v3392_v57  ;;  %v3082_v5 = vshll.u32 %v5861_v45, 16  ;;  %v3403_v27 = vrot.slane %v5838_v43, 5  ;;  %v3089_v48 = vrot.slane %v3087_v12, 4  ;;  %v2981_v57 = vld [vmem:[#allocation2 + $0x54] sm:$0xf] }
 0x3a8   : > { %4508 = vmatmul.mubr.msk.bf16.gmra.mxu1 %vm384_vm6, %v4139_v13  ;;  %v3060_v13 = vrot.slane %v3058_v63, 5  ;;  %v3092_v29 = vrot.slane %v3090_v50, 5  ;;  %v5901_v39 = vrot.slane %v3096_v28, 5  ;;  %v5903_v4 = vcombine.low %v3027_v31, %v3037_v55  ;;  %v5913_v60 = vld [vmem:[#allocation2 + $0x58] sm:$0xf] }
 0x3a9   : > { %4511 = vmatprep.mubr.msk.bf16.mxu1 %vm384_vm6, %v4140_v23  ;;  %v3398_v23 = vrot.slane %v3396_v53, 4  ;;  %v2980_v53 = vld [vmem:[#allocation2 + $0x50] sm:$0x1]  ;;  %v4196_v51 = vcombine.low %v5855_v59, %v5875_v25  ;;  %v3410_v43 = vrot.slane %v5857_v6, 5  ;;  %v3070_v36 = vrot.slane %v3069_v47, 4 }
 0x3aa   : > { %v3061_v63 = vsel %vm5289_vm15, %v3056_v58, %v3060_v13  ;;  %v3406_v7 = vrot.slane %v5861_v45, 5  ;;  %v3405_v1 = vrot.slane %v3403_v27, 4  ;;  %v3106_v58 = vshll.u32 %v2980_v53, 16  ;;  %v2984_v6 = vld [vmem:[#allocation2 + $0x60] sm:$0xf] }
 0x3ab   : > { %v5893_v37 = vsel %vm5417_vm3, %v3398_v23, %v3399_v9  ;;  %v5907_v2 = vcombine.low %v3051_v22, %v3061_v63  ;;  %v3093_v13 = vor.u32 %v3092_v29, %v3089_v48  ;;  %v4190_v3 = vrot.slane %v3352_v46, 9  ;;  %v5925_v9 = vld [vmem:[#allocation2 + $0x64] sm:$0xf] }
 0x3ac   : > { %4530 = vmatmul.mubr.msk.bf16.gmra.mxu0 %vm384_vm6, %v4754_v34  ;;  %v3079_v34 = vor.u32 %v3078_v41, %v5863_v11  ;;  %v4197_v44 = vcombine.low %v5879_v61, %v5893_v37  ;;  %v3413_v23 = vrot.slane %v2980_v53, 5  ;;  %v3412_v45 = vrot.slane %v3410_v43, 4  ;;  %v2986_v53 = vld [vmem:[#allocation2 + $0x68] sm:$0x1] }
 0x3ad   : > { %4533 = vmatprep.mubr.msk.bf16.mxu0 %vm384_vm6, %v4755_v38  ;;  %v4189_v38 = vrot.slane %v3351_v54, 9  ;;  %v3111_v41 = vshrl.u32 %v2981_v57, 16  ;;  %v3114_v54 = vshll.u32 %v2981_v57, 16  ;;  %v3120_v12 = vshll.u32 %v5913_v60, 16  ;;  %v3354_v57 = vld [vmem:[#allocation2 + $0x60] sm:$0xe] }
 0x3ae   : > { %v3080_v24 = vrot.slane %v3079_v34, 4  ;;  %v3075_v50 = vsel %vm5289_vm15, %v3070_v36, %v5863_v11  ;;  %v3124_v33 = vshrl.u32 %v5913_v60, 16  ;;  %v3135_v8 = vshrl.u32 %v2984_v6, 16  ;;  %v2987_v36 = vld [vmem:[#allocation2 + $0x6c] sm:$0xf] }
 0x3af   : > { %v5918_v59 = vsel %vm5417_vm3, %v4189_v38, %v3403_v27  ;;  %v3144_v31 = vshll.u32 %v5925_v9, 16  ;;  %v3148_v55 = vshrl.u32 %v5925_v9, 16  ;;  %v3094_v11 = vrot.slane %v3093_v13, 4 }
 0x3b0   : > { %4512 = vmatmul.mubr.msk.bf16.gmra.mxu1 %vm384_vm6, %v4141_v32  ;;  %v3102_v32 = vrot.slane %v3100_v30, 4  ;;  %v3407_v30 = vsel %vm5417_vm3, %v3405_v1, %v3406_v7  ;;  %v3108_v61 = vrot.slane %v3106_v58, 5  ;;  %v3411_v40 = vsel %vm5417_vm3, %v4190_v3, %v3410_v43 }
 0x3b1   : > { %4515 = vmatprep.mubr.msk.bf16.mxu1 %vm384_vm6, %v4142_v0  ;;  %v3084_v0 = vrot.slane %v3082_v5, 5  ;;  %v3414_v49 = vsel %vm5417_vm3, %v3412_v45, %v3413_v23  ;;  %v3113_v22 = vrot.slane %v3111_v41, 4  ;;  %v3116_v63 = vrot.slane %v3114_v54, 5 }
 0x3b2   : > { %v3103_v52 = vor.u32 %v3102_v32, %v5901_v39  ;;  %v5948_v47 = vrot.slane %v3120_v12, 5  ;;  %v3126_v5 = vrot.slane %v3124_v33, 4  ;;  %v3417_v37 = vrot.slane %v5913_v60, 5 }
 0x3b3   : > { %v3085_v28 = vsel %vm5289_vm15, %v3080_v24, %v3084_v0  ;;  %v3137_v34 = vrot.slane %v3135_v8, 4  ;;  %v4198_v27 = vcombine.low %v5918_v59, %v3407_v30  ;;  %v5953_v48 = vrot.slane %v3144_v31, 5  ;;  %v2988_v59 = vld [vmem:[#allocation2 + $0x70] sm:$0xf] }
 0x3b4   : > { %4534 = vmatmul.mubr.msk.bf16.gmra.mxu0 %vm384_vm6, %v4756_v26  ;;  %v3104_v25 = vrot.slane %v3103_v52, 4  ;;  %v3353_v26 = vld [vmem:[#allocation2 + $0x54] sm:$0xe]  ;;  %v4173_v38 = vcombine.low %v3075_v50, %v3085_v28  ;;  %v3150_v29 = vrot.slane %v3148_v55, 4  ;;  %v3099_v32 = vsel %vm5289_vm15, %v3094_v11, %v5901_v39 }
 0x3b5   : > { %4557 = vmatprep.mubr.msk.bf16.mxu0 %vm384_vm6, %v4195_v35  ;;  %v3138_v35 = vshll.u32 %v2984_v6, 16  ;;  %v4199_v0 = vcombine.low %v3411_v40, %v3414_v49  ;;  %v3117_v7 = vor.u32 %v3116_v63, %v3113_v22  ;;  %v4191_v60 = vrot.slane %v3353_v26, 9 }
 0x3b6   : > { %v3109_v46 = vsel %vm5289_vm15, %v3104_v25, %v3108_v61  ;;  %v3127_v1 = vor.u32 %v3126_v5, %v5948_v47  ;;  %v3154_v6 = vshll.u32 %v2986_v53, 16  ;;  %v3151_v39 = vor.u32 %v3150_v29, %v5953_v48  ;;  %v2989_v25 = vld [vmem:[#allocation2 + $0x74] sm:$0x1] }
 0x3b7   : > { %v4192_v13 = vrot.slane %v3354_v57, 9  ;;  %v3159_v52 = vshrl.u32 %v2987_v36, 16  ;;  %v3162_v3 = vshll.u32 %v2987_v36, 16  ;;  %v3168_v45 = vshll.u32 %v2988_v59, 16 }
 0x3b8   : > { %4516 = vmatmul.mubr.msk.bf16.gmra.mxu1 %vm384_vm6, %v4143_v56  ;;  %v2983_v56 = vld [vmem:[#allocation2 + $0x5c] sm:$0x1]  ;;  %v3172_v41 = vshrl.u32 %v2988_v59, 16  ;;  %v4174_v54 = vcombine.low %v3099_v32, %v3109_v46  ;;  %v3118_v12 = vrot.slane %v3117_v7, 4  ;;  %v3418_v33 = vsel %vm5417_vm3, %v4191_v60, %v3417_v37 }
 0x3b9   : > { %4539 = vmatprep.mubr.msk.bf16.mxu1 %vm384_vm6, %v5846_v42  ;;  %v3140_v42 = vrot.slane %v3138_v35, 5  ;;  %v3130_v43 = vshll.u32 %v2983_v56, 16  ;;  %v3420_v24 = vrot.slane %v2983_v56, 5  ;;  %v3128_v8 = vrot.slane %v3127_v1, 4  ;;  %v3355_v56 = vld [vmem:[#allocation2 + $0x6c] sm:$0xe] }
 0x3ba   : > { %v3156_v28 = vrot.slane %v3154_v6, 5  ;;  %v3152_v30 = vrot.slane %v3151_v39, 4  ;;  %v3161_v31 = vrot.slane %v3159_v52, 4  ;;  %v3164_v55 = vrot.slane %v3162_v3, 5 }
 0x3bb   : > { %v3141_v58 = vor.u32 %v3140_v42, %v3137_v34  ;;  %v3132_v50 = vrot.slane %v3130_v43, 5  ;;  %v3170_v61 = vrot.slane %v3168_v45, 5  ;;  %v3174_v40 = vrot.slane %v3172_v41, 4 }
 0x3bc   : > { %4558 = vmatmul.mubr.msk.bf16.vlgmr.msra.gmra.mxu0 %vm384_vm6, %v4196_v51  ;;  %v3424_v51 = vrot.slane %v5925_v9, 5  ;;  %v3427_v9 = vrot.slane %v2986_v53, 5  ;;  %v3431_v49 = vrot.slane %v2988_v59, 5  ;;  %v3123_v22 = vsel %vm5289_vm15, %v3118_v12, %v5948_v47 }
 0x3bd   : > { %4561 = vmatprep.mubr.msk.bf16.mxu0 %vm384_vm6, %v4197_v44  ;;  %v3419_v44 = vrot.slane %v3417_v37, 4  ;;  %v3142_v35 = vrot.slane %v3141_v58, 4  ;;  %v3133_v63 = vsel %vm5289_vm15, %v3128_v8, %v3132_v50  ;;  %v3157_v37 = vsel %vm5289_vm15, %v3152_v30, %v3156_v28 }
 0x3be   : > { %v3426_v23 = vrot.slane %v3424_v51, 4  ;;  %v3165_v42 = vor.u32 %v3164_v55, %v3161_v31  ;;  %v3175_v53 = vor.u32 %v3174_v40, %v3170_v61  ;;  %v4193_v47 = vrot.slane %v3355_v56, 9 }
 0x3bf   : > { %v3147_v26 = vsel %vm5289_vm15, %v3142_v35, %v5953_v48  ;;  %v3433_v29 = vrot.slane %v3431_v49, 4  ;;  %v3434_v32 = vrot.slane %v2989_v25, 5  ;;  %v4175_v46 = vcombine.low %v3123_v22, %v3133_v63 }
 0x3c0   : > { %4540 = vmatmul.mubr.msk.bf16.vlgmr.msra.gmra.mxu1 %vm384_vm6, %v5903_v4  ;;  %v3421_v4 = vsel %vm5417_vm3, %v3419_v44, %v3420_v24  ;;  %v3428_v11 = vsel %vm5417_vm3, %v3426_v23, %v3427_v9  ;;  %v4176_v43 = vcombine.low %v3147_v26, %v3157_v37  ;;  %v3166_v57 = vrot.slane %v3165_v42, 4 }
 0x3c1   : > { %4543 = vmatprep.mubr.msk.bf16.mxu1 %vm384_vm6, %v5907_v2  ;;  %v3425_v2 = vsel %vm5417_vm3, %v4192_v13, %v3424_v51  ;;  %v4200_v5 = vcombine.low %v3418_v33, %v3421_v4  ;;  %v3432_v51 = vsel %vm5417_vm3, %v4193_v47, %v3431_v49  ;;  %v3435_v36 = vsel %vm5417_vm3, %v3433_v29, %v3434_v32 }
 0x3c2   : > { %v4201_v34 = vcombine.low %v3425_v2, %v3428_v11  ;;  %v3171_v7 = vsel %vm5289_vm15, %v3166_v57, %v3170_v61 }
 0x3c4   : > { %4562 = vmatmul.mubr.msk.bf16.gmra.mxu0 %vm384_vm6, %v4198_v27  ;;  %v3178_v27 = vshll.u32 %v2989_v25, 16 }
 0x3c5   : > { %4565 = vmatprep.mubr.msk.bf16.mxu0 %vm384_vm6, %v4199_v0  ;;  %v4202_v0 = vcombine.low %v3432_v51, %v3435_v36 }
 0x3c6   : > { %v3180_v48 = vrot.slane %v3178_v27, 5 }
 0x3c8   : > { %4544 = vmatmul.mubr.msk.bf16.gmra.mxu1 %vm384_vm6, %v4173_v38  ;;  %v3176_v38 = vrot.slane %v3175_v53, 4 }
 0x3c9   : > { %4547 = vmatprep.mubr.msk.bf16.mxu1 %vm384_vm6, %v4174_v54 }
 0x3ca   : > { %v3181_v60 = vsel %vm5289_vm15, %v3176_v38, %v3180_v48 }
 0x3cb   : > { %v4177_v24 = vcombine.low %v3171_v7, %v3181_v60 }
 0x3cc   : > { %4566 = vmatmul.mubr.msk.bf16.gmra.mxu0 %vm384_vm6, %v4200_v5 }
 0x3cd   : > { %4569 = vmatprep.mubr.msk.bf16.mxu0 %vm384_vm6, %v4201_v34 }
 0x3d0   : > { %4548 = vmatmul.mubr.msk.bf16.gmra.mxu1 %vm384_vm6, %v4175_v46 }
 0x3d1   : > { %4551 = vmatprep.mubr.msk.bf16.mxu1 %vm384_vm6, %v4176_v43 }
 0x3d4   : > { %4570 = vmatmul.mubr.msk.bf16.gmra.mxu0 %vm384_vm6, %v4202_v0 }
 0x3d8   : > { %4552 = vmatmul.mubr.msk.bf16.gmra.mxu1 %vm384_vm6, %v4177_v24 }
 0x402   : > { %v4415_v59 = vpop.f32.mrf.mxu0 }
 0x404   : > { %v1457_v62 = vpop.f32.mrf.mxu0 }
 0x406   : > { %v4416_v58 = vpop.f32.mrf.mxu0 }
 0x407   : > { %v4423_v1 = vpop.f32.mrf.mxu1 }
 0x408   : > { %v1460_v39 = vpop.f32.mrf.mxu0 }
 0x409   : > { %v1489_v44 = vpop.f32.mrf.mxu1 }
 0x40b   : > { %v4424_v6 = vpop.f32.mrf.mxu1 }
 0x40d   : > { %v1492_v13 = vpop.f32.mrf.mxu1 }
 0x414   : > { %v4419_v52 = vpop.f32.mrf.mxu0 }
 0x416   : > { %v1473_v3 = vpop.f32.mrf.mxu0 }
 0x418   : > { %v4427_v23 = vpop.f32.mrf.mxu1  ;;  %v4420_v9 = vpop.f32.mrf.mxu0 }
 0x41a   : > { %v1505_v45 = vpop.f32.mrf.mxu1  ;;  %v1476_v10 = vpop.f32.mrf.mxu0 }
 0x41c   : > { %v4428_v41 = vpop.f32.mrf.mxu1  ;;  %v4451_v54 = vpop.f32.mrf.mxu0 }
 0x41e   : > { %v6004_v12 = vpop.f32.mrf.mxu1  ;;  %v1854_v50 = vpop.f32.mrf.mxu0 }
 0x420   : > { %v4433_v33 = vpop.f32.mrf.mxu1  ;;  %v4452_v8 = vpop.f32.mrf.mxu0 }
 0x421   : > { %v1630_v4 = vadd.f32 %v4433_v33, %v4415_v59 }
 0x422   : > { %v1621_v35 = vpop.f32.mrf.mxu1  ;;  %v1857_v28 = vpop.f32.mrf.mxu0 }
 0x423   : > { %v6006_v30 = vadd.f32 %v4451_v54, %v1630_v4  ;;  %v1622_v2 = vadd.f32 %v1621_v35, %v1457_v62 }
 0x424   : > { %v4434_v31 = vpop.f32.mrf.mxu1  ;;  %v4455_v55 = vpop.f32.mrf.mxu0 }
 0x425   : > { %v6008_v11 = vadd.f32 %v1854_v50, %v1622_v2  ;;  %v1633_v25 = vadd.f32 %v4434_v31, %v4416_v58 }
 0x426   : > { %v1624_v61 = vpop.f32.mrf.mxu1  ;;  %v1870_v40 = vpop.f32.mrf.mxu0 }
 0x427   : > { %v6010_v49 = vadd.f32 %v4452_v8, %v1633_v25  ;;  %v1625_v56 = vadd.f32 %v1624_v61, %v1460_v39 }
 0x428   : > { %v4437_v22 = vpop.f32.mrf.mxu1  ;;  %v4456_v63 = vpop.f32.mrf.mxu0 }
 0x429   : > { %v6012_v5 = vadd.f32 %v1857_v28, %v1625_v56  ;;  %v1646_v26 = vadd.f32 %v4437_v22, %v4419_v52 }
 0x42a   : > { %v1637_v37 = vpop.f32.mrf.mxu1  ;;  %v1873_v34 = vpop.f32.mrf.mxu0 }
 0x42b   : > { %v6014_v42 = vadd.f32 %v4455_v55, %v1646_v26  ;;  %v1638_v27 = vadd.f32 %v1637_v37, %v1473_v3 }
 0x42c   : > { %v4438_v53 = vpop.f32.mrf.mxu1  ;;  %v4459_v47 = vpop.f32.mrf.mxu0 }
 0x42d   : > { %v6016_v29 = vadd.f32 %v1870_v40, %v1638_v27  ;;  %v1649_v32 = vadd.f32 %v4438_v53, %v4420_v9 }
 0x42e   : > { %v1640_v46 = vpop.f32.mrf.mxu1  ;;  %v1886_v43 = vpop.f32.mrf.mxu0 }
 0x42f   : > { %v6018_v57 = vadd.f32 %v4456_v63, %v1649_v32  ;;  %v1641_v38 = vadd.f32 %v1640_v46, %v1476_v10 }
 0x430   : > { %v4441_v48 = vpop.f32.mrf.mxu1  ;;  %v4460_v51 = vpop.f32.mrf.mxu0 }
 0x431   : > { %v6020_v36 = vadd.f32 %v1873_v34, %v1641_v38  ;;  %v1662_v0 = vadd.f32 %v4441_v48, %v4423_v1 }
 0x432   : > { %v1653_v7 = vpop.f32.mrf.mxu1  ;;  %v1889_v60 = vpop.f32.mrf.mxu0 }
 0x433   : > { %v6022_v24 = vadd.f32 %v4459_v47, %v1662_v0  ;;  %v1654_v59 = vadd.f32 %v1653_v7, %v1489_v44 }
 0x434   : > { %v4442_v62 = vpop.f32.mrf.mxu1  ;;  %v4463_v58 = vpop.f32.mrf.mxu0 }
 0x435   : > { %v6024_v39 = vadd.f32 %v1886_v43, %v1654_v59  ;;  %v1665_v52 = vadd.f32 %v4442_v62, %v4424_v6 }
 0x436   : > { %v1656_v3 = vpop.f32.mrf.mxu1  ;;  %v1902_v9 = vpop.f32.mrf.mxu0 }
 0x437   : > { %v6026_v54 = vadd.f32 %v4460_v51, %v1665_v52  ;;  %v1657_v10 = vadd.f32 %v1656_v3, %v1492_v13 }
 0x438   : > { %v4445_v50 = vpop.f32.mrf.mxu1  ;;  %v4464_v33 = vpop.f32.mrf.mxu0 }
 0x439   : > { %v6028_v8 = vadd.f32 %v1889_v60, %v1657_v10  ;;  %v1678_v1 = vadd.f32 %v4445_v50, %v4427_v23 }
 0x43a   : > { %v1669_v4 = vpop.f32.mrf.mxu1  ;;  %v1905_v35 = vpop.f32.mrf.mxu0 }
 0x43b   : > { %v6030_v28 = vadd.f32 %v4463_v58, %v1678_v1  ;;  %v1670_v44 = vadd.f32 %v1669_v4, %v1505_v45 }
 0x43c   : > { %v4446_v2 = vpop.f32.mrf.mxu1  ;;  %v6032_v31 = vpop.f32.mrf.mxu0 }
 0x43d   : > { %v6034_v55 = vadd.f32 %v1902_v9, %v1670_v44  ;;  %v1681_v6 = vadd.f32 %v4446_v2, %v4428_v41 }
 0x43e   : > { %v1672_v25 = vpop.f32.mrf.mxu1  ;;  %v6036_v61 = vpop.f32.mrf.mxu0 }
 0x43f   : > { %v6038_v13 = vadd.f32 %v4464_v33, %v1681_v6  ;;  %v1673_v40 = vadd.f32 %v1672_v25, %v6004_v12 }
 0x440   : > { %v4469_v56 = vpop.f32.mrf.mxu1  ;;  %v6041_v23 = vpop.f32.mrf.mxu0 }
 0x441   : > { %6392 = vst [vmem:[#allocation11_spill] sm:$0xff] %v6038_v13  ;;  %v6043_v22 = vadd.f32 %v1905_v35, %v1673_v40 }
 0x442   : > { %v2052_v63 = vpop.f32.mrf.mxu1  ;;  %v6045_v45 = vpop.f32.mrf.mxu0 }
 0x443   : > { %6393 = vst [vmem:[#allocation12_spill] sm:$0xff] %v6043_v22 }
 0x444   : > { %v4470_v26 = vpop.f32.mrf.mxu1  ;;  %v6047_v37 = vpop.f32.mrf.mxu0 }
 0x446   : > { %v2055_v34 = vpop.f32.mrf.mxu1  ;;  %v6049_v41 = vpop.f32.mrf.mxu0 }
 0x448   : > { %v4473_v27 = vpop.f32.mrf.mxu1  ;;  %v6051_v53 = vpop.f32.mrf.mxu0 }
 0x44a   : > { %v2068_v47 = vpop.f32.mrf.mxu1  ;;  %v6053_v32 = vpop.f32.mrf.mxu0 }
 0x44c   : > { %v6055_v12 = vpop.f32.mrf.mxu1  ;;  %v6057_v46 = vpop.f32.mrf.mxu0 }
 0x44e   : > { %v6059_v43 = vpop.f32.mrf.mxu1  ;;  %v6061_v38 = vpop.f32.mrf.mxu0 }
 0x450   : > { %v6063_v48 = vpop.f32.mrf.mxu1  ;;  %v6065_v51 = vpop.f32.mrf.mxu0 }
 0x452   : > { %v6067_v0 = vpop.f32.mrf.mxu1  ;;  %v6069_v7 = vpop.f32.mrf.mxu0 }
 0x454   : > { %v6071_v60 = vpop.f32.mrf.mxu1  ;;  %v6073_v59 = vpop.f32.mrf.mxu0 }
 0x455   : > { %6394 = vst [vmem:[#allocation13_spill] sm:$0xff] %v6073_v59 }
 0x456   : > { %v6075_v62 = vpop.f32.mrf.mxu1  ;;  %v6077_v58 = vpop.f32.mrf.mxu0 }
 0x457   : > { %6395 = vst [vmem:[#allocation14_spill] sm:$0xff] %v6077_v58 }
 0x458   : > { %v6079_v52 = vpop.f32.mrf.mxu1  ;;  %v6081_v3 = vpop.f32.mrf.mxu0 }
 0x459   : > { %6396 = vst [vmem:[#allocation15_spill] sm:$0xff] %v6081_v3 }
 0x45a   : > { %v6083_v9 = vpop.f32.mrf.mxu1  ;;  %v6085_v10 = vpop.f32.mrf.mxu0 }
 0x45b   : > { %6397 = vst [vmem:[#allocation16_spill] sm:$0xff] %v6083_v9  ;;  %6398 = vst [vmem:[#allocation17_spill] sm:$0xff] %v6085_v10 }
 0x45c   : > { %v6087_v50 = vpop.f32.mrf.mxu1  ;;  %v4523_v33 = vpop.f32.mrf.mxu0 }
 0x45d   : > { %6399 = vst [vmem:[#allocation18_spill] sm:$0xff] %v6087_v50 }
 0x45e   : > { %v6089_v1 = vpop.f32.mrf.mxu1  ;;  %v2887_v4 = vpop.f32.mrf.mxu0 }
 0x45f   : > { %6400 = vst [vmem:[#allocation19_spill] sm:$0xff] %v6089_v1 }
 0x460   : > { %v4505_v35 = vpop.f32.mrf.mxu1  ;;  %v4524_v44 = vpop.f32.mrf.mxu0 }
 0x462   : > { %v2688_v2 = vpop.f32.mrf.mxu1  ;;  %v6091_v6 = vpop.f32.mrf.mxu0 }
 0x464   : > { %v4506_v25 = vpop.f32.mrf.mxu1  ;;  %v6093_v40 = vpop.f32.mrf.mxu0 }
 0x466   : > { %v2691_v19 = vpop.f32.mrf.mxu1  ;;  %v6095_v21 = vpop.f32.mrf.mxu0 }
 0x468   : > { %v4509_v15 = vpop.f32.mrf.mxu1  ;;  %v6097_v17 = vpop.f32.mrf.mxu0 }
 0x469   : > { %6401 = vst [vmem:[#allocation20_spill] sm:$0xff] %v6097_v17 }
 0x46a   : > { %v2704_v18 = vpop.f32.mrf.mxu1  ;;  %v6099_v20 = vpop.f32.mrf.mxu0 }
 0x46b   : > { %6402 = vst [vmem:[#allocation21_spill] sm:$0xff] %v6099_v20  ;;  %v2117_v20 = vadd.f32 %v4469_v56, %v6006_v30  ;;  %v2116_v56 = vadd.f32 %v2055_v34, %v6012_v5  ;;  %v2120_v34 = vadd.f32 %v6059_v43, %v6020_v36  ;;  %v2124_v36 = vadd.f32 %v6075_v62, %v6028_v8 }
 0x46c   : > { %v6101_v14 = vpop.f32.mrf.mxu1  ;;  %v6103_v16 = vpop.f32.mrf.mxu0 }
 0x46d   : > { %6403 = vst [vmem:[#allocation22_spill] sm:$0xff] %v6103_v16 }
 0x46e   : > { %v6105_v10 = vpop.f32.mrf.mxu1  ;;  %v6107_v3 = vpop.f32.mrf.mxu0 }
 0x46f   : > { %6404 = vst [vmem:[#allocation23_spill] sm:$0xff] %v6107_v3  ;;  %v2115_v3 = vadd.f32 %v2052_v63, %v6008_v11 }
 0x470   : > { %v6109_v1 = vpop.f32.mrf.mxu1  ;;  %v6111_v22 = vpop.f32.mrf.mxu0 }
 0x471   : > { %6405 = vst [vmem:[#allocation24_spill] sm:$0xff] %v6109_v1  ;;  %6406 = vst [vmem:[#allocation25_spill] sm:$0xff] %v6111_v22  ;;  %v2499_v22 = vadd.f32 %v6032_v31, %v2117_v20  ;;  %v2497_v30 = vadd.f32 %v6036_v61, %v2115_v3  ;;  %v2119_v20 = vadd.f32 %v2068_v47, %v6016_v29 }
 0x472   : > { %v6113_v50 = vpop.f32.mrf.mxu1  ;;  %v6115_v13 = vpop.f32.mrf.mxu0  ;;  %v2122_v61 = vadd.f32 %v6055_v12, %v6018_v57  ;;  %v2123_v57 = vadd.f32 %v6067_v0, %v6024_v39  ;;  %v2126_v12 = vadd.f32 %v6071_v60, %v6026_v54  ;;  %v2502_v39 = vadd.f32 %v6053_v32, %v2120_v34 }
 0x473   : > { %6407 = vst [vmem:[#allocation26_spill] sm:$0xff] %v6113_v50  ;;  %6408 = vst [vmem:[#allocation27_spill] sm:$0xff] %v6115_v13  ;;  %v2118_v13 = vadd.f32 %v4470_v26, %v6010_v49  ;;  %v2498_v26 = vadd.f32 %v6045_v45, %v2116_v56  ;;  %v2501_v45 = vadd.f32 %v6049_v41, %v2119_v20 }
 0x474   : > { %v6117_v58 = vpop.f32.mrf.mxu1  ;;  %v6119_v59 = vpop.f32.mrf.mxu0 }
 0x475   : > { %6409 = vst [vmem:[#allocation28_spill] sm:$0xff] %v6117_v58  ;;  %6410 = vst [vmem:[#allocation29_spill] sm:$0xff] %v6119_v59  ;;  %v2753_v59 = vadd.f32 %v4505_v35, %v2499_v22  ;;  %v2500_v63 = vadd.f32 %v6041_v23, %v2118_v13  ;;  %v2125_v13 = vadd.f32 %v6063_v48, %v6022_v24  ;;  %v6164_v24 = vld [vmem:[%s6354_s4] ss:$0 sm:$0xff] }
 0x476   : > { %v6122_v17 = vpop.f32.mrf.mxu1  ;;  %v6124_v16 = vpop.f32.mrf.mxu0  ;;  %v2752_v47 = vadd.f32 %v2691_v19, %v2498_v26  ;;  %v2504_v19 = vadd.f32 %v6051_v53, %v2122_v61  ;;  %v2755_v60 = vadd.f32 %v2704_v18, %v2501_v45  ;;  %v2505_v53 = vadd.f32 %v6061_v38, %v2123_v57  ;;  %v6415_v61 = vld [vmem:[#allocation20_spill] sm:$0xff] }
 0x477   : > { %6411 = vst [vmem:[#allocation30_spill] sm:$0xff] %v6124_v16  ;;  %v2952_v5 = vadd.f32 %v4523_v33, %v2753_v59  ;;  %v2754_v22 = vadd.f32 %v4506_v25, %v2500_v63  ;;  %v2507_v0 = vadd.f32 %v6057_v46, %v2125_v13  ;;  %v2508_v35 = vadd.f32 %v6065_v51, %v2126_v12 }
 0x478   : > { %v6127_v9 = vpop.f32.mrf.mxu1  ;;  %v6129_v1 = vpop.f32.mrf.mxu0  ;;  %v2951_v62 = vadd.f32 %v6091_v6, %v2752_v47  ;;  %v2758_v32 = vadd.f32 %v6101_v14, %v2504_v19  ;;  %v2954_v51 = vadd.f32 %v6095_v21, %v2755_v60 }
 0x479   : > { %6412 = vst [vmem:[#allocation31_spill] sm:$0xff] %v6127_v9  ;;  %6413 = vst [vmem:[#allocation32_spill] sm:$0xff] %v6129_v1  ;;  %v2121_v1 = vadd.f32 %v4473_v27, %v6014_v42  ;;  %v2751_v9 = vadd.f32 %v2688_v2, %v2497_v30  ;;  %v2953_v48 = vadd.f32 %v4524_v44, %v2754_v22 }
 0x47a   : > { %v6133_v50 = vpop.f32.mrf.mxu1  ;;  %v6135_v58 = vpop.f32.mrf.mxu0  ;;  %v2506_v44 = vadd.f32 %v6069_v7, %v2124_v36  ;;  %v2129_v30 = vadd.f32 %v6079_v52, %v6030_v28  ;;  %v2756_v7 = vadd.f32 %v6105_v10, %v2502_v39  ;;  %v2957_v28 = vadd.f32 %v6415_v61, %v2758_v32  ;;  %v6416_v52 = vld [vmem:[#allocation24_spill] sm:$0xff]  ;;  %v6419_v47 = vld [vmem:[#allocation26_spill] sm:$0xff] }
 0x47b   : > { %v2503_v29 = vadd.f32 %v6047_v37, %v2121_v1  ;;  %v2950_v27 = vadd.f32 %v2887_v4, %v2751_v9  ;;  %v6425_v32 = vld [vmem:[#allocation12_spill] sm:$0xff] }
 0x47c   : > { %v6139_v16 = vpop.f32.mrf.mxu1  ;;  %v4559_v11 = vpop.f32.mrf.mxu0 }
 0x47d   : > { %v2757_v54 = vadd.f32 %v4509_v15, %v2503_v29  ;;  %v6418_v29 = vld [vmem:[#allocation21_spill] sm:$0xff] }
 0x47e   : > { %v6144_v49 = vpop.f32.mrf.mxu1  ;;  %v3523_v31 = vpop.f32.mrf.mxu0 }
 0x47f   : > { %v2956_v38 = vadd.f32 %v6093_v40, %v2757_v54  ;;  %v2761_v40 = vadd.f32 %v6416_v52, %v2507_v0 }
 0x480   : > { %v4541_v42 = vpop.f32.mrf.mxu1  ;;  %v4560_v23 = vpop.f32.mrf.mxu0 }
 0x481   : > { %v3334_v3 = vadd.f32 %v4541_v42, %v2952_v5  ;;  %v6417_v42 = vld [vmem:[#allocation13_spill] sm:$0xff] }
 0x482   : > { %v3269_v37 = vpop.f32.mrf.mxu1  ;;  %v3526_v43 = vpop.f32.mrf.mxu0 }
 0x483   : > { %v3588_v41 = vadd.f32 %v4559_v11, %v3334_v3  ;;  %v3332_v59 = vadd.f32 %v3269_v37, %v2950_v27  ;;  %v2955_v27 = vadd.f32 %v6418_v29, %v2756_v7 }
 0x484   : > { %v4542_v9 = vpop.f32.mrf.mxu1  ;;  %v4563_v8 = vpop.f32.mrf.mxu0 }
 0x485   : > { %v6171_v33 = vadd.f32 %v6164_v24, %v3588_v41  ;;  %v3586_v1 = vadd.f32 %v3523_v31, %v3332_v59  ;;  %v3335_v4 = vadd.f32 %v4542_v9, %v2953_v48  ;;  %v6414_v31 = vld [vmem:[#allocation16_spill] sm:$0xff]  ;;  %v6421_v48 = vld [vmem:[#allocation22_spill] sm:$0xff] }
 0x486   : > { %v3272_v46 = vpop.f32.mrf.mxu1  ;;  %v3539_v15 = vpop.f32.mrf.mxu0  ;;  %v2127_v26 = vadd.f32 %v6414_v31, %v6034_v55  ;;  %v2759_v55 = vadd.f32 %v6419_v47, %v2505_v53  ;;  %v2960_v41 = vadd.f32 %v6421_v48, %v2761_v40  ;;  %v6422_v59 = vld [vmem:[#allocation28_spill] sm:$0xff]  ;;  %v6429_v31 = vld [vmem:[#allocation31_spill] sm:$0xff] }
 0x487   : > { %v4214_v18 = vmul.f32 -1.442695, %v6171_v33  ;;  %v6179_v2 = vadd.f32 %v6164_v24, %v3586_v1  ;;  %v3589_v6 = vadd.f32 %v4560_v23, %v3335_v4  ;;  %v3333_v25 = vadd.f32 %v3272_v46, %v2951_v62  ;;  %v6423_v1 = vld [vmem:[#allocation11_spill] sm:$0xff]  ;;  %v6424_v4 = vld [vmem:[#allocation18_spill] sm:$0xff] }
 0x488   : > { %v4545_v56 = vpop.f32.mrf.mxu1  ;;  %v4564_v14 = vpop.f32.mrf.mxu0  ;;  %v2511_v23 = vadd.f32 %v6417_v42, %v2129_v30  ;;  %v2762_v39 = vadd.f32 %v6422_v59, %v2508_v35  ;;  %v2130_v53 = vadd.f32 %v6424_v4, %v6423_v1  ;;  %v6426_v46 = vld [vmem:[#allocation19_spill] sm:$0xff]  ;;  %v6434_v59 = vld [vmem:[#allocation30_spill] sm:$0xff] }
 0x489   : > { %4757 = vpow2.f32 %v4214_v18  ;;  %v4212_v11 = vmul.f32 -1.442695, %v6179_v2  ;;  %v6188_v63 = vadd.f32 %v6164_v24, %v3589_v6  ;;  %v3587_v20 = vadd.f32 %v3526_v43, %v3333_v25  ;;  %v6420_v43 = vld [vmem:[#allocation14_spill] sm:$0xff]  ;;  %v6427_v18 = vld [vmem:[#allocation23_spill] sm:$0xff] }
 0x48a   : > { %v3338_v5 = vadd.f32 %v4545_v56, %v2956_v38  ;;  %v3285_v21 = vpop.f32.mrf.mxu1  ;;  %v3542_v22 = vpop.f32.mrf.mxu0  ;;  %v2509_v19 = vadd.f32 %v6420_v43, %v2127_v26  ;;  %v2958_v6 = vadd.f32 %v6427_v18, %v2759_v55  ;;  %v2765_v26 = vadd.f32 %v6429_v31, %v2511_v23 }
 0x48b   : > { %4759 = vpow2.f32 %v4212_v11  ;;  %v4215_v10 = vmul.f32 -1.442695, %v6188_v63  ;;  %v6196_v34 = vadd.f32 %v6164_v24, %v3587_v20  ;;  %v3336_v13 = vadd.f32 %v3285_v21, %v2954_v51  ;;  %v6430_v21 = vld [vmem:[#allocation15_spill] sm:$0xff] }
 0x48c   : > { %v3592_v3 = vadd.f32 %v4563_v8, %v3338_v5  ;;  %v4546_v45 = vpop.f32.mrf.mxu1  ;;  %v4567_v57 = vpop.f32.mrf.mxu0  ;;  %v2760_v20 = vadd.f32 %v6122_v17, %v2506_v44  ;;  %v2763_v42 = vadd.f32 %v6133_v50, %v2509_v19 }
 0x48d   : > { %4761 = vpow2.f32 %v4215_v10  ;;  %v4213_v12 = vmul.f32 -1.442695, %v6196_v34  ;;  %v3590_v36 = vadd.f32 %v3539_v15, %v3336_v13  ;;  %v3339_v37 = vadd.f32 %v4546_v45, %v2957_v28 }
 0x48e   : > { %v6206_v0 = vadd.f32 %v6164_v24, %v3592_v3  ;;  %v3288_v54 = vpop.f32.mrf.mxu1  ;;  %v3555_v60 = vpop.f32.mrf.mxu0  ;;  %v2128_v15 = vadd.f32 %v6426_v46, %v6425_v32  ;;  %v2512_v10 = vadd.f32 %v6430_v21, %v2130_v53  ;;  %v6432_v3 = vld [vmem:[#allocation27_spill] sm:$0xff]  ;;  %v6435_v46 = vld [vmem:[#allocation32_spill] sm:$0xff] }
 0x48f   : > { %4763 = vpow2.f32 %v4213_v12  ;;  %v6209_v9 = vadd.f32 %v6164_v24, %v3590_v36  ;;  %v3593_v8 = vadd.f32 %v4564_v14, %v3339_v37  ;;  %v3337_v62 = vadd.f32 %v3288_v54, %v2955_v27  ;;  %v6428_v14 = vld [vmem:[#allocation25_spill] sm:$0xff] }
 0x490   : > { %v4218_v35 = vmul.f32 -1.442695, %v6206_v0  ;;  %v4549_v25 = vpop.f32.mrf.mxu1  ;;  %v4568_v30 = vpop.f32.mrf.mxu0  ;;  %v2961_v11 = vadd.f32 %v6428_v14, %v2762_v39  ;;  %v2959_v45 = vadd.f32 %v6432_v3, %v2760_v20  ;;  %v2766_v36 = vadd.f32 %v6139_v16, %v2512_v10 }
 0x491   : > { %v4216_v38 = vmul.f32 -1.442695, %v6209_v9  ;;  %v6219_v51 = vadd.f32 %v6164_v24, %v3593_v8  ;;  %v3591_v7 = vadd.f32 %v3542_v22, %v3337_v62  ;;  %v3342_v56 = vadd.f32 %v4549_v25, %v2960_v41  ;;  %v6431_v22 = vld [vmem:[#allocation17_spill] sm:$0xff] }
 0x492   : > { %4765 = vpow2.f32 %v4218_v35  ;;  %v3301_v61 = vpop.f32.mrf.mxu1  ;;  %v3558_v28 = vpop.f32.mrf.mxu0  ;;  %v2510_v13 = vadd.f32 %v6431_v22, %v2128_v15  ;;  %v2962_v39 = vadd.f32 %v6434_v59, %v2763_v42  ;;  %v2965_v15 = vadd.f32 %v6435_v46, %v2766_v36 }
 0x493   : > { %4767 = vpow2.f32 %v4216_v38  ;;  %v4219_v52 = vmul.f32 -1.442695, %v6219_v51  ;;  %v6226_v40 = vadd.f32 %v6164_v24, %v3591_v7  ;;  %v3596_v5 = vadd.f32 %v4567_v57, %v3342_v56  ;;  %v6433_v57 = vld [vmem:[#allocation29_spill] sm:$0xff] }
 0x494   : > { %v3340_v29 = vadd.f32 %v3301_v61, %v2958_v6  ;;  %v4550_v17 = vpop.f32.mrf.mxu1  ;;  %v4571_v44 = vpop.f32.mrf.mxu0  ;;  %v2964_v12 = vadd.f32 %v6433_v57, %v2765_v26  ;;  %v2764_v54 = vadd.f32 %v6144_v49, %v2510_v13 }
 0x495   : > { %4769 = vpow2.f32 %v4219_v52  ;;  %v4217_v23 = vmul.f32 -1.442695, %v6226_v40  ;;  %v6233_v27 = vadd.f32 %v6164_v24, %v3596_v5  ;;  %v3343_v47 = vadd.f32 %v4550_v17, %v2961_v11 }
 0x496   : > { %v4758_v55 = vpop.eup %4757  ;;  %v3594_v37 = vadd.f32 %v3555_v60, %v3340_v29  ;;  %v3304_v43 = vpop.f32.mrf.mxu1  ;;  %v2963_v7 = vadd.f32 %v6135_v58, %v2764_v54 }
 0x497   : > { %v3675_v50 = vadd.f32 1.0, %v4758_v55  ;;  %4771 = vpow2.f32 %v4217_v23  ;;  %v4222_v19 = vmul.f32 -1.442695, %v6233_v27  ;;  %v3597_v48 = vadd.f32 %v4568_v30, %v3343_v47  ;;  %v3571_v4 = vpop.f32.mrf.mxu0 }
 0x498   : > { %v4760_v41 = vpop.eup %4759  ;;  %v6242_v8 = vadd.f32 %v6164_v24, %v3594_v37  ;;  %v3341_v62 = vadd.f32 %v3304_v43, %v2959_v45  ;;  %v4553_v1 = vpop.f32.mrf.mxu1  ;;  %v6436_v37 = vld [vmem:[#allocation5_spill] sm:$0xff] }
 0x499   : > { %4773 = vrcp.f32 %v3675_v50  ;;  %v3673_v16 = vadd.f32 1.0, %v4760_v41  ;;  %v6245_v60 = vadd.f32 %v6164_v24, %v3597_v48  ;;  %v3346_v53 = vadd.f32 %v4553_v1, %v2964_v12  ;;  %v4572_v20 = vpop.f32.mrf.mxu0 }
 0x49a   : > { %v4762_v32 = vpop.eup %4761  ;;  %4775 = vpow2.f32 %v4222_v19  ;;  %v4220_v18 = vmul.f32 -1.442695, %v6242_v8  ;;  %v3595_v6 = vadd.f32 %v3558_v28, %v3341_v62  ;;  %v3317_v49 = vpop.f32.mrf.mxu1  ;;  %v3739_v43 = vunpack.c.l.bf16 %v6436_v37 }
 0x49b   : > { %4777 = vrcp.f32 %v3673_v16  ;;  %v3676_v35 = vadd.f32 1.0, %v4762_v32  ;;  %v4223_v25 = vmul.f32 -1.442695, %v6245_v60  ;;  %v3600_v30 = vadd.f32 %v4571_v44, %v3346_v53  ;;  %v3574_v17 = vpop.f32.mrf.mxu0 }
 0x49c   : > { %v4764_v38 = vpop.eup %4763  ;;  %4779 = vpow2.f32 %v4220_v18  ;;  %v6252_v56 = vadd.f32 %v6164_v24, %v3595_v6  ;;  %v3344_v14 = vadd.f32 %v3317_v49, %v2962_v39  ;;  %v4554_v11 = vpop.f32.mrf.mxu1  ;;  %v6437_v39 = vld [vmem:[#allocation3_spill] sm:$0xff]  ;;  %v3740_v53 = vunpack.c.h.bf16 %v6436_v37 }
 0x49d   : > { %4781 = vrcp.f32 %v3676_v35  ;;  %v3674_v31 = vadd.f32 1.0, %v4764_v38  ;;  %v6255_v26 = vadd.f32 %v6164_v24, %v3600_v30  ;;  %v3347_v61 = vadd.f32 %v4554_v11, %v2965_v15  ;;  %v6438_v11 = vld [vmem:[#allocation9_spill] sm:$0xff] }
 0x49e   : > { %4783 = vpow2.f32 %v4223_v25  ;;  %v4221_v28 = vmul.f32 -1.442695, %v6252_v56  ;;  %v3598_v52 = vadd.f32 %v3571_v4, %v3344_v14  ;;  %v3320_v5 = vpop.f32.mrf.mxu1  ;;  %v3737_v54 = vunpack.c.l.bf16 %v6437_v39 }
 0x49f   : > { %v4766_v21 = vpop.eup %4765  ;;  %4785 = vrcp.f32 %v3674_v31  ;;  %v4226_v58 = vmul.f32 -1.442695, %v6255_v26  ;;  %v3601_v10 = vadd.f32 %v4572_v20, %v3347_v61  ;;  %v3345_v22 = vadd.f32 %v3320_v5, %v2963_v7 }
 0x4a0   : > { %v4768_v13 = vpop.eup %4767  ;;  %v3679_v42 = vadd.f32 1.0, %v4766_v21  ;;  %4787 = vpow2.f32 %v4221_v28  ;;  %v6260_v29 = vadd.f32 %v6164_v24, %v3598_v52  ;;  %v3738_v49 = vunpack.c.h.bf16 %v6437_v39  ;;  %v6439_v52 = vld [vmem:[#allocation7_spill] sm:$0xff] }
 0x4a1   : > { %v3677_v44 = vadd.f32 1.0, %v4768_v13  ;;  %4789 = vpow2.f32 %v4226_v58  ;;  %v6263_v23 = vadd.f32 %v6164_v24, %v3601_v10  ;;  %v3599_v47 = vadd.f32 %v3574_v17, %v3345_v22 }
 0x4a2   : > { %v4770_v55 = vpop.eup %4769  ;;  %4791 = vrcp.f32 %v3679_v42  ;;  %v4224_v3 = vmul.f32 -1.442695, %v6260_v29  ;;  %v3743_v20 = vunpack.c.l.bf16 %v6438_v11  ;;  %v3741_v5 = vunpack.c.l.bf16 %v6439_v52 }
 0x4a3   : > { %4793 = vrcp.f32 %v3677_v44  ;;  %v3680_v45 = vadd.f32 1.0, %v4770_v55  ;;  %v4227_v57 = vmul.f32 -1.442695, %v6263_v23  ;;  %v6268_v12 = vadd.f32 %v6164_v24, %v3599_v47 }
 0x4a4   : > { %v4772_v36 = vpop.eup %4771  ;;  %4795 = vpow2.f32 %v4224_v3  ;;  %v3744_v42 = vunpack.c.h.bf16 %v6438_v11 }
 0x4a5   : > { %4797 = vrcp.f32 %v3680_v45  ;;  %v3678_v50 = vadd.f32 1.0, %v4772_v36  ;;  %v4225_v19 = vmul.f32 -1.442695, %v6268_v12  ;;  %v3742_v45 = vunpack.c.h.bf16 %v6439_v52 }
 0x4a6   : > { %v4774_v48 = vpop.eup %4773  ;;  %4799 = vpow2.f32 %v4227_v57 }
 0x4a7   : > { %v4776_v41 = vpop.eup %4775  ;;  %v3723_v59 = vmul.f32 %v4774_v48, %v6171_v33  ;;  %4801 = vrcp.f32 %v3678_v50  ;;  %v6440_v48 = vld [vmem:[#allocation6_spill] sm:$0xff] }
 0x4a8   : > { %v4778_v62 = vpop.eup %4777  ;;  %v3683_v1 = vadd.f32 1.0, %v4776_v41  ;;  %4803 = vpow2.f32 %v4225_v19  ;;  %v3747_v41 = vunpack.c.l.bf16 %v6440_v48 }
 0x4a9   : > { %v4780_v24 = vpop.eup %4779  ;;  %v3755_v4 = vadd.f32 %v3739_v43, %v3723_v59  ;;  %v3721_v16 = vmul.f32 %v4778_v62, %v6179_v2 }
 0x4aa   : > { %v4782_v32 = vpop.eup %4781  ;;  %4805 = vrcp.f32 %v3683_v1  ;;  %v3681_v46 = vadd.f32 1.0, %v4780_v24  ;;  %v6441_v1 = vld [vmem:[#allocation4_spill] sm:$0xff] }
 0x4ab   : > { %v4784_v15 = vpop.eup %4783  ;;  %v4273_v18 = vpack.c.bf16 %v3755_v4, %v3755_v4  ;;  %v3753_v6 = vadd.f32 %v3737_v54, %v3721_v16  ;;  %v3724_v33 = vmul.f32 %v4782_v32, %v6188_v63  ;;  %v3745_v24 = vunpack.c.l.bf16 %v6441_v1 }
 0x4ac   : > { %v4786_v35 = vpop.eup %4785  ;;  %4807 = vrcp.f32 %v3681_v46  ;;  %v3684_v25 = vadd.f32 1.0, %v4784_v15  ;;  %v3748_v32 = vunpack.c.h.bf16 %v6440_v48 }
 0x4ad   : > { %v4788_v30 = vpop.eup %4787  ;;  %3835 = vst.msk [vmem:[%s4983_s16 + $0x8] sm:$0xf] %vm833_vm7, %v4273_v18  ;;  %v4271_v2 = vpack.c.bf16 %v3753_v6, %v3753_v6  ;;  %v3756_v38 = vadd.f32 %v3740_v53, %v3724_v33  ;;  %v3722_v7 = vmul.f32 %v4786_v35, %v6196_v34  ;;  %v3746_v6 = vunpack.c.h.bf16 %v6441_v1 }
 0x4ae   : > { %v4790_v14 = vpop.eup %4789  ;;  %4809 = vrcp.f32 %v3684_v25  ;;  %v3682_v31 = vadd.f32 1.0, %v4788_v30 }
 0x4af   : > { %v4792_v61 = vpop.eup %4791  ;;  %3833 = vst.msk [vmem:[%s4983_s16] sm:$0xf] %vm833_vm7, %v4271_v2  ;;  %v4274_v63 = vpack.c.bf16 %v3756_v38, %v3756_v38  ;;  %v3754_v28 = vadd.f32 %v3738_v49, %v3722_v7  ;;  %v3687_v21 = vadd.f32 1.0, %v4790_v14  ;;  %v6442_v49 = vld [vmem:[#allocation10_spill] sm:$0xff]  ;;  %v6443_v14 = vld [vmem:[#allocation8_spill] sm:$0xff] }
 0x4b0   : > { %v4794_v58 = vpop.eup %4793  ;;  %v3727_v10 = vmul.f32 %v4792_v61, %v6206_v0  ;;  %4811 = vrcp.f32 %v3682_v31  ;;  %v3751_v35 = vunpack.c.l.bf16 %v6442_v49  ;;  %v3749_v11 = vunpack.c.l.bf16 %v6443_v14 }
 0x4b1   : > { %v4796_v22 = vpop.eup %4795  ;;  %3836 = vst.msk [vmem:[%s4983_s16 + $0xc] sm:$0xf] %vm833_vm7, %v4274_v63  ;;  %v4272_v34 = vpack.c.bf16 %v3754_v28, %v3754_v28  ;;  %v3725_v13 = vmul.f32 %v4794_v58, %v6209_v9  ;;  %4813 = vrcp.f32 %v3687_v21  ;;  %v3750_v21 = vunpack.c.h.bf16 %v6443_v14 }
 0x4b2   : > { %v4798_v17 = vpop.eup %4797  ;;  %v3759_v44 = vadd.f32 %v3743_v20, %v3727_v10  ;;  %v3685_v47 = vadd.f32 1.0, %v4796_v22 }
 0x4b3   : > { %v4800_v55 = vpop.eup %4799  ;;  %3834 = vst.msk [vmem:[%s4983_s16 + $0x4] sm:$0xf] %vm833_vm7, %v4272_v34  ;;  %v3757_v3 = vadd.f32 %v3741_v5, %v3725_v13  ;;  %v3728_v0 = vmul.f32 %v4798_v17, %v6219_v51 }
 0x4b4   : > { %v4802_v57 = vpop.eup %4801  ;;  %v4277_v36 = vpack.c.bf16 %v3759_v44, %v3759_v44  ;;  %4815 = vrcp.f32 %v3685_v47  ;;  %v3688_v9 = vadd.f32 1.0, %v4800_v55 }
 0x4b5   : > { %v4804_v37 = vpop.eup %4803  ;;  %v4275_v43 = vpack.c.bf16 %v3757_v3, %v3757_v3  ;;  %v3760_v50 = vadd.f32 %v3744_v42, %v3728_v0  ;;  %v3726_v19 = vmul.f32 %v4802_v57, %v6226_v40 }
 0x4b6   : > { %3839 = vst.msk [vmem:[%s4983_s16 + $0x18] sm:$0xf] %vm833_vm7, %v4277_v36  ;;  %4817 = vrcp.f32 %v3688_v9  ;;  %v3686_v59 = vadd.f32 1.0, %v4804_v37 }
 0x4b7   : > { %v4806_v51 = vpop.eup %4805  ;;  %3837 = vst.msk [vmem:[%s4983_s16 + $0x10] sm:$0xf] %vm833_vm7, %v4275_v43  ;;  %v4278_v39 = vpack.c.bf16 %v3760_v50, %v3760_v50  ;;  %v3758_v54 = vadd.f32 %v3742_v45, %v3726_v19 }
 0x4b8   : > { %v3731_v62 = vmul.f32 %v4806_v51, %v6233_v27  ;;  %4819 = vrcp.f32 %v3686_v59 }
 0x4b9   : > { %v4808_v4 = vpop.eup %4807  ;;  %3840 = vst.msk [vmem:[%s4983_s16 + $0x1c] sm:$0xf] %vm833_vm7, %v4278_v39  ;;  %v4276_v40 = vpack.c.bf16 %v3758_v54, %v3758_v54 }
 0x4ba   : > { %v3763_v16 = vadd.f32 %v3747_v41, %v3731_v62  ;;  %v3729_v53 = vmul.f32 %v4808_v4, %v6242_v8 }
 0x4bb   : > { %v4810_v46 = vpop.eup %4809  ;;  %3838 = vst.msk [vmem:[%s4983_s16 + $0x14] sm:$0xf] %vm833_vm7, %v4276_v40 }
 0x4bc   : > { %v4281_v15 = vpack.c.bf16 %v3763_v16, %v3763_v16  ;;  %v3761_v18 = vadd.f32 %v3745_v24, %v3729_v53  ;;  %v3732_v27 = vmul.f32 %v4810_v46, %v6245_v60 }
 0x4bd   : > { %v4812_v33 = vpop.eup %4811 }
 0x4be   : > { %v4814_v25 = vpop.eup %4813  ;;  %3843 = vst.msk [vmem:[%s4983_s16 + $0x28] sm:$0xf] %vm833_vm7, %v4281_v15  ;;  %v4279_v8 = vpack.c.bf16 %v3761_v18, %v3761_v18  ;;  %v3764_v30 = vadd.f32 %v3748_v32, %v3732_v27  ;;  %v3730_v2 = vmul.f32 %v4812_v33, %v6252_v56  ;;  %v3752_v56 = vunpack.c.h.bf16 %v6442_v49 }
 0x4bf   : > { %v3735_v38 = vmul.f32 %v4814_v25, %v6255_v26 }
 0x4c0   : > { %3841 = vst.msk [vmem:[%s4983_s16 + $0x20] sm:$0xf] %vm833_vm7, %v4279_v8  ;;  %v4282_v7 = vpack.c.bf16 %v3764_v30, %v3764_v30  ;;  %v3762_v60 = vadd.f32 %v3746_v6, %v3730_v2 }
 0x4c1   : > { %v4816_v20 = vpop.eup %4815  ;;  %v3767_v31 = vadd.f32 %v3751_v35, %v3735_v38 }
 0x4c2   : > { %3844 = vst.msk [vmem:[%s4983_s16 + $0x2c] sm:$0xf] %vm833_vm7, %v4282_v7  ;;  %v4280_v61 = vpack.c.bf16 %v3762_v60, %v3762_v60  ;;  %v3733_v63 = vmul.f32 %v4816_v20, %v6260_v29 }
 0x4c3   : > { %v4818_v28 = vpop.eup %4817  ;;  %v4285_v26 = vpack.c.bf16 %v3767_v31, %v3767_v31 }
 0x4c4   : > { %3842 = vst.msk [vmem:[%s4983_s16 + $0x24] sm:$0xf] %vm833_vm7, %v4280_v61  ;;  %v3765_v52 = vadd.f32 %v3749_v11, %v3733_v63  ;;  %v3736_v5 = vmul.f32 %v4818_v28, %v6263_v23 }
 0x4c5   : > { %v4820_v58 = vpop.eup %4819  ;;  %3847 = vst.msk [vmem:[%s4983_s16 + $0x38] sm:$0xf] %vm833_vm7, %v4285_v26 }
 0x4c6   : > { %v4283_v10 = vpack.c.bf16 %v3765_v52, %v3765_v52  ;;  %v3768_v22 = vadd.f32 %v3752_v56, %v3736_v5  ;;  %v3734_v29 = vmul.f32 %v4820_v58, %v6268_v12 }
 0x4c8   : > { %3845 = vst.msk [vmem:[%s4983_s16 + $0x30] sm:$0xf] %vm833_vm7, %v4283_v10  ;;  %v4286_v34 = vpack.c.bf16 %v3768_v22, %v3768_v22  ;;  %v3766_v13 = vadd.f32 %v3750_v21, %v3734_v29 }
 0x4ca   : > { %3848 = vst.msk [vmem:[%s4983_s16 + $0x3c] sm:$0xf] %vm833_vm7, %v4286_v34  ;;  %v4284_v42 = vpack.c.bf16 %v3766_v13, %v3766_v13 }
 0x4cc   : > { %3846 = vst.msk [vmem:[%s4983_s16 + $0x34] sm:$0xf] %vm833_vm7, %v4284_v42 }
 0x4cd PF: > { %s15_s22 = sadd.s32 1, %s4859_s22   ;;  %s6444_s18 = smov %s4851_s20 }
 0x4ce   : > { %p12_p11 = scmp.ge.s32.totalorder %s15_s22, 6   ;;  %s6445_s19 = smov %s4855_s21 }
 0x4cf   : > { %s6446_s20 = smov %s6449_s23  ;;  %s6447_s21 = smov %s6453_s24 }
 0x4d0   :  { %14 = sbr.rel (!%p12_p11) target bundleno = 3 (0x3), region = 101 }

</bundles_post_ra>
